<compile_context>
chip_gen: v7x
topology: tpu7x:2x2x1
jax: 0.10.0
libtpu: 0.0.40
codegen_flags: <defaults>
</compile_context>

<pallas_src>
import functools

import jax
import jax.numpy as jnp
from jax.experimental import pallas as pl
from jax.experimental.pallas import tpu as pltpu


def _round_up(v: int, m: int) -> int:
    return -(-v // m) * m


def _silu(y):
    # y * sigmoid(y): exp and the approximate reciprocal both run on the EUP slot.
    return y * pl.reciprocal(1.0 + jnp.exp(-y), approx=True)


# -----------------------------------------------------------------------------
# Fused Bottleneck kernel: one grid step == one image (flattened padded grid).
# -----------------------------------------------------------------------------
def _bottleneck_kernel(xp_ref, w1_ref, b1_ref, w2_ref, b2_ref, mask_ref,
                       o_ref, y1_scr, *, deltas, margin, p2, add):
    """Refs (P2 = (H+2)*(W+2) flattened padded spatial grid):
       xp_ref  : (1, P2, C1p) f32   spatially padded NHWC input, flattened
       w1_ref  : (C1p, CHp)   bf16  1x1 conv weight, BN1 scale folded in
       b1_ref  : (1, CHp)     f32   BN1 folded bias
       w2_ref  : (9, CHp, C2p) bf16 3x3 conv taps, BN2 scale folded in
       b2_ref  : (1, C2p)     f32   BN2 folded bias
       mask_ref: (P2, 1)      f32   1.0 on interior pixels, 0.0 on the pad border
       o_ref   : (1, P2, C2p) f32   output on the padded grid (border rows discarded)
       y1_scr  : (P2 + 2*margin, CHp) f32 VMEM scratch for the hidden activation
    """
    chp = w1_ref.shape[1]
    xp = xp_ref[0]                                              # (P2, C1p) f32

    # ---- cv1: 1x1 conv (= matmul, bf16 MXU) + folded-BN bias + SiLU --------------
    y1 = jnp.dot(xp.astype(jnp.bfloat16), w1_ref[...],
                 preferred_element_type=jnp.float32)            # (P2, CHp) f32
    y1 = _silu(y1 + b1_ref[...]) * mask_ref[...]                # zero the pad border

    # Park y1 in a margin-padded scratch: every 3x3 tap becomes a constant row shift
    # of this buffer (no HBM im2col, no in-kernel reshape).
    zeros_m = jnp.zeros((margin, chp), jnp.float32)
    y1_scr[pl.ds(0, margin), :] = zeros_m
    y1_scr[pl.ds(margin + p2, margin), :] = zeros_m
    y1_scr[pl.ds(margin, p2), :] = y1

    # ---- cv2: 3x3 conv as 9 shifted matmuls accumulated in f32 -------------------
    acc = jnp.zeros((p2, w2_ref.shape[2]), jnp.float32)
    for t, d in enumerate(deltas):                              # statically unrolled
        lhs = y1_scr[pl.ds(margin + d, p2), :].astype(jnp.bfloat16)
        acc = acc + jnp.dot(lhs, w2_ref[t], preferred_element_type=jnp.float32)

    y2 = _silu(acc + b2_ref[...])
    if add:                                                     # residual in f32
        y2 = y2 + xp
    o_ref[0] = y2.astype(o_ref.dtype)


# -----------------------------------------------------------------------------
# Bottleneck forward (wrapper: layout + BN folding + weight packing only)
# -----------------------------------------------------------------------------
def bottleneck_forward(x, params, *, shortcut=True, g=1, eps=1e-5):
    """x: (N, C1, H, W) NCHW float. BatchNorm uses running stats (inference)."""
    assert g == 1  # TODO(synk): grouped conv (g>1) not implemented in Pallas.
    n, c1, h, w = x.shape
    w1 = params["cv1_w"]                       # (C_, C1, 1, 1)
    w2 = params["cv2_w"]                       # (C2, C_, 3, 3)
    c_ = w1.shape[0]
    c2 = w2.shape[0]
    add = shortcut and (c1 == c2)

    # Lane-dense (multiple-of-128) hidden / output channel counts.
    chp = _round_up(c_, 128)
    c2p = _round_up(c2, 128)
    c1p = c2p if add else c1                   # residual is read straight from xp

    hp, wp = h + 2, w + 2
    p2 = hp * wp                               # flattened padded spatial grid size
    margin = _round_up(wp + 1, 16)             # >= max |tap row shift| = W + 3

    # Fold BatchNorm (running stats): scale into the weight columns, bias separate.
    s1 = params["bn1_gamma"] * jax.lax.rsqrt(params["bn1_var"] + eps)
    b1 = params["bn1_beta"] - params["bn1_mean"] * s1
    s2 = params["bn2_gamma"] * jax.lax.rsqrt(params["bn2_var"] + eps)
    b2 = params["bn2_beta"] - params["bn2_mean"] * s2

    w1_mat = jnp.transpose(w1.reshape(c_, c1), (1, 0)) * s1[None, :]     # (C1, C_)
    w1_mat = jnp.pad(w1_mat, ((0, c1p - c1), (0, chp - c_))).astype(jnp.bfloat16)
    b1_row = jnp.pad(b1, (0, chp - c_)).reshape(1, chp).astype(jnp.float32)

    w2_taps = jnp.transpose(w2, (2, 3, 1, 0)).reshape(9, c_, c2) * s2[None, None, :]
    w2_taps = jnp.pad(w2_taps, ((0, 0), (0, chp - c_), (0, c2p - c2)))
    w2_taps = w2_taps.astype(jnp.bfloat16)
    b2_row = jnp.pad(b2, (0, c2p - c2)).reshape(1, c2p).astype(jnp.float32)

    # NCHW -> NHWC, zero-pad spatial by 1 (cv2 padding) and channels to C1p.
    xp = jnp.transpose(x, (0, 2, 3, 1)).astype(jnp.float32)
    xp = jnp.pad(xp, ((0, 0), (1, 1), (1, 1), (0, c1p - c1)))
    xp = xp.reshape(n, p2, c1p)

    # Interior mask: zeros the SiLU(bias) values the 1x1 conv would put on the border.
    hh = (jnp.arange(hp) >= 1) & (jnp.arange(hp) <= h)
    ww = (jnp.arange(wp) >= 1) & (jnp.arange(wp) <= w)
    mask = (hh[:, None] & ww[None, :]).astype(jnp.float32).reshape(p2, 1)

    # Per-tap row shifts on the flat padded grid.
    deltas = tuple((kh - 1) * wp + (kw - 1) for kh in range(3) for kw in range(3))

    # Per-grid-step VMEM budget -> explicit scoped-VMEM limit (defaults are 16/32 MiB).
    vmem_bytes = (2 * p2 * c1p * 4                     # x blocks (double-buffered)
                  + 2 * p2 * c2p * 4                   # out blocks (double-buffered)
                  + (p2 + 2 * margin) * chp * 4        # y1 scratch
                  + 2 * (c1p * chp + 9 * chp * c2p) * 2
                  + 2 * (chp + c2p) * 4 + p2 * 4       # biases + mask
                  + 6 * p2 * max(chp, c2p) * 4)        # live f32 temporaries headroom
    vmem_limit = int(min(max(vmem_bytes * 5 // 4, 32 << 20), 100 << 20))

    kernel = functools.partial(_bottleneck_kernel, deltas=deltas, margin=margin,
                               p2=p2, add=add)

    out_flat = pl.pallas_call(
        kernel,
        out_shape=jax.ShapeDtypeStruct((n, p2, c2p), jnp.float32),
        grid_spec=pltpu.PrefetchScalarGridSpec(
            num_scalar_prefetch=0,
            grid=(n,),
            in_specs=[
                pl.BlockSpec((1, p2, c1p), lambda i: (i, 0, 0)),    # x, image i
                pl.BlockSpec((c1p, chp), lambda i: (0, 0)),         # w1 (resident)
                pl.BlockSpec((1, chp), lambda i: (0, 0)),           # b1
                pl.BlockSpec((9, chp, c2p), lambda i: (0, 0, 0)),   # w2 taps
                pl.BlockSpec((1, c2p), lambda i: (0, 0)),           # b2
                pl.BlockSpec((p2, 1), lambda i: (0, 0)),            # border mask
            ],
            out_specs=pl.BlockSpec((1, p2, c2p), lambda i: (i, 0, 0)),
            scratch_shapes=[pltpu.VMEM((p2 + 2 * margin, chp), jnp.float32)],
        ),
        compiler_params=pltpu.CompilerParams(
            dimension_semantics=("parallel",),
            vmem_limit_bytes=vmem_limit,
        ),
    )(xp, w1_mat, b1_row, w2_taps, b2_row, mask)

    out = out_flat.reshape(n, hp, wp, c2p)[:, 1:h + 1, 1:w + 1, :c2]
    return jnp.transpose(out, (0, 3, 1, 2)).astype(x.dtype)


# -----------------------------------------------------------------------------
# Pure-JAX reference (lax conv) for the self-test
# -----------------------------------------------------------------------------
def bottleneck_ref(x, params, *, shortcut=True, g=1, eps=1e-5):
    def conv_bn_silu(z, wt, gamma, beta, mean, var, pad, groups):
        y = jax.lax.conv_general_dilated(
            z, wt, window_strides=(1, 1), padding=[(pad, pad), (pad, pad)],
            dimension_numbers=("NCHW", "OIHW", "NCHW"),
            feature_group_count=groups, precision=jax.lax.Precision.HIGHEST)
        s = gamma * jax.lax.rsqrt(var + eps)
        b = beta - mean * s
        y = y * s[None, :, None, None] + b[None, :, None, None]
        return y * jax.nn.sigmoid(y)

    y = conv_bn_silu(x, params["cv1_w"], params["bn1_gamma"], params["bn1_beta"],
                     params["bn1_mean"], params["bn1_var"], pad=0, groups=1)
    y = conv_bn_silu(y, params["cv2_w"], params["bn2_gamma"], params["bn2_beta"],
                     params["bn2_mean"], params["bn2_var"], pad=1, groups=g)
    add = shortcut and x.shape[1] == params["cv2_w"].shape[0]
    return x + y if add else y


if __name__ == "__main__":
    key = jax.random.PRNGKey(0)
    N, C1, H, W = 2, 4, 16, 16
    C2, e = 4, 0.5
    C_ = int(C2 * e)                           # hidden channels = 2

    ks = jax.random.split(key, 11)
    params = {
        "cv1_w": jax.random.normal(ks[0], (C_, C1, 1, 1), jnp.float32) * 0.5,
        "bn1_gamma": jax.random.uniform(ks[1], (C_,), jnp.float32, minval=0.5, maxval=1.5),
        "bn1_beta": jax.random.normal(ks[2], (C_,), jnp.float32) * 0.1,
        "bn1_mean": jax.random.normal(ks[3], (C_,), jnp.float32) * 0.1,
        "bn1_var": jax.random.uniform(ks[4], (C_,), jnp.float32, minval=0.5, maxval=1.5),
        "cv2_w": jax.random.normal(ks[5], (C2, C_, 3, 3), jnp.float32) * 0.2,
        "bn2_gamma": jax.random.uniform(ks[6], (C2,), jnp.float32, minval=0.5, maxval=1.5),
        "bn2_beta": jax.random.normal(ks[7], (C2,), jnp.float32) * 0.1,
        "bn2_mean": jax.random.normal(ks[8], (C2,), jnp.float32) * 0.1,
        "bn2_var": jax.random.uniform(ks[9], (C2,), jnp.float32, minval=0.5, maxval=1.5),
    }
    x = jax.random.normal(ks[10], (N, C1, H, W), jnp.float32)

    fwd = jax.jit(functools.partial(bottleneck_forward, shortcut=True, g=1))
    y = jax.block_until_ready(fwd(x, params))

    y_ref = bottleneck_ref(x, params, shortcut=True, g=1)
    assert y.shape == x.shape and y.dtype == x.dtype
    err = float(jnp.max(jnp.abs(y - y_ref)))
    # Tolerance accounts for bf16 MXU operands + EUP approx-reciprocal in SiLU.
    assert err < 5e-2, f"max abs err {err}"

    print("KERNEL_OK")
</pallas_src>

<mosaic_0001>
module attributes {stable_mosaic.version = 11 : i64} {
  func.func @_bottleneck_kernel(%arg0: i32, %arg1: memref<1x324x128xf32, #tpu.memory_space<vmem>>, %arg2: memref<128x128xbf16, #tpu.memory_space<vmem>>, %arg3: memref<1x128xf32, #tpu.memory_space<vmem>>, %arg4: memref<9x128x128xbf16, #tpu.memory_space<vmem>>, %arg5: memref<1x128xf32, #tpu.memory_space<vmem>>, %arg6: memref<324x1xf32, #tpu.memory_space<vmem>>, %arg7: memref<1x324x128xf32, #tpu.memory_space<vmem>>, %arg8: memref<388x128xf32, #tpu.memory_space<vmem>>) attributes {dimension_semantics = [#tpu.dimension_semantics<parallel>], iteration_bounds = array<i64: 2>, scalar_prefetch = 0 : i64, scratch_operands = 1 : i64, tpu.core_type = #tpu.core_type<tc>, window_params = [{transform_indices = @transform_0, window_bounds = array<i64: 1, 324, 128>}, {pipeline_mode = #tpu.pipeline_mode<synchronous>, transform_indices = @transform_1, window_bounds = array<i64: 128, 128>}, {pipeline_mode = #tpu.pipeline_mode<synchronous>, transform_indices = @transform_2, window_bounds = array<i64: 1, 128>}, {pipeline_mode = #tpu.pipeline_mode<synchronous>, transform_indices = @transform_3, window_bounds = array<i64: 9, 128, 128>}, {pipeline_mode = #tpu.pipeline_mode<synchronous>, transform_indices = @transform_4, window_bounds = array<i64: 1, 128>}, {pipeline_mode = #tpu.pipeline_mode<synchronous>, transform_indices = @transform_5, window_bounds = array<i64: 324, 1>}, {transform_indices = @transform_6, window_bounds = array<i64: 1, 324, 128>}]} {
    %c0 = arith.constant 0 : index
    %c0_0 = arith.constant 0 : index
    %c0_1 = arith.constant 0 : index
    %0 = vector.load %arg1[%c0, %c0_0, %c0_1] : memref<1x324x128xf32, #tpu.memory_space<vmem>>, vector<1x324x128xf32>
    %1 = vector.shape_cast %0 : vector<1x324x128xf32> to vector<324x128xf32>
    %2 = arith.truncf %1 : vector<324x128xf32> to vector<324x128xbf16>
    %c0_2 = arith.constant 0 : index
    %c0_3 = arith.constant 0 : index
    %3 = vector.load %arg2[%c0_2, %c0_3] : memref<128x128xbf16, #tpu.memory_space<vmem>>, vector<128x128xbf16>
    %cst = arith.constant dense<0.000000e+00> : vector<324x128xf32>
    %4 = tpu.matmul %2, %3, %cst {dimension_numbers = #tpu.dot_dimension_numbers<[1], [0], [0], [1], [0, 0, 1, 1], [], []>} : vector<324x128xbf16>, vector<128x128xbf16>, vector<324x128xf32> -> vector<324x128xf32>
    %c0_4 = arith.constant 0 : index
    %c0_5 = arith.constant 0 : index
    %5 = vector.load %arg3[%c0_4, %c0_5] : memref<1x128xf32, #tpu.memory_space<vmem>>, vector<1x128xf32>
    %6 = vector.broadcast %5 : vector<1x128xf32> to vector<324x128xf32>
    %7 = arith.addf %4, %6 : vector<324x128xf32>
    %cst_6 = arith.constant 0.000000e+00 : f32
    %8 = vector.broadcast %cst_6 : f32 to vector<324x128xf32>
    %9 = arith.subf %8, %7 : vector<324x128xf32>
    %10 = math.exp %9 : vector<324x128xf32>
    %cst_7 = arith.constant 1.000000e+00 : f32
    %11 = vector.broadcast %cst_7 : f32 to vector<324x128xf32>
    %12 = arith.addf %11, %10 : vector<324x128xf32>
    %13 = tpu.reciprocal %12 {approx = true} : vector<324x128xf32> -> vector<324x128xf32>
    %14 = arith.mulf %7, %13 : vector<324x128xf32>
    %c0_8 = arith.constant 0 : index
    %c0_9 = arith.constant 0 : index
    %15 = vector.load %arg6[%c0_8, %c0_9] : memref<324x1xf32, #tpu.memory_space<vmem>>, vector<324x1xf32>
    %16 = vector.broadcast %15 : vector<324x1xf32> to vector<324x128xf32>
    %17 = arith.mulf %14, %16 : vector<324x128xf32>
    %cst_10 = arith.constant 0.000000e+00 : f32
    %18 = vector.broadcast %cst_10 : f32 to vector<32x128xf32>
    %c0_11 = arith.constant 0 : index
    %c0_12 = arith.constant 0 : index
    %19 = vector.load %arg8[%c0_11, %c0_12] : memref<388x128xf32, #tpu.memory_space<vmem>>, vector<32x128xf32>
    tpu.vector_store %arg8[%c0_11, %c0_12], %18 {strides = array<i32>} : memref<388x128xf32, #tpu.memory_space<vmem>>, vector<32x128xf32>,
    %c356 = arith.constant 356 : index
    %c0_13 = arith.constant 0 : index
    %20 = vector.load %arg8[%c356, %c0_13] : memref<388x128xf32, #tpu.memory_space<vmem>>, vector<32x128xf32>
    tpu.vector_store %arg8[%c356, %c0_13], %18 {strides = array<i32>} : memref<388x128xf32, #tpu.memory_space<vmem>>, vector<32x128xf32>,
    %c32 = arith.constant 32 : index
    %c0_14 = arith.constant 0 : index
    %21 = vector.load %arg8[%c32, %c0_14] : memref<388x128xf32, #tpu.memory_space<vmem>>, vector<324x128xf32>
    tpu.vector_store %arg8[%c32, %c0_14], %17 {strides = array<i32>} : memref<388x128xf32, #tpu.memory_space<vmem>>, vector<324x128xf32>,
    %cst_15 = arith.constant 0.000000e+00 : f32
    %22 = vector.broadcast %cst_15 : f32 to vector<324x128xf32>
    %c13 = arith.constant 13 : index
    %c0_16 = arith.constant 0 : index
    %23 = vector.load %arg8[%c13, %c0_16] : memref<388x128xf32, #tpu.memory_space<vmem>>, vector<324x128xf32>
    %24 = arith.truncf %23 : vector<324x128xf32> to vector<324x128xbf16>
    %c0_17 = arith.constant 0 : index
    %c0_18 = arith.constant 0 : index
    %c0_19 = arith.constant 0 : index
    %25 = vector.load %arg4[%c0_17, %c0_18, %c0_19] : memref<9x128x128xbf16, #tpu.memory_space<vmem>>, vector<1x128x128xbf16>
    %26 = vector.shape_cast %25 : vector<1x128x128xbf16> to vector<128x128xbf16>
    %cst_20 = arith.constant dense<0.000000e+00> : vector<324x128xf32>
    %27 = tpu.matmul %24, %26, %cst_20 {dimension_numbers = #tpu.dot_dimension_numbers<[1], [0], [0], [1], [0, 0, 1, 1], [], []>} : vector<324x128xbf16>, vector<128x128xbf16>, vector<324x128xf32> -> vector<324x128xf32>
    %28 = arith.addf %22, %27 : vector<324x128xf32>
    %c14 = arith.constant 14 : index
    %c0_21 = arith.constant 0 : index
    %29 = vector.load %arg8[%c14, %c0_21] : memref<388x128xf32, #tpu.memory_space<vmem>>, vector<324x128xf32>
    %30 = arith.truncf %29 : vector<324x128xf32> to vector<324x128xbf16>
    %c1 = arith.constant 1 : index
    %c0_22 = arith.constant 0 : index
    %c0_23 = arith.constant 0 : index
    %31 = vector.load %arg4[%c1, %c0_22, %c0_23] : memref<9x128x128xbf16, #tpu.memory_space<vmem>>, vector<1x128x128xbf16>
    %32 = vector.shape_cast %31 : vector<1x128x128xbf16> to vector<128x128xbf16>
    %cst_24 = arith.constant dense<0.000000e+00> : vector<324x128xf32>
    %33 = tpu.matmul %30, %32, %cst_24 {dimension_numbers = #tpu.dot_dimension_numbers<[1], [0], [0], [1], [0, 0, 1, 1], [], []>} : vector<324x128xbf16>, vector<128x128xbf16>, vector<324x128xf32> -> vector<324x128xf32>
    %34 = arith.addf %28, %33 : vector<324x128xf32>
    %c15 = arith.constant 15 : index
    %c0_25 = arith.constant 0 : index
    %35 = vector.load %arg8[%c15, %c0_25] : memref<388x128xf32, #tpu.memory_space<vmem>>, vector<324x128xf32>
    %36 = arith.truncf %35 : vector<324x128xf32> to vector<324x128xbf16>
    %c2 = arith.constant 2 : index
    %c0_26 = arith.constant 0 : index
    %c0_27 = arith.constant 0 : index
    %37 = vector.load %arg4[%c2, %c0_26, %c0_27] : memref<9x128x128xbf16, #tpu.memory_space<vmem>>, vector<1x128x128xbf16>
    %38 = vector.shape_cast %37 : vector<1x128x128xbf16> to vector<128x128xbf16>
    %cst_28 = arith.constant dense<0.000000e+00> : vector<324x128xf32>
    %39 = tpu.matmul %36, %38, %cst_28 {dimension_numbers = #tpu.dot_dimension_numbers<[1], [0], [0], [1], [0, 0, 1, 1], [], []>} : vector<324x128xbf16>, vector<128x128xbf16>, vector<324x128xf32> -> vector<324x128xf32>
    %40 = arith.addf %34, %39 : vector<324x128xf32>
    %c31 = arith.constant 31 : index
    %c0_29 = arith.constant 0 : index
    %41 = vector.load %arg8[%c31, %c0_29] : memref<388x128xf32, #tpu.memory_space<vmem>>, vector<324x128xf32>
    %42 = arith.truncf %41 : vector<324x128xf32> to vector<324x128xbf16>
    %c3 = arith.constant 3 : index
    %c0_30 = arith.constant 0 : index
    %c0_31 = arith.constant 0 : index
    %43 = vector.load %arg4[%c3, %c0_30, %c0_31] : memref<9x128x128xbf16, #tpu.memory_space<vmem>>, vector<1x128x128xbf16>
    %44 = vector.shape_cast %43 : vector<1x128x128xbf16> to vector<128x128xbf16>
    %cst_32 = arith.constant dense<0.000000e+00> : vector<324x128xf32>
    %45 = tpu.matmul %42, %44, %cst_32 {dimension_numbers = #tpu.dot_dimension_numbers<[1], [0], [0], [1], [0, 0, 1, 1], [], []>} : vector<324x128xbf16>, vector<128x128xbf16>, vector<324x128xf32> -> vector<324x128xf32>
    %46 = arith.addf %40, %45 : vector<324x128xf32>
    %c32_33 = arith.constant 32 : index
    %c0_34 = arith.constant 0 : index
    %47 = vector.load %arg8[%c32_33, %c0_34] : memref<388x128xf32, #tpu.memory_space<vmem>>, vector<324x128xf32>
    %48 = arith.truncf %47 : vector<324x128xf32> to vector<324x128xbf16>
    %c4 = arith.constant 4 : index
    %c0_35 = arith.constant 0 : index
    %c0_36 = arith.constant 0 : index
    %49 = vector.load %arg4[%c4, %c0_35, %c0_36] : memref<9x128x128xbf16, #tpu.memory_space<vmem>>, vector<1x128x128xbf16>
    %50 = vector.shape_cast %49 : vector<1x128x128xbf16> to vector<128x128xbf16>
    %cst_37 = arith.constant dense<0.000000e+00> : vector<324x128xf32>
    %51 = tpu.matmul %48, %50, %cst_37 {dimension_numbers = #tpu.dot_dimension_numbers<[1], [0], [0], [1], [0, 0, 1, 1], [], []>} : vector<324x128xbf16>, vector<128x128xbf16>, vector<324x128xf32> -> vector<324x128xf32>
    %52 = arith.addf %46, %51 : vector<324x128xf32>
    %c33 = arith.constant 33 : index
    %c0_38 = arith.constant 0 : index
    %53 = vector.load %arg8[%c33, %c0_38] : memref<388x128xf32, #tpu.memory_space<vmem>>, vector<324x128xf32>
    %54 = arith.truncf %53 : vector<324x128xf32> to vector<324x128xbf16>
    %c5 = arith.constant 5 : index
    %c0_39 = arith.constant 0 : index
    %c0_40 = arith.constant 0 : index
    %55 = vector.load %arg4[%c5, %c0_39, %c0_40] : memref<9x128x128xbf16, #tpu.memory_space<vmem>>, vector<1x128x128xbf16>
    %56 = vector.shape_cast %55 : vector<1x128x128xbf16> to vector<128x128xbf16>
    %cst_41 = arith.constant dense<0.000000e+00> : vector<324x128xf32>
    %57 = tpu.matmul %54, %56, %cst_41 {dimension_numbers = #tpu.dot_dimension_numbers<[1], [0], [0], [1], [0, 0, 1, 1], [], []>} : vector<324x128xbf16>, vector<128x128xbf16>, vector<324x128xf32> -> vector<324x128xf32>
    %58 = arith.addf %52, %57 : vector<324x128xf32>
    %c49 = arith.constant 49 : index
    %c0_42 = arith.constant 0 : index
    %59 = vector.load %arg8[%c49, %c0_42] : memref<388x128xf32, #tpu.memory_space<vmem>>, vector<324x128xf32>
    %60 = arith.truncf %59 : vector<324x128xf32> to vector<324x128xbf16>
    %c6 = arith.constant 6 : index
    %c0_43 = arith.constant 0 : index
    %c0_44 = arith.constant 0 : index
    %61 = vector.load %arg4[%c6, %c0_43, %c0_44] : memref<9x128x128xbf16, #tpu.memory_space<vmem>>, vector<1x128x128xbf16>
    %62 = vector.shape_cast %61 : vector<1x128x128xbf16> to vector<128x128xbf16>
    %cst_45 = arith.constant dense<0.000000e+00> : vector<324x128xf32>
    %63 = tpu.matmul %60, %62, %cst_45 {dimension_numbers = #tpu.dot_dimension_numbers<[1], [0], [0], [1], [0, 0, 1, 1], [], []>} : vector<324x128xbf16>, vector<128x128xbf16>, vector<324x128xf32> -> vector<324x128xf32>
    %64 = arith.addf %58, %63 : vector<324x128xf32>
    %c50 = arith.constant 50 : index
    %c0_46 = arith.constant 0 : index
    %65 = vector.load %arg8[%c50, %c0_46] : memref<388x128xf32, #tpu.memory_space<vmem>>, vector<324x128xf32>
    %66 = arith.truncf %65 : vector<324x128xf32> to vector<324x128xbf16>
    %c7 = arith.constant 7 : index
    %c0_47 = arith.constant 0 : index
    %c0_48 = arith.constant 0 : index
    %67 = vector.load %arg4[%c7, %c0_47, %c0_48] : memref<9x128x128xbf16, #tpu.memory_space<vmem>>, vector<1x128x128xbf16>
    %68 = vector.shape_cast %67 : vector<1x128x128xbf16> to vector<128x128xbf16>
    %cst_49 = arith.constant dense<0.000000e+00> : vector<324x128xf32>
    %69 = tpu.matmul %66, %68, %cst_49 {dimension_numbers = #tpu.dot_dimension_numbers<[1], [0], [0], [1], [0, 0, 1, 1], [], []>} : vector<324x128xbf16>, vector<128x128xbf16>, vector<324x128xf32> -> vector<324x128xf32>
    %70 = arith.addf %64, %69 : vector<324x128xf32>
    %c51 = arith.constant 51 : index
    %c0_50 = arith.constant 0 : index
    %71 = vector.load %arg8[%c51, %c0_50] : memref<388x128xf32, #tpu.memory_space<vmem>>, vector<324x128xf32>
    %72 = arith.truncf %71 : vector<324x128xf32> to vector<324x128xbf16>
    %c8 = arith.constant 8 : index
    %c0_51 = arith.constant 0 : index
    %c0_52 = arith.constant 0 : index
    %73 = vector.load %arg4[%c8, %c0_51, %c0_52] : memref<9x128x128xbf16, #tpu.memory_space<vmem>>, vector<1x128x128xbf16>
    %74 = vector.shape_cast %73 : vector<1x128x128xbf16> to vector<128x128xbf16>
    %cst_53 = arith.constant dense<0.000000e+00> : vector<324x128xf32>
    %75 = tpu.matmul %72, %74, %cst_53 {dimension_numbers = #tpu.dot_dimension_numbers<[1], [0], [0], [1], [0, 0, 1, 1], [], []>} : vector<324x128xbf16>, vector<128x128xbf16>, vector<324x128xf32> -> vector<324x128xf32>
    %76 = arith.addf %70, %75 : vector<324x128xf32>
    %c0_54 = arith.constant 0 : index
    %c0_55 = arith.constant 0 : index
    %77 = vector.load %arg5[%c0_54, %c0_55] : memref<1x128xf32, #tpu.memory_space<vmem>>, vector<1x128xf32>
    %78 = vector.broadcast %77 : vector<1x128xf32> to vector<324x128xf32>
    %79 = arith.addf %76, %78 : vector<324x128xf32>
    %cst_56 = arith.constant 0.000000e+00 : f32
    %80 = vector.broadcast %cst_56 : f32 to vector<324x128xf32>
    %81 = arith.subf %80, %79 : vector<324x128xf32>
    %82 = math.exp %81 : vector<324x128xf32>
    %cst_57 = arith.constant 1.000000e+00 : f32
    %83 = vector.broadcast %cst_57 : f32 to vector<324x128xf32>
    %84 = arith.addf %83, %82 : vector<324x128xf32>
    %85 = tpu.reciprocal %84 {approx = true} : vector<324x128xf32> -> vector<324x128xf32>
    %86 = arith.mulf %79, %85 : vector<324x128xf32>
    %87 = arith.addf %86, %1 : vector<324x128xf32>
    %c0_58 = arith.constant 0 : index
    %c0_59 = arith.constant 0 : index
    %c0_60 = arith.constant 0 : index
    %88 = vector.load %arg7[%c0_58, %c0_59, %c0_60] : memref<1x324x128xf32, #tpu.memory_space<vmem>>, vector<1x324x128xf32>
    %89 = vector.shape_cast %88 : vector<1x324x128xf32> to vector<324x128xf32>
    %90 = vector.shape_cast %87 : vector<324x128xf32> to vector<1x324x128xf32>
    tpu.vector_store %arg7[%c0_58, %c0_59, %c0_60], %90 {strides = array<i32>} : memref<1x324x128xf32, #tpu.memory_space<vmem>>, vector<1x324x128xf32>,
    return
  }
  func.func @transform_0(%arg0: i32) -> (i32, i32, i32) {
    %c0_i32 = arith.constant 0 : i32
    %c0_i32_0 = arith.constant 0 : i32
    %c0_i32_1 = arith.constant 0 : i32
    return %arg0, %c0_i32, %c0_i32_0 : i32, i32, i32
  }
  func.func @transform_1(%arg0: i32) -> (i32, i32) {
    %c0_i32 = arith.constant 0 : i32
    %c0_i32_0 = arith.constant 0 : i32
    %c0_i32_1 = arith.constant 0 : i32
    return %c0_i32, %c0_i32_0 : i32, i32
  }
  func.func @transform_2(%arg0: i32) -> (i32, i32) {
    %c0_i32 = arith.constant 0 : i32
    %c0_i32_0 = arith.constant 0 : i32
    %c0_i32_1 = arith.constant 0 : i32
    return %c0_i32, %c0_i32_0 : i32, i32
  }
  func.func @transform_3(%arg0: i32) -> (i32, i32, i32) {
    %c0_i32 = arith.constant 0 : i32
    %c0_i32_0 = arith.constant 0 : i32
    %c0_i32_1 = arith.constant 0 : i32
    %c0_i32_2 = arith.constant 0 : i32
    return %c0_i32, %c0_i32_0, %c0_i32_1 : i32, i32, i32
  }
  func.func @transform_4(%arg0: i32) -> (i32, i32) {
    %c0_i32 = arith.constant 0 : i32
    %c0_i32_0 = arith.constant 0 : i32
    %c0_i32_1 = arith.constant 0 : i32
    return %c0_i32, %c0_i32_0 : i32, i32
  }
  func.func @transform_5(%arg0: i32) -> (i32, i32) {
    %c0_i32 = arith.constant 0 : i32
    %c0_i32_0 = arith.constant 0 : i32
    %c0_i32_1 = arith.constant 0 : i32
    return %c0_i32, %c0_i32_0 : i32, i32
  }
  func.func @transform_6(%arg0: i32) -> (i32, i32, i32) {
    %c0_i32 = arith.constant 0 : i32
    %c0_i32_0 = arith.constant 0 : i32
    %c0_i32_1 = arith.constant 0 : i32
    return %arg0, %c0_i32, %c0_i32_0 : i32, i32, i32
  }
}

</mosaic_0001>

<bundles_post_ra>
// kernel: bottleneck_forward.1
= control target key start
LH: loop header
LB: loop body
LE: loop exit
PB: predicated region body
PF: predicated region fallthrough
CT: control target
= control target key end

     0   :  { %s6853_s21 = smov 0   ;;  %s8881_s0 = inlined_call_operand.vmem [shape: f32[2,324,128], index: 0, kind: input, shape index: {}]   ;;  %s8882_s1 = inlined_call_operand.vmem [shape: bf16[128,128], index: 1, kind: input, shape index: {}]   ;;  %s8883_s2 = inlined_call_operand.vmem [shape: f32[1,128], index: 2, kind: input, shape index: {}]   ;;  %s8884_s3 = inlined_call_operand.vmem [shape: bf16[9,128,128], index: 3, kind: input, shape index: {}]   ;;  %s8885_s4 = inlined_call_operand.vmem [shape: f32[1,128], index: 4, kind: input, shape index: {}]   ;;  %s8886_s5 = inlined_call_operand.vmem [shape: f32[324,1], index: 5, kind: input, shape index: {}]   ;;  %s8887_s6 = inlined_call_operand.vmem [shape: f32[2,324,128], index: 6, kind: output, shape index: {}]  }
   0x1 LB: > { %s4828_s22 = sadd.s32 4294967295, %s6813_s21   ;;  %p4832_p0 = scmp.ge.s32.totalorder %s6813_s21, 1  ;;  %s6813_s21 = sphi %s6853_s21, %s16_s21  }
   0x2   : > { %p212_p1 = scmp.lt.s32.totalorder %s6813_s21, 3 }
   0x4   : > { %p213_p2 = pnand %p4832_p0, %p212_p1 }
   0x6   : > { %216 = sbr.rel (%p213_p2) target bundleno = 1377 (0x561), region = 44 }
   0xd   : > { %v6351_v0 = vld [vmem:[%s8882_s1] sm:$0xff]   ;;  %v6815_v1 = vmov 0.0   ;;  %v6352_v2 = vld [vmem:[%s8882_s1 + $0x8] sm:$0xff]   ;;  %vm6816_vm0 = vmmov 0   ;;  %v6817_v3 = vmov 0   ;;  %v6353_v4 = vld [vmem:[%s8882_s1 + $0x10] sm:$0xff]  }
   0xe   : > { %5337 = vmatprep.subr.bf16.mxu0 %v6815_v1  ;;  %1119 = vst [vmem:[#allocation2] sm:$0xff] %v6815_v1  ;;  %1120 = vst [vmem:[#allocation2 + $0x8] sm:$0xff] %v6815_v1  ;;  %5437 = vmatprep.subr.bf16.mxu1 %v6815_v1  ;;  %v832_v5 = vld [vmem:[%s8886_s5] sm:$0xff]  ;;  %v6354_v6 = vld [vmem:[%s8882_s1 + $0x18] sm:$0xff]   ;;  %p242_p3 = scmp.lt.s32.totalorder %s4828_s22, 1 }
   0xf   : > { %1121 = vst [vmem:[#allocation2 + $0x10] sm:$0xff] %v6815_v1  ;;  %1122 = vst [vmem:[#allocation2 + $0x18] sm:$0xff] %v6815_v1  ;;  %5338 = vmatpush3.bf16.msra.mxu0 %v6351_v0  ;;  %5353 = vmatprep.mubr.msk.bf16.mxu0 %vm6816_vm0, %v6815_v1  ;;  %v833_v7 = vld [vmem:[%s8886_s5 + $0x8] sm:$0xff]  ;;  %v834_v8 = vld [vmem:[%s8886_s5 + $0x10] sm:$0xff] }
  0x10   : > { %1123 = vst [vmem:[#allocation2 + $0x164] sm:$0xff] %v6815_v1  ;;  %1124 = vst [vmem:[#allocation2 + $0x16c] sm:$0xff] %v6815_v1  ;;  %5339 = vmatprep.subr.bf16.mxu0 %v6815_v1  ;;  %5453 = vmatprep.mubr.msk.bf16.mxu1 %vm6816_vm0, %v6815_v1  ;;  %v6355_v9 = vld [vmem:[%s8882_s1 + $0x20] sm:$0xff]   ;;  %s8915_s22 = smov (!%p242_p3, %s4828_s22), 1  ;;  %v835_v11 = vld [vmem:[%s8886_s5 + $0x18] sm:$0xff] }
  0x11   : > { %1125 = vst [vmem:[#allocation2 + $0x174] sm:$0xff] %v6815_v1  ;;  %6349 = vset.pattern.permute.xlu0 %v6817_v3  ;;  %6350 = vset.pattern.permute.xlu1 %v6817_v3  ;;  %v836_v10 = vld [vmem:[%s8886_s5 + $0x20] sm:$0xff]  ;;  %v6356_v12 = vld [vmem:[%s8882_s1 + $0x28] sm:$0xff]   ;;  %v838_v13 = vld [vmem:[%s8886_s5 + $0x30] sm:$0xff]  ;;  %s6337_s25 = smul.u32 328, %s8915_s22 }
  0x12   : > { %875 = vperm.xlu0 %6349, %v832_v5   ;;  %885 = vperm.xlu1 %6350, %v834_v8   ;;  %v837_v14 = vld [vmem:[%s8886_s5 + $0x28] sm:$0xff]  ;;  %v6357_v15 = vld [vmem:[%s8882_s1 + $0x30] sm:$0xff]   ;;  %v840_v16 = vld [vmem:[%s8886_s5 + $0x40] sm:$0xff] }
  0x13   : > { %5340 = vmatpush3.bf16.msra.mxu0 %v6352_v2  ;;  %s6937_s10 = scalar_lea.vmem %s8881_s0, %s6337_s25  ;;  %v839_v17 = vld [vmem:[%s8886_s5 + $0x38] sm:$0xff]  ;;  %v842_v21 = vld [vmem:[%s8886_s5 + $0x50] sm:$0xff]  ;;  %v841_v22 = vld [vmem:[%s8886_s5 + $0x48] sm:$0xff]  ;;  %s8592_s11 = scalar_lea.vmem %s8887_s6, %s6337_s25 }
  0x14   : > { %5341 = vmatprep.subr.bf16.mxu0 %v6815_v1  ;;  %v6358_v18 = vld [vmem:[%s8882_s1 + $0x38] sm:$0xff]   ;;  %v253_v19 = vld [vmem:[%s6937_s10] sm:$0xff]  ;;  %v254_v20 = vld [vmem:[%s6937_s10 + $0x8] sm:$0xff] }
  0x15   : > { %v294_v23 = vpack.c.bf16 %v254_v20, %v253_v19  ;;  %v844_v24 = vld [vmem:[%s8886_s5 + $0x60] sm:$0xff]  ;;  %v843_v25 = vld [vmem:[%s8886_s5 + $0x58] sm:$0xff]  ;;  %v255_v26 = vld [vmem:[%s6937_s10 + $0x10] sm:$0xff] }
  0x16   : > { %880 = vperm.xlu0 %6349, %v833_v7   ;;  %890 = vperm.xlu1 %6350, %v835_v11   ;;  %v256_v27 = vld [vmem:[%s6937_s10 + $0x18] sm:$0xff]  ;;  %v846_v28 = vld [vmem:[%s8886_s5 + $0x70] sm:$0xff]  ;;  %v845_v29 = vld [vmem:[%s8886_s5 + $0x68] sm:$0xff] }
  0x17   : > { %5342 = vmatpush3.bf16.msra.mxu0 %v6353_v4  ;;  %v848_v30 = vld [vmem:[%s8886_s5 + $0x80] sm:$0xff]  ;;  %v295_v31 = vpack.c.bf16 %v256_v27, %v255_v26  ;;  %v847_v32 = vld [vmem:[%s8886_s5 + $0x78] sm:$0xff]  ;;  %v258_v34 = vld [vmem:[%s6937_s10 + $0x28] sm:$0xff] }
  0x18   : > { %5343 = vmatprep.subr.bf16.mxu0 %v6815_v1  ;;  %v257_v33 = vld [vmem:[%s6937_s10 + $0x20] sm:$0xff]  ;;  %v850_v35 = vld [vmem:[%s8886_s5 + $0x90] sm:$0xff]  ;;  %v849_v36 = vld [vmem:[%s8886_s5 + $0x88] sm:$0xff] }
  0x19   : > { %v852_v37 = vld [vmem:[%s8886_s5 + $0xa0] sm:$0xff]  ;;  %v296_v38 = vpack.c.bf16 %v258_v34, %v257_v33  ;;  %v851_v39 = vld [vmem:[%s8886_s5 + $0x98] sm:$0xff]  ;;  %v259_v40 = vld [vmem:[%s6937_s10 + $0x30] sm:$0xff] }
  0x1a   : > { %895 = vperm.xlu0 %6349, %v836_v10   ;;  %900 = vperm.xlu1 %6350, %v837_v14   ;;  %v260_v41 = vld [vmem:[%s6937_s10 + $0x38] sm:$0xff]  ;;  %v854_v42 = vld [vmem:[%s8886_s5 + $0xb0] sm:$0xff]  ;;  %v853_v43 = vld [vmem:[%s8886_s5 + $0xa8] sm:$0xff] }
  0x1b   : > { %5344 = vmatpush3.bf16.msra.mxu0 %v6354_v6  ;;  %v856_v44 = vld [vmem:[%s8886_s5 + $0xc0] sm:$0xff]  ;;  %v297_v45 = vpack.c.bf16 %v260_v41, %v259_v40  ;;  %v855_v46 = vld [vmem:[%s8886_s5 + $0xb8] sm:$0xff]  ;;  %v262_v48 = vld [vmem:[%s6937_s10 + $0x48] sm:$0xff] }
  0x1c   : > { %5345 = vmatprep.subr.bf16.mxu0 %v6815_v1  ;;  %v261_v47 = vld [vmem:[%s6937_s10 + $0x40] sm:$0xff]  ;;  %v858_v49 = vld [vmem:[%s8886_s5 + $0xd0] sm:$0xff]  ;;  %v857_v50 = vld [vmem:[%s8886_s5 + $0xc8] sm:$0xff] }
  0x1d   : > { %v860_v51 = vld [vmem:[%s8886_s5 + $0xe0] sm:$0xff]  ;;  %v298_v52 = vpack.c.bf16 %v262_v48, %v261_v47  ;;  %v859_v53 = vld [vmem:[%s8886_s5 + $0xd8] sm:$0xff]  ;;  %v263_v54 = vld [vmem:[%s6937_s10 + $0x50] sm:$0xff] }
  0x1e   : > { %905 = vperm.xlu0 %6349, %v838_v13   ;;  %910 = vperm.xlu1 %6350, %v839_v17   ;;  %v264_v55 = vld [vmem:[%s6937_s10 + $0x58] sm:$0xff]  ;;  %v862_v56 = vld [vmem:[%s8886_s5 + $0xf0] sm:$0xff]  ;;  %v861_v57 = vld [vmem:[%s8886_s5 + $0xe8] sm:$0xff] }
  0x1f   : > { %5346 = vmatpush3.bf16.msra.mxu0 %v6355_v9  ;;  %v864_v58 = vld [vmem:[%s8886_s5 + $0x100] sm:$0xff]  ;;  %v299_v59 = vpack.c.bf16 %v264_v55, %v263_v54  ;;  %v863_v60 = vld [vmem:[%s8886_s5 + $0xf8] sm:$0xff]  ;;  %v266_v62 = vld [vmem:[%s6937_s10 + $0x68] sm:$0xff] }
  0x20   : > { %5347 = vmatprep.subr.bf16.mxu0 %v6815_v1  ;;  %v265_v61 = vld [vmem:[%s6937_s10 + $0x60] sm:$0xff]  ;;  %v866_v63 = vld [vmem:[%s8886_s5 + $0x110] sm:$0xff]  ;;  %v865_v0 = vld [vmem:[%s8886_s5 + $0x108] sm:$0xff] }
  0x21   : > { %v868_v2 = vld [vmem:[%s8886_s5 + $0x120] sm:$0xff]  ;;  %v300_v3 = vpack.c.bf16 %v266_v62, %v265_v61  ;;  %v867_v4 = vld [vmem:[%s8886_s5 + $0x118] sm:$0xff]  ;;  %v267_v5 = vld [vmem:[%s6937_s10 + $0x70] sm:$0xff] }
  0x22   : > { %915 = vperm.xlu0 %6349, %v840_v16   ;;  %920 = vperm.xlu1 %6350, %v841_v22   ;;  %v268_v6 = vld [vmem:[%s6937_s10 + $0x78] sm:$0xff]  ;;  %v870_v7 = vld [vmem:[%s8886_s5 + $0x130] sm:$0xff]  ;;  %v869_v8 = vld [vmem:[%s8886_s5 + $0x128] sm:$0xff] }
  0x23   : > { %5348 = vmatpush3.bf16.msra.mxu0 %v6356_v12  ;;  %v301_v9 = vpack.c.bf16 %v268_v6, %v267_v5  ;;  %v872_v10 = vld [vmem:[%s8886_s5 + $0x140] sm:$0xf]  ;;  %v871_v11 = vld [vmem:[%s8886_s5 + $0x138] sm:$0xff]  ;;  %v270_v13 = vld [vmem:[%s6937_s10 + $0x88] sm:$0xff] }
  0x24   : > { %5349 = vmatprep.subr.bf16.mxu0 %v6815_v1  ;;  %v269_v12 = vld [vmem:[%s6937_s10 + $0x80] sm:$0xff]  ;;  %v272_v16 = vld [vmem:[%s6937_s10 + $0x98] sm:$0xff]  ;;  %v274_v19 = vld [vmem:[%s6937_s10 + $0xa8] sm:$0xff] }
  0x25   : > { %v302_v14 = vpack.c.bf16 %v270_v13, %v269_v12  ;;  %v276_v22 = vld [vmem:[%s6937_s10 + $0xb8] sm:$0xff]  ;;  %v277_v26 = vld [vmem:[%s6937_s10 + $0xc0] sm:$0xff]  ;;  %v278_v27 = vld [vmem:[%s6937_s10 + $0xc8] sm:$0xff] }
  0x26   : > { %925 = vperm.xlu0 %6349, %v842_v21   ;;  %930 = vperm.xlu1 %6350, %v843_v25   ;;  %v275_v21 = vld [vmem:[%s6937_s10 + $0xb0] sm:$0xff]  ;;  %v6360_v25 = vld [vmem:[%s8884_s3] sm:$0xff]   ;;  %v280_v34 = vld [vmem:[%s6937_s10 + $0xd8] sm:$0xff] }
  0x27   : > { %5350 = vmatpush3.bf16.msra.mxu0 %v6357_v15  ;;  %v271_v15 = vld [vmem:[%s6937_s10 + $0x90] sm:$0xff]  ;;  %v281_v40 = vld [vmem:[%s6937_s10 + $0xe0] sm:$0xff]  ;;  %v282_v41 = vld [vmem:[%s6937_s10 + $0xe8] sm:$0xff] }
  0x28   : > { %5351 = vmatprep.subr.bf16.mxu0 %v6815_v1  ;;  %v303_v17 = vpack.c.bf16 %v272_v16, %v271_v15  ;;  %v279_v33 = vld [vmem:[%s6937_s10 + $0xd0] sm:$0xff]  ;;  %v284_v48 = vld [vmem:[%s6937_s10 + $0xf8] sm:$0xff]  ;;  %v285_v55 = vld [vmem:[%s6937_s10 + $0x100] sm:$0xff] }
  0x29   : > { %v283_v47 = vld [vmem:[%s6937_s10 + $0xf0] sm:$0xff]  ;;  %v289_v61 = vld [vmem:[%s6937_s10 + $0x120] sm:$0xff]  ;;  %v290_v62 = vld [vmem:[%s6937_s10 + $0x128] sm:$0xff] }
  0x2a   : > { %935 = vperm.xlu0 %6349, %v844_v24   ;;  %940 = vperm.xlu1 %6350, %v845_v29   ;;  %v6359_v24 = vld [vmem:[%s8884_s3 + $0x40] sm:$0xff]   ;;  %v6362_v29 = vld [vmem:[%s8884_s3 + $0x8] sm:$0xff]  }
  0x2b   : > { %5352 = vmatpush3.bf16.msra.mxu0 %v6358_v18  ;;  %v273_v18 = vld [vmem:[%s6937_s10 + $0xa0] sm:$0xff]  ;;  %5438 = vmatpush3.bf16.msra.mxu1 %v6359_v24 }
  0x2c   : > { %5537 = vmatprep.subr.bf16.mxu0 %v6815_v1  ;;  %v304_v20 = vpack.c.bf16 %v274_v19, %v273_v18  ;;  %5439 = vmatprep.subr.bf16.mxu1 %v6815_v1  ;;  %v293_v5 = vld [vmem:[%s6937_s10 + $0x140] sm:$0xf] }
  0x2d   : > { %v314_v6 = vpack.c.bf16 %v293_v5, %v293_v5  ;;  %v7209_v12 = vld [vmem:[%s8883_s2] ss:$0 sm:$0xff] }
  0x2e   : > { %5354 = vmatmul.mubr.bf16.vlgmr.msra.gmra.mrb[0].mxu0 %v294_v23  ;;  %945 = vperm.xlu0 %6349, %v846_v28   ;;  %v305_v23 = vpack.c.bf16 %v276_v22, %v275_v21  ;;  %v6361_v28 = vld [vmem:[%s8884_s3 + $0x48] sm:$0xff]   ;;  %v6378_v22 = vld [vmem:[%s8884_s3 + $0x98] sm:$0xff]  }
  0x2f   : > { %5357 = vmatprep.mubr.msk.bf16.mxu0 %vm6816_vm0, %v6815_v1  ;;  %950 = vperm.xlu1 %6350, %v847_v32   ;;  %v6364_v32 = vld [vmem:[%s8884_s3 + $0x10] sm:$0xff]  }
  0x30   : > { %5538 = vmatpush3.bf16.msra.mxu0 %v6360_v25  ;;  %5440 = vmatpush3.bf16.msra.mxu1 %v6361_v28 }
  0x31   : > { %5539 = vmatprep.subr.bf16.mxu0 %v6815_v1  ;;  %5441 = vmatprep.subr.bf16.mxu1 %v6815_v1 }
  0x32   : > { %955 = vperm.xlu0 %6349, %v848_v30   ;;  %v306_v30 = vpack.c.bf16 %v278_v27, %v277_v26 }
  0x33   : > { %960 = vperm.xlu1 %6350, %v849_v36   ;;  %v6366_v36 = vld [vmem:[%s8884_s3 + $0x18] sm:$0xff]  }
  0x34   : > { %5540 = vmatpush3.bf16.msra.mxu0 %v6362_v29 }
  0x35   : > { %5541 = vmatprep.subr.bf16.mxu0 %v6815_v1 }
  0x36   : > { %5358 = vmatmul.mubr.bf16.gmra.mrb[4].mxu0 %v295_v31  ;;  %965 = vperm.xlu0 %6349, %v850_v35   ;;  %v6363_v31 = vld [vmem:[%s8884_s3 + $0x50] sm:$0xff]   ;;  %v6365_v35 = vld [vmem:[%s8884_s3 + $0x58] sm:$0xff]  }
  0x37   : > { %5361 = vmatprep.mubr.msk.bf16.mxu0 %vm6816_vm0, %v6815_v1  ;;  %970 = vperm.xlu1 %6350, %v851_v39   ;;  %v6368_v39 = vld [vmem:[%s8884_s3 + $0x20] sm:$0xff]  }
  0x38   : > { %5442 = vmatpush3.bf16.msra.mxu1 %v6363_v31  ;;  %5542 = vmatpush3.bf16.msra.mxu0 %v6364_v32 }
  0x39   : > { %5443 = vmatprep.subr.bf16.mxu1 %v6815_v1  ;;  %5543 = vmatprep.subr.bf16.mxu0 %v6815_v1 }
  0x3a   : > { %975 = vperm.xlu0 %6349, %v852_v37   ;;  %v307_v37 = vpack.c.bf16 %v280_v34, %v279_v33 }
  0x3b   : > { %980 = vperm.xlu1 %6350, %v853_v43   ;;  %v6370_v43 = vld [vmem:[%s8884_s3 + $0x28] sm:$0xff]  }
  0x3c   : > { %5444 = vmatpush3.bf16.msra.mxu1 %v6365_v35  ;;  %5544 = vmatpush3.bf16.msra.mxu0 %v6366_v36 }
  0x3d   : > { %5445 = vmatprep.subr.bf16.mxu1 %v6815_v1  ;;  %5545 = vmatprep.subr.bf16.mxu0 %v6815_v1 }
  0x3e   : > { %5362 = vmatmul.mubr.bf16.gmra.mrb[8].mxu0 %v296_v38  ;;  %985 = vperm.xlu0 %6349, %v854_v42   ;;  %v6367_v38 = vld [vmem:[%s8884_s3 + $0x60] sm:$0xff]   ;;  %v6369_v42 = vld [vmem:[%s8884_s3 + $0x68] sm:$0xff]  }
  0x3f   : > { %5365 = vmatprep.mubr.msk.bf16.mxu0 %vm6816_vm0, %v6815_v1  ;;  %990 = vperm.xlu1 %6350, %v855_v46   ;;  %v6372_v46 = vld [vmem:[%s8884_s3 + $0x30] sm:$0xff]  }
  0x40   : > { %5446 = vmatpush3.bf16.msra.mxu1 %v6367_v38  ;;  %5546 = vmatpush3.bf16.msra.mxu0 %v6368_v39 }
  0x41   : > { %5447 = vmatprep.subr.bf16.mxu1 %v6815_v1  ;;  %5547 = vmatprep.subr.bf16.mxu0 %v6815_v1 }
  0x42   : > { %995 = vperm.xlu0 %6349, %v856_v44   ;;  %v308_v44 = vpack.c.bf16 %v282_v41, %v281_v40 }
  0x43   : > { %1000 = vperm.xlu1 %6350, %v857_v50   ;;  %v6374_v50 = vld [vmem:[%s8884_s3 + $0x38] sm:$0xff]  }
  0x44   : > { %5448 = vmatpush3.bf16.msra.mxu1 %v6369_v42  ;;  %5548 = vmatpush3.bf16.msra.mxu0 %v6370_v43 }
  0x45   : > { %5449 = vmatprep.subr.bf16.mxu1 %v6815_v1  ;;  %5549 = vmatprep.subr.bf16.mxu0 %v6815_v1 }
  0x46   : > { %5366 = vmatmul.mubr.bf16.gmra.mrb[12].mxu0 %v297_v45  ;;  %1005 = vperm.xlu0 %6349, %v858_v49   ;;  %v6371_v45 = vld [vmem:[%s8884_s3 + $0x70] sm:$0xff]   ;;  %v6373_v49 = vld [vmem:[%s8884_s3 + $0x78] sm:$0xff]  }
  0x47   : > { %5369 = vmatprep.mubr.msk.bf16.mxu0 %vm6816_vm0, %v6815_v1  ;;  %1010 = vperm.xlu1 %6350, %v859_v53   ;;  %v1247_v53 = vld [vmem:[#allocation2 + $0x16] sm:$0xff] }
  0x48   : > { %5450 = vmatpush3.bf16.msra.mxu1 %v6371_v45  ;;  %5550 = vmatpush3.bf16.msra.mxu0 %v6372_v46 }
  0x49   : > { %5451 = vmatprep.subr.bf16.mxu1 %v6815_v1  ;;  %5551 = vmatprep.subr.bf16.mxu0 %v6815_v1 }
  0x4a   : > { %1015 = vperm.xlu0 %6349, %v860_v51   ;;  %v309_v51 = vpack.c.bf16 %v284_v48, %v283_v47 }
  0x4b   : > { %1020 = vperm.xlu1 %6350, %v861_v57  }
  0x4c   : > { %5452 = vmatpush3.bf16.msra.mxu1 %v6373_v49  ;;  %5552 = vmatpush3.bf16.msra.mxu0 %v6374_v50 }
  0x4d   : > { %5637 = vmatprep.subr.bf16.mxu1 %v6815_v1  ;;  %5737 = vmatprep.subr.bf16.mxu0 %v6815_v1 }
  0x4e   : > { %5370 = vmatmul.mubr.bf16.gmra.mrb[16].mxu0 %v298_v52  ;;  %1025 = vperm.xlu0 %6349, %v862_v56   ;;  %v1246_v52 = vld [vmem:[#allocation2 + $0xe] sm:$0xff] }
  0x4f   : > { %5373 = vmatprep.mubr.msk.bf16.mxu0 %vm6816_vm0, %v6815_v1  ;;  %1030 = vperm.xlu1 %6350, %v863_v60   ;;  %v1287_v54 = vpack.c.bf16 %v1247_v53, %v1246_v52  ;;  %v286_v56 = vld [vmem:[%s6937_s10 + $0x108] sm:$0xff] }
  0x50   : > { %v310_v57 = vpack.c.bf16 %v286_v56, %v285_v55 }
  0x51   : > { %5454 = vmatmul.mubr.bf16.vlgmr.msra.gmra.mrb[0].mxu1 %v1287_v54 }
  0x52   : > { %1035 = vperm.xlu0 %6349, %v864_v58   ;;  %5457 = vmatprep.mubr.msk.bf16.mxu1 %vm6816_vm0, %v6815_v1  ;;  %v287_v58 = vld [vmem:[%s6937_s10 + $0x110] sm:$0xff] }
  0x53   : > { %1040 = vperm.xlu1 %6350, %v865_v0   ;;  %v291_v0 = vld [vmem:[%s6937_s10 + $0x130] sm:$0xff] }
  0x56   : > { %5374 = vmatmul.mubr.bf16.gmra.mrb[20].mxu0 %v299_v59  ;;  %1045 = vperm.xlu0 %6349, %v866_v63   ;;  %v288_v59 = vld [vmem:[%s6937_s10 + $0x118] sm:$0xff]  ;;  %v312_v63 = vpack.c.bf16 %v290_v62, %v289_v61  ;;  %v6379_v61 = vld [vmem:[%s8884_s3 + $0xa0] sm:$0xff]  }
  0x57   : > { %5377 = vmatprep.mubr.msk.bf16.mxu0 %vm6816_vm0, %v6815_v1  ;;  %1050 = vperm.xlu1 %6350, %v867_v4   ;;  %v311_v60 = vpack.c.bf16 %v288_v59, %v287_v58  ;;  %v6375_v4 = vld [vmem:[%s8884_s3 + $0x80] sm:$0xff]  }
  0x58   : > { %5638 = vmatpush3.bf16.msra.mxu1 %v6375_v4  ;;  %v7247_v4 = vld [vmem:[#allocation2] sm:$0xff] }
  0x59   : > { %5639 = vmatprep.subr.bf16.mxu1 %v6815_v1 }
  0x5a   : > { %1055 = vperm.xlu0 %6349, %v868_v2   ;;  %v292_v2 = vld [vmem:[%s6937_s10 + $0x138] sm:$0xff] }
  0x5b   : > { %1060 = vperm.xlu1 %6350, %v869_v8   ;;  %v1169_v8 = vld [vmem:[#allocation2 + $0x15] sm:$0xff] }
  0x5e   : > { %5378 = vmatmul.mubr.bf16.gmra.mrb[24].mxu0 %v300_v3  ;;  %1065 = vperm.xlu0 %6349, %v870_v7   ;;  %v313_v3 = vpack.c.bf16 %v292_v2, %v291_v0  ;;  %v1168_v7 = vld [vmem:[#allocation2 + $0xd] sm:$0xff] }
  0x5f   : > { %5381 = vmatprep.mubr.msk.bf16.mxu0 %vm6816_vm0, %v6815_v1  ;;  %1070 = vperm.xlu1 %6350, %v871_v11   ;;  %v6377_v11 = vld [vmem:[%s8884_s3 + $0x90] sm:$0xff]  }
  0x62   : > { %1075 = vperm.xlu0 %6349, %v872_v10   ;;  %v6376_v10 = vld [vmem:[%s8884_s3 + $0x88] sm:$0xff]  }
  0x63   : > { %5640 = vmatpush3.bf16.msra.mxu1 %v6376_v10 }
  0x64   : > { %5641 = vmatprep.subr.bf16.mxu1 %v6815_v1 }
  0x66   : > { %5382 = vmatmul.mubr.bf16.gmra.mrb[28].mxu0 %v301_v9  ;;  %v1209_v9 = vpack.c.bf16 %v1169_v8, %v1168_v7 }
  0x67   : > { %5385 = vmatprep.mubr.msk.bf16.mxu0 %vm6816_vm0, %v6815_v1  ;;  %5642 = vmatpush3.bf16.msra.mxu1 %v6377_v11 }
  0x68   : > { %5643 = vmatprep.subr.bf16.mxu1 %v6815_v1 }
  0x6b   : > { %5644 = vmatpush3.bf16.msra.mxu1 %v6378_v22 }
  0x6c   : > { %5645 = vmatprep.subr.bf16.mxu1 %v6815_v1 }
  0x6e   : > { %5386 = vmatmul.mubr.bf16.gmra.mrb[32].mxu0 %v302_v14 }
  0x6f   : > { %5389 = vmatprep.mubr.msk.bf16.mxu0 %vm6816_vm0, %v6815_v1  ;;  %5646 = vmatpush3.bf16.msra.mxu1 %v6379_v61 }
  0x70   : > { %5647 = vmatprep.subr.bf16.mxu1 %v7247_v4 }
  0x76   : > { %5390 = vmatmul.mubr.bf16.gmra.mrb[36].mxu0 %v303_v17 }
  0x77   : > { %5393 = vmatprep.mubr.msk.bf16.mxu0 %vm6816_vm0, %v6815_v1 }
  0x7e   : > { %5394 = vmatmul.mubr.bf16.gmra.mrb[40].mxu0 %v304_v20 }
  0x7f   : > { %5397 = vmatprep.mubr.msk.bf16.mxu0 %vm6816_vm0, %v6815_v1 }
  0x86   : > { %5398 = vmatmul.mubr.bf16.gmra.mrb[44].mxu0 %v305_v23 }
  0x87   : > { %5401 = vmatprep.mubr.msk.bf16.mxu0 %vm6816_vm0, %v6815_v1 }
  0x8e   : > { %5402 = vmatmul.mubr.bf16.gmra.mrb[48].mxu0 %v306_v30 }
  0x8f   : > { %5405 = vmatprep.mubr.msk.bf16.mxu0 %vm6816_vm0, %v6815_v1 }
  0x96   : > { %5406 = vmatmul.mubr.bf16.gmra.mrb[52].mxu0 %v307_v37 }
  0x97   : > { %5409 = vmatprep.mubr.msk.bf16.mxu0 %vm6816_vm0, %v6815_v1 }
  0x9e   : > { %5410 = vmatmul.mubr.bf16.gmra.mrb[56].mxu0 %v308_v44 }
  0x9f   : > { %5413 = vmatprep.mubr.msk.bf16.mxu0 %vm6816_vm0, %v6815_v1 }
  0xa6   : > { %5414 = vmatmul.mubr.bf16.gmra.mrb[60].mxu0 %v309_v51 }
  0xa7   : > { %5417 = vmatprep.mubr.msk.bf16.mxu0 %vm6816_vm0, %v6815_v1 }
  0xae   : > { %5418 = vmatmul.mubr.bf16.gmra.mrb[64].mxu0 %v310_v57  ;;  %v876_v57 = vpop.permute.xlu0 %875 }
  0xaf   : > { %5421 = vmatprep.mubr.msk.bf16.mxu0 %vm6816_vm0, %v6815_v1 }
  0xb2   : > { %v881_v10 = vpop.permute.xlu0 %880 }
  0xb6   : > { %5422 = vmatmul.mubr.bf16.gmra.mrb[68].mxu0 %v311_v60 }
  0xb7   : > { %5425 = vmatprep.mubr.msk.bf16.mxu0 %vm6816_vm0, %v6815_v1 }
  0xbe   : > { %5426 = vmatmul.mubr.bf16.gmra.mrb[72].mxu0 %v312_v63 }
  0xbf   : > { %5429 = vmatprep.mubr.msk.bf16.mxu0 %vm6816_vm0, %v6815_v1 }
  0xc6   : > { %5430 = vmatmul.mubr.bf16.gmra.mrb[76].mxu0 %v313_v3 }
  0xc7   : > { %5433 = vmatprep.mubr.msk.bf16.mxu0 %vm6816_vm0, %v6815_v1 }
  0xce   : > { %5434 = vmatmul.mubr.bf16.gmra.mrb[80].mxu0 %v314_v6 }
  0xcf   : > { %5553 = vmatprep.mubr.msk.bf16.mxu0 %vm6816_vm0, %v6815_v1 }
  0xd6   : > { %5554 = vmatmul.mubr.bf16.vlgmr.msra.gmra.mrb[84].mxu0 %v1209_v9 }
  0xd7   : > { %5557 = vmatprep.mubr.msk.bf16.mxu0 %vm6816_vm0, %v6815_v1 }
 0x101   : > { %v420_v13 = vpop.f32.mrb[0].mxu0 }
 0x102   : > { %v421_v14 = vadd.f32 %v7209_v12, %v420_v13  ;;  %v5355_v15 = vpop.f32.mrb[1].mxu0 }
 0x103   : > { %v423_v16 = vpop.f32.mrb[2].mxu0 }
 0x104   : > { %v586_v17 = vsub.f32 0.0, %v421_v14  ;;  %v7213_v18 = vadd.f32 %v7209_v12, %v423_v16  ;;  %v5356_v19 = vpop.f32.mrb[3].mxu0 }
 0x106   : > { %v627_v20 = vmul.f32 1.442695, %v586_v17  ;;  %v587_v21 = vsub.f32 0.0, %v7213_v18 }
 0x108   : > { %6431 = vpow2.f32 %v627_v20  ;;  %v629_v23 = vmul.f32 1.442695, %v587_v21  ;;  %v886_v20 = vpop.permute.xlu1 %885 }
 0x109   : > { %v428_v24 = vpop.f32.mrb[4].mxu0 }
 0x10a   : > { %6433 = vpow2.f32 %v629_v23  ;;  %v7221_v25 = vadd.f32 %v7209_v12, %v428_v24  ;;  %v5359_v26 = vpop.f32.mrb[5].mxu0 }
 0x10b   : > { %v431_v27 = vpop.f32.mrb[6].mxu0 }
 0x10c   : > { %v588_v28 = vsub.f32 0.0, %v7221_v25  ;;  %v7225_v29 = vadd.f32 %v7209_v12, %v431_v27  ;;  %v5360_v30 = vpop.f32.mrb[7].mxu0 }
 0x10e   : > { %v631_v31 = vmul.f32 1.442695, %v588_v28  ;;  %v589_v32 = vsub.f32 0.0, %v7225_v29 }
 0x110   : > { %6435 = vpow2.f32 %v631_v31  ;;  %v633_v33 = vmul.f32 1.442695, %v589_v32 }
 0x111   : > { %v436_v34 = vpop.f32.mrb[8].mxu0 }
 0x112   : > { %v6432_v35 = vpop.eup %6431  ;;  %6437 = vpow2.f32 %v633_v33  ;;  %v7229_v1 = vadd.f32 %v7209_v12, %v436_v34  ;;  %v5363_v36 = vpop.f32.mrb[9].mxu0 }
 0x113   : > { %v709_v37 = vadd.f32 1.0, %v6432_v35  ;;  %v439_v38 = vpop.f32.mrb[10].mxu0  ;;  %v891_v35 = vpop.permute.xlu1 %890 }
 0x114   : > { %v6434_v39 = vpop.eup %6433  ;;  %v590_v40 = vsub.f32 0.0, %v7229_v1  ;;  %v7233_v41 = vadd.f32 %v7209_v12, %v439_v38  ;;  %v5364_v42 = vpop.f32.mrb[11].mxu0 }
 0x115   : > { %6439 = vrcp.f32 %v709_v37  ;;  %v710_v43 = vadd.f32 1.0, %v6434_v39 }
 0x116   : > { %v635_v44 = vmul.f32 1.442695, %v590_v40  ;;  %v591_v45 = vsub.f32 0.0, %v7233_v41 }
 0x117   : > { %6441 = vrcp.f32 %v710_v43 }
 0x118   : > { %6443 = vpow2.f32 %v635_v44  ;;  %v637_v46 = vmul.f32 1.442695, %v591_v45 }
 0x119   : > { %v444_v47 = vpop.f32.mrb[12].mxu0 }
 0x11a   : > { %v6436_v48 = vpop.eup %6435  ;;  %6445 = vpow2.f32 %v637_v46  ;;  %v7237_v49 = vadd.f32 %v7209_v12, %v444_v47  ;;  %v5367_v50 = vpop.f32.mrb[13].mxu0 }
 0x11b   : > { %v711_v51 = vadd.f32 1.0, %v6436_v48  ;;  %v447_v52 = vpop.f32.mrb[14].mxu0 }
 0x11c   : > { %v6438_v53 = vpop.eup %6437  ;;  %v592_v54 = vsub.f32 0.0, %v7237_v49  ;;  %v7241_v55 = vadd.f32 %v7209_v12, %v447_v52  ;;  %v5368_v56 = vpop.f32.mrb[15].mxu0 }
 0x11d   : > { %6447 = vrcp.f32 %v711_v51  ;;  %v712_v58 = vadd.f32 1.0, %v6438_v53  ;;  %v6382_v56 = vld [vmem:[%s8884_s3 + $0xc0] sm:$0xff]  }
 0x11e   : > { %v639_v59 = vmul.f32 1.442695, %v592_v54  ;;  %v593_v60 = vsub.f32 0.0, %v7241_v55  ;;  %5738 = vmatpush3.bf16.msra.mxu0 %v6382_v56 }
 0x11f   : > { %v6440_v62 = vpop.eup %6439  ;;  %6449 = vrcp.f32 %v712_v58  ;;  %v896_v58 = vpop.permute.xlu0 %895  ;;  %5739 = vmatprep.subr.bf16.mxu0 %v7247_v4 }
 0x120   : > { %v791_v63 = vmul.f32 %v6440_v62, %v421_v14  ;;  %6451 = vpow2.f32 %v639_v59  ;;  %v641_v0 = vmul.f32 1.442695, %v593_v60 }
 0x121   : > { %v6442_v2 = vpop.eup %6441  ;;  %v452_v3 = vpop.f32.mrb[16].mxu0 }
 0x122   : > { %v6444_v5 = vpop.eup %6443  ;;  %v1078_v6 = vmul.f32 %v876_v57, %v791_v63  ;;  %v792_v7 = vmul.f32 %v6442_v2, %v7213_v18  ;;  %6453 = vpow2.f32 %v641_v0  ;;  %v7252_v8 = vadd.f32 %v7209_v12, %v452_v3  ;;  %v5371_v9 = vpop.f32.mrb[17].mxu0 }
 0x123   : > { %v713_v11 = vadd.f32 1.0, %v6444_v5  ;;  %v455_v13 = vpop.f32.mrb[18].mxu0  ;;  %v901_v0 = vpop.permute.xlu1 %900 }
 0x124   : > { %v6446_v14 = vpop.eup %6445  ;;  %1127 = vst [vmem:[#allocation2 + $0x20] sm:$0xff] %v1078_v6  ;;  %v1079_v15 = vmul.f32 %v881_v10, %v792_v7  ;;  %v594_v16 = vsub.f32 0.0, %v7252_v8  ;;  %v7256_v17 = vadd.f32 %v7209_v12, %v455_v13  ;;  %v5372_v19 = vpop.f32.mrb[19].mxu0  ;;  %v6380_v10 = vld [vmem:[%s8884_s3 + $0xa8] sm:$0xff]  }
 0x125   : > { %6455 = vrcp.f32 %v713_v11  ;;  %v714_v18 = vadd.f32 1.0, %v6446_v14  ;;  %v6383_v11 = vld [vmem:[%s8884_s3 + $0xc8] sm:$0xff]   ;;  %5648 = vmatpush3.bf16.msra.mxu1 %v6380_v10 }
 0x126   : > { %1128 = vst [vmem:[#allocation2 + $0x28] sm:$0xff] %v1079_v15  ;;  %v643_v21 = vmul.f32 1.442695, %v594_v16  ;;  %v595_v22 = vsub.f32 0.0, %v7256_v17  ;;  %5740 = vmatpush3.bf16.msra.mxu0 %v6383_v11  ;;  %5649 = vmatprep.subr.bf16.mxu1 %v7247_v4 }
 0x127   : > { %v6448_v23 = vpop.eup %6447  ;;  %6457 = vrcp.f32 %v714_v18  ;;  %5741 = vmatprep.subr.bf16.mxu0 %v7247_v4 }
 0x128   : > { %v793_v24 = vmul.f32 %v6448_v23, %v7221_v25  ;;  %6459 = vpow2.f32 %v643_v21  ;;  %v645_v26 = vmul.f32 1.442695, %v595_v22 }
 0x129   : > { %v6450_v27 = vpop.eup %6449  ;;  %v460_v28 = vpop.f32.mrb[20].mxu0 }
 0x12a   : > { %v6452_v30 = vpop.eup %6451  ;;  %v1080_v31 = vmul.f32 %v886_v20, %v793_v24  ;;  %v794_v32 = vmul.f32 %v6450_v27, %v7225_v29  ;;  %6461 = vpow2.f32 %v645_v26  ;;  %v7262_v33 = vadd.f32 %v7209_v12, %v460_v28  ;;  %v5375_v34 = vpop.f32.mrb[21].mxu0  ;;  %v6384_v27 = vld [vmem:[%s8884_s3 + $0xd0] sm:$0xff]  }
 0x12b   : > { %v715_v36 = vadd.f32 1.0, %v6452_v30  ;;  %v463_v37 = vpop.f32.mrb[22].mxu0  ;;  %v1248_v43 = vld [vmem:[#allocation2 + $0x1e] sm:$0xff]  ;;  %v906_v30 = vpop.permute.xlu0 %905  ;;  %5742 = vmatpush3.bf16.msra.mxu0 %v6384_v27 }
 0x12c   : > { %v6454_v38 = vpop.eup %6453  ;;  %1129 = vst [vmem:[#allocation2 + $0x30] sm:$0xff] %v1080_v31  ;;  %v1081_v39 = vmul.f32 %v891_v35, %v794_v32  ;;  %v596_v25 = vsub.f32 0.0, %v7262_v33  ;;  %v7266_v40 = vadd.f32 %v7209_v12, %v463_v37  ;;  %v5376_v42 = vpop.f32.mrb[23].mxu0  ;;  %v1170_v45 = vld [vmem:[#allocation2 + $0x1d] sm:$0xff]  ;;  %5743 = vmatprep.subr.bf16.mxu0 %v7247_v4 }
 0x12d   : > { %6463 = vrcp.f32 %v715_v36  ;;  %v716_v29 = vadd.f32 1.0, %v6454_v38  ;;  %v1249_v44 = vld [vmem:[#allocation2 + $0x26] sm:$0xff]  ;;  %v911_v37 = vpop.permute.xlu1 %910  ;;  %v6385_v27 = vld [vmem:[%s8884_s3 + $0xb8] sm:$0xff]  }
 0x12e   : > { %v1171_v46 = vld [vmem:[#allocation2 + $0x25] sm:$0xff]  ;;  %1130 = vst [vmem:[#allocation2 + $0x38] sm:$0xff] %v1081_v39  ;;  %v647_v47 = vmul.f32 1.442695, %v596_v25  ;;  %v597_v48 = vsub.f32 0.0, %v7266_v40  ;;  %v1288_v50 = vpack.c.bf16 %v1249_v44, %v1248_v43 }
 0x12f   : > { %v1210_v51 = vpack.c.bf16 %v1171_v46, %v1170_v45  ;;  %v6456_v52 = vpop.eup %6455  ;;  %6465 = vrcp.f32 %v716_v29  ;;  %v6386_v45 = vld [vmem:[%s8884_s3 + $0xd8] sm:$0xff]  }
 0x130   : > { %v795_v53 = vmul.f32 %v6456_v52, %v7229_v1  ;;  %6467 = vpow2.f32 %v647_v47  ;;  %v649_v54 = vmul.f32 1.442695, %v597_v48  ;;  %5458 = vmatmul.mubr.bf16.gmra.mrb[4].mxu1 %v1288_v50  ;;  %5744 = vmatpush3.bf16.msra.mxu0 %v6386_v45 }
 0x131   : > { %5558 = vmatmul.mubr.bf16.gmra.mrb[88].mxu0 %v1210_v51  ;;  %v6458_v57 = vpop.eup %6457  ;;  %v468_v59 = vpop.f32.mrb[24].mxu0  ;;  %5461 = vmatprep.mubr.msk.bf16.mxu1 %vm6816_vm0, %v7247_v4 }
 0x132   : > { %5561 = vmatprep.mubr.msk.bf16.mxu0 %vm6816_vm0, %v7247_v4  ;;  %v6460_v60 = vpop.eup %6459  ;;  %v1082_v61 = vmul.f32 %v896_v58, %v795_v53  ;;  %v796_v1 = vmul.f32 %v6458_v57, %v7233_v41  ;;  %6469 = vpow2.f32 %v649_v54  ;;  %v7279_v62 = vadd.f32 %v7209_v12, %v468_v59  ;;  %v5379_v63 = vpop.f32.mrb[25].mxu0  ;;  %5745 = vmatprep.subr.bf16.mxu0 %v7247_v4  ;;  %v6387_v59 = vld [vmem:[%s8884_s3 + $0xe0] sm:$0xff]  }
 0x133   : > { %v717_v2 = vadd.f32 1.0, %v6460_v60  ;;  %v471_v3 = vpop.f32.mrb[26].mxu0  ;;  %v1250_v14 = vld [vmem:[#allocation2 + $0x2e] sm:$0xff] }
 0x134   : > { %v6462_v5 = vpop.eup %6461  ;;  %1131 = vst [vmem:[#allocation2 + $0x40] sm:$0xff] %v1082_v61  ;;  %v1083_v6 = vmul.f32 %v901_v0, %v796_v1  ;;  %v598_v7 = vsub.f32 0.0, %v7279_v62  ;;  %v7284_v9 = vadd.f32 %v7209_v12, %v471_v3  ;;  %v5380_v41 = vpop.f32.mrb[27].mxu0  ;;  %v1172_v18 = vld [vmem:[#allocation2 + $0x2d] sm:$0xff]  ;;  %5746 = vmatpush3.bf16.msra.mxu0 %v6387_v59 }
 0x135   : > { %6471 = vrcp.f32 %v717_v2  ;;  %v718_v13 = vadd.f32 1.0, %v6462_v5  ;;  %v1251_v15 = vld [vmem:[#allocation2 + $0x36] sm:$0xff]  ;;  %v916_v61 = vpop.permute.xlu0 %915  ;;  %v921_v5 = vpop.permute.xlu1 %920  ;;  %5747 = vmatprep.subr.bf16.mxu0 %v7247_v4 }
 0x136   : > { %1132 = vst [vmem:[#allocation2 + $0x48] sm:$0xff] %v1083_v6  ;;  %v651_v16 = vmul.f32 1.442695, %v598_v7  ;;  %v599_v19 = vsub.f32 0.0, %v7284_v9  ;;  %v1289_v20 = vpack.c.bf16 %v1251_v15, %v1250_v14  ;;  %v1173_v21 = vld [vmem:[#allocation2 + $0x35] sm:$0xff] }
 0x137   : > { %v6464_v22 = vpop.eup %6463  ;;  %6473 = vrcp.f32 %v718_v13  ;;  %v1211_v23 = vpack.c.bf16 %v1173_v21, %v1172_v18  ;;  %v6381_v15 = vld [vmem:[%s8884_s3 + $0xb0] sm:$0xff]  }
 0x138   : > { %v797_v24 = vmul.f32 %v6464_v22, %v7237_v49  ;;  %6475 = vpow2.f32 %v651_v16  ;;  %v653_v26 = vmul.f32 1.442695, %v599_v19  ;;  %5462 = vmatmul.mubr.bf16.gmra.mrb[8].mxu1 %v1289_v20  ;;  %v6388_v16 = vld [vmem:[%s8884_s3 + $0xe8] sm:$0xff]  }
 0x139   : > { %v6466_v28 = vpop.eup %6465  ;;  %5562 = vmatmul.mubr.bf16.gmra.mrb[92].mxu0 %v1211_v23  ;;  %v476_v31 = vpop.f32.mrb[28].mxu0  ;;  %5465 = vmatprep.mubr.msk.bf16.mxu1 %vm6816_vm0, %v7247_v4 }
 0x13a   : > { %v6468_v32 = vpop.eup %6467  ;;  %v1084_v34 = vmul.f32 %v906_v30, %v797_v24  ;;  %v798_v35 = vmul.f32 %v6466_v28, %v7241_v55  ;;  %6477 = vpow2.f32 %v653_v26  ;;  %v7303_v49 = vadd.f32 %v7209_v12, %v476_v31  ;;  %v5383_v36 = vpop.f32.mrb[29].mxu0  ;;  %5565 = vmatprep.mubr.msk.bf16.mxu0 %vm6816_vm0, %v7247_v4  ;;  %5650 = vmatpush3.bf16.msra.mxu1 %v6381_v15 }
 0x13b   : > { %v719_v38 = vadd.f32 1.0, %v6468_v32  ;;  %v479_v39 = vpop.f32.mrb[30].mxu0  ;;  %v1252_v44 = vld [vmem:[#allocation2 + $0x3e] sm:$0xff]  ;;  %5748 = vmatpush3.bf16.msra.mxu0 %v6388_v16  ;;  %5651 = vmatprep.subr.bf16.mxu1 %v7247_v4  ;;  %v6389_v32 = vld [vmem:[%s8884_s3 + $0xf0] sm:$0xff]  }
 0x13c   : > { %v6470_v25 = vpop.eup %6469  ;;  %1133 = vst [vmem:[#allocation2 + $0x50] sm:$0xff] %v1084_v34  ;;  %v1085_v42 = vmul.f32 %v911_v37, %v798_v35  ;;  %v600_v43 = vsub.f32 0.0, %v7303_v49  ;;  %v7310_v55 = vadd.f32 %v7209_v12, %v479_v39  ;;  %v5384_v29 = vpop.f32.mrb[31].mxu0  ;;  %v1174_v48 = vld [vmem:[#allocation2 + $0x3d] sm:$0xff]  ;;  %5749 = vmatprep.subr.bf16.mxu0 %v7247_v4 }
 0x13d   : > { %6479 = vrcp.f32 %v719_v38  ;;  %v720_v46 = vadd.f32 1.0, %v6470_v25  ;;  %v1253_v47 = vld [vmem:[#allocation2 + $0x46] sm:$0xff]  ;;  %v926_v35 = vpop.permute.xlu0 %925 }
 0x13e   : > { %v1175_v50 = vld [vmem:[#allocation2 + $0x45] sm:$0xff]  ;;  %1134 = vst [vmem:[#allocation2 + $0x58] sm:$0xff] %v1085_v42  ;;  %v655_v51 = vmul.f32 1.442695, %v600_v43  ;;  %v601_v52 = vsub.f32 0.0, %v7310_v55  ;;  %v1290_v53 = vpack.c.bf16 %v1253_v47, %v1252_v44  ;;  %5652 = vmatpush3.bf16.msra.mxu1 %v6385_v27  ;;  %v931_v42 = vpop.permute.xlu1 %930  ;;  %v6390_v44 = vld [vmem:[%s8884_s3 + $0xf8] sm:$0xff]  }
 0x13f   : > { %v1212_v54 = vpack.c.bf16 %v1175_v50, %v1174_v48  ;;  %v6472_v56 = vpop.eup %6471  ;;  %6481 = vrcp.f32 %v720_v46  ;;  %5750 = vmatpush3.bf16.msra.mxu0 %v6389_v32  ;;  %5837 = vmatprep.subr.bf16.mxu1 %v7247_v4 }
 0x140   : > { %v799_v57 = vmul.f32 %v6472_v56, %v7252_v8  ;;  %6483 = vpow2.f32 %v655_v51  ;;  %v657_v58 = vmul.f32 1.442695, %v601_v52  ;;  %5466 = vmatmul.mubr.bf16.gmra.mrb[12].mxu1 %v1290_v53  ;;  %5751 = vmatprep.subr.bf16.mxu0 %v7247_v4 }
 0x141   : > { %v6474_v60 = vpop.eup %6473  ;;  %5566 = vmatmul.mubr.bf16.gmra.mrb[96].mxu0 %v1212_v54  ;;  %v484_v1 = vpop.f32.mrb[32].mxu0  ;;  %5469 = vmatprep.mubr.msk.bf16.mxu1 %vm6816_vm0, %v7247_v4 }
 0x142   : > { %v6476_v63 = vpop.eup %6475  ;;  %v1086_v0 = vmul.f32 %v916_v61, %v799_v57  ;;  %v800_v2 = vmul.f32 %v6474_v60, %v7256_v17  ;;  %6485 = vpow2.f32 %v657_v58  ;;  %v7325_v8 = vadd.f32 %v7209_v12, %v484_v1  ;;  %v5387_v3 = vpop.f32.mrb[33].mxu0  ;;  %5569 = vmatprep.mubr.msk.bf16.mxu0 %vm6816_vm0, %v7247_v4 }
 0x143   : > { %v721_v6 = vadd.f32 1.0, %v6476_v63  ;;  %v487_v7 = vpop.f32.mrb[34].mxu0  ;;  %v1254_v14 = vld [vmem:[#allocation2 + $0x4e] sm:$0xff]  ;;  %5752 = vmatpush3.bf16.msra.mxu0 %v6390_v44 }
 0x144   : > { %v6478_v41 = vpop.eup %6477  ;;  %1135 = vst [vmem:[#allocation2 + $0x60] sm:$0xff] %v1086_v0  ;;  %v1087_v10 = vmul.f32 %v921_v5, %v800_v2  ;;  %v602_v11 = vsub.f32 0.0, %v7325_v8  ;;  %v7332_v17 = vadd.f32 %v7209_v12, %v487_v7  ;;  %v5388_v13 = vpop.f32.mrb[35].mxu0  ;;  %v1176_v18 = vld [vmem:[#allocation2 + $0x4d] sm:$0xff]  ;;  %5937 = vmatprep.subr.bf16.mxu0 %v7247_v4 }
 0x145   : > { %6487 = vrcp.f32 %v721_v6  ;;  %v722_v19 = vadd.f32 1.0, %v6478_v41  ;;  %v1255_v20 = vld [vmem:[#allocation2 + $0x56] sm:$0xff]  ;;  %v936_v0 = vpop.permute.xlu0 %935  ;;  %v941_v41 = vpop.permute.xlu1 %940 }
 0x146   : > { %v1177_v21 = vld [vmem:[#allocation2 + $0x55] sm:$0xff]  ;;  %1136 = vst [vmem:[#allocation2 + $0x68] sm:$0xff] %v1087_v10  ;;  %v659_v22 = vmul.f32 1.442695, %v602_v11  ;;  %v603_v23 = vsub.f32 0.0, %v7332_v17  ;;  %v1291_v24 = vpack.c.bf16 %v1255_v20, %v1254_v14 }
 0x147   : > { %v1213_v26 = vpack.c.bf16 %v1177_v21, %v1176_v18  ;;  %v6480_v28 = vpop.eup %6479  ;;  %6489 = vrcp.f32 %v722_v19 }
 0x148   : > { %v801_v30 = vmul.f32 %v6480_v28, %v7262_v33  ;;  %6491 = vpow2.f32 %v659_v22  ;;  %v661_v31 = vmul.f32 1.442695, %v603_v23  ;;  %5470 = vmatmul.mubr.bf16.gmra.mrb[16].mxu1 %v1291_v24 }
 0x149   : > { %v6482_v34 = vpop.eup %6481  ;;  %5570 = vmatmul.mubr.bf16.gmra.mrb[100].mxu0 %v1213_v26  ;;  %v492_v36 = vpop.f32.mrb[36].mxu0  ;;  %5473 = vmatprep.mubr.msk.bf16.mxu1 %vm6816_vm0, %v7247_v4 }
 0x14a   : > { %v6484_v37 = vpop.eup %6483  ;;  %v1088_v38 = vmul.f32 %v926_v35, %v801_v30  ;;  %v802_v39 = vmul.f32 %v6482_v34, %v7266_v40  ;;  %6493 = vpow2.f32 %v661_v31  ;;  %v7354_v33 = vadd.f32 %v7209_v12, %v492_v36  ;;  %v5391_v25 = vpop.f32.mrb[37].mxu0  ;;  %5573 = vmatprep.mubr.msk.bf16.mxu0 %vm6816_vm0, %v7247_v4 }
 0x14b   : > { %v723_v43 = vadd.f32 1.0, %v6484_v37  ;;  %v495_v29 = vpop.f32.mrb[38].mxu0  ;;  %v1256_v50 = vld [vmem:[#allocation2 + $0x5e] sm:$0xff]  ;;  %v946_v34 = vpop.permute.xlu0 %945 }
 0x14c   : > { %v6486_v40 = vpop.eup %6485  ;;  %1137 = vst [vmem:[#allocation2 + $0x70] sm:$0xff] %v1088_v38  ;;  %v1089_v45 = vmul.f32 %v931_v42, %v802_v39  ;;  %v604_v46 = vsub.f32 0.0, %v7354_v33  ;;  %v7364_v47 = vadd.f32 %v7209_v12, %v495_v29  ;;  %v5392_v48 = vpop.f32.mrb[39].mxu0  ;;  %v1178_v53 = vld [vmem:[#allocation2 + $0x5d] sm:$0xff] }
 0x14d   : > { %6495 = vrcp.f32 %v723_v43  ;;  %v724_v51 = vadd.f32 1.0, %v6486_v40  ;;  %v1257_v52 = vld [vmem:[#allocation2 + $0x66] sm:$0xff] }
 0x14e   : > { %v1179_v54 = vld [vmem:[#allocation2 + $0x65] sm:$0xff]  ;;  %1138 = vst [vmem:[#allocation2 + $0x78] sm:$0xff] %v1089_v45  ;;  %v663_v56 = vmul.f32 1.442695, %v604_v46  ;;  %v605_v57 = vsub.f32 0.0, %v7364_v47  ;;  %v1292_v58 = vpack.c.bf16 %v1257_v52, %v1256_v50 }
 0x14f   : > { %v1214_v59 = vpack.c.bf16 %v1179_v54, %v1178_v53  ;;  %v6488_v60 = vpop.eup %6487  ;;  %6497 = vrcp.f32 %v724_v51 }
 0x150   : > { %v803_v61 = vmul.f32 %v6488_v60, %v7279_v62  ;;  %6499 = vpow2.f32 %v663_v56  ;;  %v665_v1 = vmul.f32 1.442695, %v605_v57  ;;  %5474 = vmatmul.mubr.bf16.gmra.mrb[20].mxu1 %v1292_v58 }
 0x151   : > { %v6490_v63 = vpop.eup %6489  ;;  %5574 = vmatmul.mubr.bf16.gmra.mrb[104].mxu0 %v1214_v59  ;;  %v500_v2 = vpop.f32.mrb[40].mxu0  ;;  %5477 = vmatprep.mubr.msk.bf16.mxu1 %vm6816_vm0, %v7247_v4 }
 0x152   : > { %v6492_v3 = vpop.eup %6491  ;;  %v1090_v5 = vmul.f32 %v936_v0, %v803_v61  ;;  %v804_v6 = vmul.f32 %v6490_v63, %v7284_v9  ;;  %6501 = vpow2.f32 %v665_v1  ;;  %v7374_v7 = vadd.f32 %v7209_v12, %v500_v2  ;;  %v5395_v62 = vpop.f32.mrb[41].mxu0  ;;  %5577 = vmatprep.mubr.msk.bf16.mxu0 %vm6816_vm0, %v7247_v4 }
 0x153   : > { %v725_v10 = vadd.f32 1.0, %v6492_v3  ;;  %v503_v11 = vpop.f32.mrb[42].mxu0  ;;  %v1258_v19 = vld [vmem:[#allocation2 + $0x6e] sm:$0xff]  ;;  %v956_v1 = vpop.permute.xlu0 %955 }
 0x154   : > { %v6494_v13 = vpop.eup %6493  ;;  %1139 = vst [vmem:[#allocation2 + $0x80] sm:$0xff] %v1090_v5  ;;  %v1091_v14 = vmul.f32 %v941_v41, %v804_v6  ;;  %v606_v15 = vsub.f32 0.0, %v7374_v7  ;;  %v7380_v16 = vadd.f32 %v7209_v12, %v503_v11  ;;  %v5396_v9 = vpop.f32.mrb[43].mxu0  ;;  %v1180_v21 = vld [vmem:[#allocation2 + $0x6d] sm:$0xff] }
 0x155   : > { %6503 = vrcp.f32 %v725_v10  ;;  %v726_v20 = vadd.f32 1.0, %v6494_v13  ;;  %v1259_v18 = vld [vmem:[#allocation2 + $0x76] sm:$0xff] }
 0x156   : > { %v1181_v22 = vld [vmem:[#allocation2 + $0x75] sm:$0xff]  ;;  %1140 = vst [vmem:[#allocation2 + $0x88] sm:$0xff] %v1091_v14  ;;  %v667_v23 = vmul.f32 1.442695, %v606_v15  ;;  %v607_v24 = vsub.f32 0.0, %v7380_v16  ;;  %v1293_v26 = vpack.c.bf16 %v1259_v18, %v1258_v19 }
 0x157   : > { %v1215_v27 = vpack.c.bf16 %v1181_v22, %v1180_v21  ;;  %v6496_v28 = vpop.eup %6495  ;;  %6505 = vrcp.f32 %v726_v20 }
 0x158   : > { %v805_v30 = vmul.f32 %v6496_v28, %v7303_v49  ;;  %6507 = vpow2.f32 %v667_v23  ;;  %v669_v31 = vmul.f32 1.442695, %v607_v24  ;;  %5478 = vmatmul.mubr.bf16.gmra.mrb[24].mxu1 %v1293_v26  ;;  %v951_v49 = vpop.permute.xlu1 %950 }
 0x159   : > { %v6498_v32 = vpop.eup %6497  ;;  %5578 = vmatmul.mubr.bf16.gmra.mrb[108].mxu0 %v1215_v27  ;;  %v508_v35 = vpop.f32.mrb[44].mxu0  ;;  %5481 = vmatprep.mubr.msk.bf16.mxu1 %vm6816_vm0, %v7247_v4 }
 0x15a   : > { %v6500_v36 = vpop.eup %6499  ;;  %v1092_v37 = vmul.f32 %v946_v34, %v805_v30  ;;  %v806_v38 = vmul.f32 %v6498_v32, %v7310_v55  ;;  %6509 = vpow2.f32 %v669_v31  ;;  %v7388_v39 = vadd.f32 %v7209_v12, %v508_v35  ;;  %v5399_v25 = vpop.f32.mrb[45].mxu0  ;;  %5581 = vmatprep.mubr.msk.bf16.mxu0 %vm6816_vm0, %v7247_v4 }
 0x15b   : > { %v727_v42 = vadd.f32 1.0, %v6500_v36  ;;  %v511_v43 = vpop.f32.mrb[46].mxu0  ;;  %v1260_v46 = vld [vmem:[#allocation2 + $0x7e] sm:$0xff]  ;;  %v966_v31 = vpop.permute.xlu0 %965 }
 0x15c   : > { %v6502_v29 = vpop.eup %6501  ;;  %1141 = vst [vmem:[#allocation2 + $0x90] sm:$0xff] %v1092_v37  ;;  %v1093_v44 = vmul.f32 %v951_v49, %v806_v38  ;;  %v608_v40 = vsub.f32 0.0, %v7388_v39  ;;  %v7394_v45 = vadd.f32 %v7209_v12, %v511_v43  ;;  %v5400_v55 = vpop.f32.mrb[47].mxu0  ;;  %v1182_v51 = vld [vmem:[#allocation2 + $0x7d] sm:$0xff] }
 0x15d   : > { %6511 = vrcp.f32 %v727_v42  ;;  %v728_v48 = vadd.f32 1.0, %v6502_v29  ;;  %v1261_v50 = vld [vmem:[#allocation2 + $0x86] sm:$0xff] }
 0x15e   : > { %v1183_v52 = vld [vmem:[#allocation2 + $0x85] sm:$0xff]  ;;  %1142 = vst [vmem:[#allocation2 + $0x98] sm:$0xff] %v1093_v44  ;;  %v671_v53 = vmul.f32 1.442695, %v608_v40  ;;  %v609_v54 = vsub.f32 0.0, %v7394_v45  ;;  %v1294_v56 = vpack.c.bf16 %v1261_v50, %v1260_v46 }
 0x15f   : > { %v1216_v57 = vpack.c.bf16 %v1183_v52, %v1182_v51  ;;  %v6504_v58 = vpop.eup %6503  ;;  %6513 = vrcp.f32 %v728_v48 }
 0x160   : > { %v807_v59 = vmul.f32 %v6504_v58, %v7325_v8  ;;  %6515 = vpow2.f32 %v671_v53  ;;  %v673_v60 = vmul.f32 1.442695, %v609_v54  ;;  %5482 = vmatmul.mubr.bf16.gmra.mrb[28].mxu1 %v1294_v56  ;;  %v961_v8 = vpop.permute.xlu1 %960 }
 0x161   : > { %v6506_v61 = vpop.eup %6505  ;;  %5582 = vmatmul.mubr.bf16.gmra.mrb[112].mxu0 %v1216_v57  ;;  %v516_v63 = vpop.f32.mrb[48].mxu0  ;;  %5485 = vmatprep.mubr.msk.bf16.mxu1 %vm6816_vm0, %v7247_v4 }
 0x162   : > { %v6508_v0 = vpop.eup %6507  ;;  %v1094_v2 = vmul.f32 %v956_v1, %v807_v59  ;;  %v808_v3 = vmul.f32 %v6506_v61, %v7332_v17  ;;  %6517 = vpow2.f32 %v673_v60  ;;  %v7402_v5 = vadd.f32 %v7209_v12, %v516_v63  ;;  %v5403_v6 = vpop.f32.mrb[49].mxu0  ;;  %5585 = vmatprep.mubr.msk.bf16.mxu0 %vm6816_vm0, %v7247_v4 }
 0x163   : > { %v729_v62 = vadd.f32 1.0, %v6508_v0  ;;  %v519_v41 = vpop.f32.mrb[50].mxu0  ;;  %v1262_v15 = vld [vmem:[#allocation2 + $0x8e] sm:$0xff]  ;;  %v976_v60 = vpop.permute.xlu0 %975 }
 0x164   : > { %v6510_v10 = vpop.eup %6509  ;;  %1143 = vst [vmem:[#allocation2 + $0xa0] sm:$0xff] %v1094_v2  ;;  %v1095_v11 = vmul.f32 %v961_v8, %v808_v3  ;;  %v610_v13 = vsub.f32 0.0, %v7402_v5  ;;  %v7408_v14 = vadd.f32 %v7209_v12, %v519_v41  ;;  %v5404_v17 = vpop.f32.mrb[51].mxu0  ;;  %v1184_v20 = vld [vmem:[#allocation2 + $0x8d] sm:$0xff] }
 0x165   : > { %6519 = vrcp.f32 %v729_v62  ;;  %v730_v9 = vadd.f32 1.0, %v6510_v10  ;;  %v1263_v19 = vld [vmem:[#allocation2 + $0x96] sm:$0xff] }
 0x166   : > { %v1185_v18 = vld [vmem:[#allocation2 + $0x95] sm:$0xff]  ;;  %1144 = vst [vmem:[#allocation2 + $0xa8] sm:$0xff] %v1095_v11  ;;  %v675_v21 = vmul.f32 1.442695, %v610_v13  ;;  %v611_v22 = vsub.f32 0.0, %v7408_v14  ;;  %v1295_v23 = vpack.c.bf16 %v1263_v19, %v1262_v15 }
 0x167   : > { %v1217_v24 = vpack.c.bf16 %v1185_v18, %v1184_v20  ;;  %v6512_v26 = vpop.eup %6511  ;;  %6521 = vrcp.f32 %v730_v9 }
 0x168   : > { %v809_v27 = vmul.f32 %v6512_v26, %v7354_v33  ;;  %6523 = vpow2.f32 %v675_v21  ;;  %v677_v28 = vmul.f32 1.442695, %v611_v22  ;;  %5486 = vmatmul.mubr.bf16.gmra.mrb[32].mxu1 %v1295_v23  ;;  %v971_v33 = vpop.permute.xlu1 %970 }
 0x169   : > { %v6514_v30 = vpop.eup %6513  ;;  %5586 = vmatmul.mubr.bf16.gmra.mrb[116].mxu0 %v1217_v24  ;;  %v524_v32 = vpop.f32.mrb[52].mxu0  ;;  %5489 = vmatprep.mubr.msk.bf16.mxu1 %vm6816_vm0, %v7247_v4 }
 0x16a   : > { %v6516_v34 = vpop.eup %6515  ;;  %v1096_v35 = vmul.f32 %v966_v31, %v809_v27  ;;  %v810_v36 = vmul.f32 %v6514_v30, %v7364_v47  ;;  %6525 = vpow2.f32 %v677_v28  ;;  %v7416_v37 = vadd.f32 %v7209_v12, %v524_v32  ;;  %v5407_v38 = vpop.f32.mrb[53].mxu0  ;;  %5589 = vmatprep.mubr.msk.bf16.mxu0 %vm6816_vm0, %v7247_v4 }
 0x16b   : > { %v731_v25 = vadd.f32 1.0, %v6516_v34  ;;  %v527_v49 = vpop.f32.mrb[54].mxu0  ;;  %v1264_v40 = vld [vmem:[#allocation2 + $0x9e] sm:$0xff]  ;;  %v986_v24 = vpop.permute.xlu0 %985 }
 0x16c   : > { %v6518_v42 = vpop.eup %6517  ;;  %1145 = vst [vmem:[#allocation2 + $0xb0] sm:$0xff] %v1096_v35  ;;  %v1097_v43 = vmul.f32 %v971_v33, %v810_v36  ;;  %v612_v29 = vsub.f32 0.0, %v7416_v37  ;;  %v7422_v44 = vadd.f32 %v7209_v12, %v527_v49  ;;  %v5408_v47 = vpop.f32.mrb[55].mxu0  ;;  %v1186_v48 = vld [vmem:[#allocation2 + $0x9d] sm:$0xff] }
 0x16d   : > { %6527 = vrcp.f32 %v731_v25  ;;  %v732_v55 = vadd.f32 1.0, %v6518_v42  ;;  %v1265_v46 = vld [vmem:[#allocation2 + $0xa6] sm:$0xff]  ;;  %v981_v63 = vpop.permute.xlu1 %980  ;;  %v7440_v28 = vpop.f32.mrb[0].mxu1 }
 0x16e   : > { %v1187_v50 = vld [vmem:[#allocation2 + $0xa5] sm:$0xff]  ;;  %1146 = vst [vmem:[#allocation2 + $0xb8] sm:$0xff] %v1097_v43  ;;  %v679_v51 = vmul.f32 1.442695, %v612_v29  ;;  %v613_v52 = vsub.f32 0.0, %v7422_v44  ;;  %v1296_v53 = vpack.c.bf16 %v1265_v46, %v1264_v40  ;;  %v5455_v32 = vpop.f32.mrb[1].mxu1 }
 0x16f   : > { %v1218_v54 = vpack.c.bf16 %v1187_v50, %v1186_v48  ;;  %v6520_v56 = vpop.eup %6519  ;;  %6529 = vrcp.f32 %v732_v55  ;;  %v7455_v25 = vpop.f32.mrb[2].mxu1  ;;  %v7477_v32 = vld [vmem:[#allocation2] sm:$0xff] }
 0x170   : > { %v811_v57 = vmul.f32 %v6520_v56, %v7374_v7  ;;  %6531 = vpow2.f32 %v679_v51  ;;  %v681_v58 = vmul.f32 1.442695, %v613_v52  ;;  %5490 = vmatmul.mubr.bf16.gmra.mrb[36].mxu1 %v1296_v53  ;;  %v5456_v43 = vpop.f32.mrb[3].mxu1 }
 0x171   : > { %v6522_v59 = vpop.eup %6521  ;;  %5590 = vmatmul.mubr.bf16.gmra.mrb[120].mxu0 %v1218_v54  ;;  %v532_v61 = vpop.f32.mrb[56].mxu0  ;;  %5493 = vmatprep.mubr.msk.bf16.mxu1 %vm6816_vm0, %v7247_v4 }
 0x172   : > { %v6524_v1 = vpop.eup %6523  ;;  %v1098_v0 = vmul.f32 %v976_v60, %v811_v57  ;;  %v812_v2 = vmul.f32 %v6522_v59, %v7380_v16  ;;  %6533 = vpow2.f32 %v681_v58  ;;  %v7430_v3 = vadd.f32 %v7209_v12, %v532_v61  ;;  %v5411_v7 = vpop.f32.mrb[57].mxu0  ;;  %5593 = vmatprep.mubr.msk.bf16.mxu0 %vm6816_vm0, %v7247_v4 }
 0x173   : > { %v733_v6 = vadd.f32 1.0, %v6524_v1  ;;  %v535_v8 = vpop.f32.mrb[58].mxu0  ;;  %v1266_v16 = vld [vmem:[#allocation2 + $0xae] sm:$0xff]  ;;  %v991_v26 = vpop.permute.xlu1 %990 }
 0x174   : > { %v6526_v62 = vpop.eup %6525  ;;  %1147 = vst [vmem:[#allocation2 + $0xc0] sm:$0xff] %v1098_v0  ;;  %v1099_v41 = vmul.f32 %v981_v63, %v812_v2  ;;  %v614_v10 = vsub.f32 0.0, %v7430_v3  ;;  %v7436_v11 = vadd.f32 %v7209_v12, %v535_v8  ;;  %v5412_v13 = vpop.f32.mrb[59].mxu0  ;;  %v1188_v9 = vld [vmem:[#allocation2 + $0xad] sm:$0xff] }
 0x175   : > { %6535 = vrcp.f32 %v733_v6  ;;  %v734_v17 = vadd.f32 1.0, %v6526_v62  ;;  %v1267_v15 = vld [vmem:[#allocation2 + $0xb6] sm:$0xff]  ;;  %v996_v1 = vpop.permute.xlu0 %995 }
 0x176   : > { %v1189_v19 = vld [vmem:[#allocation2 + $0xb5] sm:$0xff]  ;;  %1148 = vst [vmem:[#allocation2 + $0xc8] sm:$0xff] %v1099_v41  ;;  %v683_v20 = vmul.f32 1.442695, %v614_v10  ;;  %v615_v18 = vsub.f32 0.0, %v7436_v11  ;;  %v1297_v21 = vpack.c.bf16 %v1267_v15, %v1266_v16 }
 0x177   : > { %v1219_v22 = vpack.c.bf16 %v1189_v19, %v1188_v9  ;;  %v6528_v23 = vpop.eup %6527  ;;  %6537 = vrcp.f32 %v734_v17 }
 0x178   : > { %v813_v12 = vmul.f32 %v6528_v23, %v7388_v39  ;;  %6539 = vpow2.f32 %v683_v20  ;;  %v685_v27 = vmul.f32 1.442695, %v615_v18  ;;  %5494 = vmatmul.mubr.bf16.gmra.mrb[40].mxu1 %v1297_v21  ;;  %v7448_v39 = vld [vmem:[%s8883_s2] ss:$0 sm:$0xff] }
 0x179   : > { %v6530_v30 = vpop.eup %6529  ;;  %5594 = vmatmul.mubr.bf16.gmra.mrb[124].mxu0 %v1219_v22  ;;  %v540_v31 = vpop.f32.mrb[60].mxu0  ;;  %5497 = vmatprep.mubr.msk.bf16.mxu1 %vm6816_vm0, %v7247_v4 }
 0x17a   : > { %v6532_v34 = vpop.eup %6531  ;;  %v1100_v35 = vmul.f32 %v986_v24, %v813_v12  ;;  %v814_v36 = vmul.f32 %v6530_v30, %v7394_v45  ;;  %6541 = vpow2.f32 %v685_v27  ;;  %v7451_v38 = vadd.f32 %v7448_v39, %v540_v31  ;;  %v5415_v33 = vpop.f32.mrb[61].mxu0  ;;  %5597 = vmatprep.mubr.msk.bf16.mxu0 %vm6816_vm0, %v7247_v4 }
 0x17b   : > { %v735_v49 = vadd.f32 1.0, %v6532_v34  ;;  %v543_v42 = vpop.f32.mrb[62].mxu0  ;;  %v1268_v46 = vld [vmem:[#allocation2 + $0xbe] sm:$0xff]  ;;  %v1006_v30 = vpop.permute.xlu0 %1005 }
 0x17c   : > { %v6534_v29 = vpop.eup %6533  ;;  %1149 = vst [vmem:[#allocation2 + $0xd0] sm:$0xff] %v1100_v35  ;;  %v1101_v45 = vmul.f32 %v991_v26, %v814_v36  ;;  %v616_v47 = vsub.f32 0.0, %v7451_v38  ;;  %v7459_v40 = vadd.f32 %v7448_v39, %v543_v42  ;;  %v5416_v55 = vpop.f32.mrb[63].mxu0  ;;  %v1190_v51 = vld [vmem:[#allocation2 + $0xbd] sm:$0xff] }
 0x17d   : > { %6543 = vrcp.f32 %v735_v49  ;;  %v736_v48 = vadd.f32 1.0, %v6534_v29  ;;  %v1269_v50 = vld [vmem:[#allocation2 + $0xc6] sm:$0xff] }
 0x17e   : > { %v1191_v52 = vld [vmem:[#allocation2 + $0xc5] sm:$0xff]  ;;  %1150 = vst [vmem:[#allocation2 + $0xd8] sm:$0xff] %v1101_v45  ;;  %v687_v53 = vmul.f32 1.442695, %v616_v47  ;;  %v617_v54 = vsub.f32 0.0, %v7459_v40  ;;  %v1298_v56 = vpack.c.bf16 %v1269_v50, %v1268_v46 }
 0x17f   : > { %v1220_v57 = vpack.c.bf16 %v1191_v52, %v1190_v51  ;;  %v6536_v58 = vpop.eup %6535  ;;  %6545 = vrcp.f32 %v736_v48 }
 0x180   : > { %v815_v59 = vmul.f32 %v6536_v58, %v7402_v5  ;;  %6547 = vpow2.f32 %v687_v53  ;;  %v689_v60 = vmul.f32 1.442695, %v617_v54  ;;  %5498 = vmatmul.mubr.bf16.gmra.mrb[44].mxu1 %v1298_v56  ;;  %v1001_v5 = vpop.permute.xlu1 %1000 }
 0x181   : > { %v6538_v61 = vpop.eup %6537  ;;  %5598 = vmatmul.mubr.bf16.gmra.mrb[128].mxu0 %v1220_v57  ;;  %v548_v63 = vpop.f32.mrb[64].mxu0  ;;  %5501 = vmatprep.mubr.msk.bf16.mxu1 %vm6816_vm0, %v7247_v4 }
 0x182   : > { %v6540_v0 = vpop.eup %6539  ;;  %v1102_v2 = vmul.f32 %v996_v1, %v815_v59  ;;  %v816_v7 = vmul.f32 %v6538_v61, %v7408_v14  ;;  %6549 = vpow2.f32 %v689_v60  ;;  %v7467_v6 = vadd.f32 %v7448_v39, %v548_v63  ;;  %v5419_v8 = vpop.f32.mrb[65].mxu0  ;;  %5601 = vmatprep.mubr.msk.bf16.mxu0 %vm6816_vm0, %v7247_v4 }
 0x183   : > { %v737_v62 = vadd.f32 1.0, %v6540_v0  ;;  %v551_v41 = vpop.f32.mrb[66].mxu0  ;;  %v1270_v15 = vld [vmem:[#allocation2 + $0xce] sm:$0xff]  ;;  %v1016_v1 = vpop.permute.xlu0 %1015 }
 0x184   : > { %v6542_v10 = vpop.eup %6541  ;;  %1151 = vst [vmem:[#allocation2 + $0xe0] sm:$0xff] %v1102_v2  ;;  %v1103_v13 = vmul.f32 %v1001_v5, %v816_v7  ;;  %v618_v16 = vsub.f32 0.0, %v7467_v6  ;;  %v7473_v17 = vadd.f32 %v7448_v39, %v551_v41  ;;  %v5420_v14 = vpop.f32.mrb[67].mxu0  ;;  %v1192_v20 = vld [vmem:[#allocation2 + $0xcd] sm:$0xff] }
 0x185   : > { %6551 = vrcp.f32 %v737_v62  ;;  %v738_v9 = vadd.f32 1.0, %v6542_v10  ;;  %v1271_v19 = vld [vmem:[#allocation2 + $0xd6] sm:$0xff]  ;;  %v1011_v49 = vpop.permute.xlu1 %1010 }
 0x186   : > { %v1193_v18 = vld [vmem:[#allocation2 + $0xd5] sm:$0xff]  ;;  %1152 = vst [vmem:[#allocation2 + $0xe8] sm:$0xff] %v1103_v13  ;;  %v691_v4 = vmul.f32 1.442695, %v618_v16  ;;  %v619_v21 = vsub.f32 0.0, %v7473_v17  ;;  %v1299_v22 = vpack.c.bf16 %v1271_v19, %v1270_v15 }
 0x187   : > { %v1221_v23 = vpack.c.bf16 %v1193_v18, %v1192_v20  ;;  %v6544_v24 = vpop.eup %6543  ;;  %6553 = vrcp.f32 %v738_v9 }
 0x188   : > { %v817_v26 = vmul.f32 %v6544_v24, %v7416_v37  ;;  %6555 = vpow2.f32 %v691_v4  ;;  %v693_v12 = vmul.f32 1.442695, %v619_v21  ;;  %5502 = vmatmul.mubr.bf16.gmra.mrb[48].mxu1 %v1299_v22 }
 0x189   : > { %v6546_v27 = vpop.eup %6545  ;;  %5602 = vmatmul.mubr.bf16.gmra.mrb[132].mxu0 %v1221_v23  ;;  %v556_v31 = vpop.f32.mrb[68].mxu0  ;;  %5505 = vmatprep.mubr.msk.bf16.mxu1 %vm6816_vm0, %v7477_v32 }
 0x18a   : > { %v6548_v34 = vpop.eup %6547  ;;  %v1104_v35 = vmul.f32 %v1006_v30, %v817_v26  ;;  %v818_v36 = vmul.f32 %v6546_v27, %v7422_v44  ;;  %6557 = vpow2.f32 %v693_v12  ;;  %v7483_v33 = vadd.f32 %v7448_v39, %v556_v31  ;;  %v5423_v37 = vpop.f32.mrb[69].mxu0  ;;  %5605 = vmatprep.mubr.msk.bf16.mxu0 %vm6816_vm0, %v7477_v32 }
 0x18b   : > { %v739_v42 = vadd.f32 1.0, %v6548_v34  ;;  %v559_v43 = vpop.f32.mrb[70].mxu0  ;;  %v1272_v46 = vld [vmem:[#allocation2 + $0xde] sm:$0xff]  ;;  %v1026_v30 = vpop.permute.xlu0 %1025 }
 0x18c   : > { %v6550_v29 = vpop.eup %6549  ;;  %1153 = vst [vmem:[#allocation2 + $0xf0] sm:$0xff] %v1104_v35  ;;  %v1105_v45 = vmul.f32 %v1011_v49, %v818_v36  ;;  %v620_v47 = vsub.f32 0.0, %v7483_v33  ;;  %v7489_v55 = vadd.f32 %v7448_v39, %v559_v43  ;;  %v5424_v44 = vpop.f32.mrb[71].mxu0  ;;  %v1194_v51 = vld [vmem:[#allocation2 + $0xdd] sm:$0xff] }
 0x18d   : > { %6559 = vrcp.f32 %v739_v42  ;;  %v740_v48 = vadd.f32 1.0, %v6550_v29  ;;  %v1273_v50 = vld [vmem:[#allocation2 + $0xe6] sm:$0xff] }
 0x18e   : > { %v1195_v52 = vld [vmem:[#allocation2 + $0xe5] sm:$0xff]  ;;  %1154 = vst [vmem:[#allocation2 + $0xf8] sm:$0xff] %v1105_v45  ;;  %v695_v53 = vmul.f32 1.442695, %v620_v47  ;;  %v621_v54 = vsub.f32 0.0, %v7489_v55  ;;  %v1300_v56 = vpack.c.bf16 %v1273_v50, %v1272_v46 }
 0x18f   : > { %v1222_v57 = vpack.c.bf16 %v1195_v52, %v1194_v51  ;;  %v6552_v58 = vpop.eup %6551  ;;  %6561 = vrcp.f32 %v740_v48 }
 0x190   : > { %v819_v59 = vmul.f32 %v6552_v58, %v7430_v3  ;;  %6563 = vpow2.f32 %v695_v53  ;;  %v697_v60 = vmul.f32 1.442695, %v621_v54  ;;  %5506 = vmatmul.mubr.bf16.gmra.mrb[52].mxu1 %v1300_v56  ;;  %v1021_v3 = vpop.permute.xlu1 %1020 }
 0x191   : > { %v6554_v61 = vpop.eup %6553  ;;  %5606 = vmatmul.mubr.bf16.gmra.mrb[136].mxu0 %v1222_v57  ;;  %v564_v63 = vpop.f32.mrb[72].mxu0  ;;  %5509 = vmatprep.mubr.msk.bf16.mxu1 %vm6816_vm0, %v7477_v32 }
 0x192   : > { %v6556_v0 = vpop.eup %6555  ;;  %v1106_v2 = vmul.f32 %v1016_v1, %v819_v59  ;;  %v820_v7 = vmul.f32 %v6554_v61, %v7436_v11  ;;  %6565 = vpow2.f32 %v697_v60  ;;  %v7497_v8 = vadd.f32 %v7448_v39, %v564_v63  ;;  %v5427_v5 = vpop.f32.mrb[73].mxu0  ;;  %5609 = vmatprep.mubr.msk.bf16.mxu0 %vm6816_vm0, %v7477_v32 }
 0x193   : > { %v741_v62 = vadd.f32 1.0, %v6556_v0  ;;  %v567_v41 = vpop.f32.mrb[74].mxu0  ;;  %v1274_v15 = vld [vmem:[#allocation2 + $0xee] sm:$0xff]  ;;  %v1036_v1 = vpop.permute.xlu0 %1035 }
 0x194   : > { %v6558_v10 = vpop.eup %6557  ;;  %1155 = vst [vmem:[#allocation2 + $0x100] sm:$0xff] %v1106_v2  ;;  %v1107_v13 = vmul.f32 %v1021_v3, %v820_v7  ;;  %v622_v16 = vsub.f32 0.0, %v7497_v8  ;;  %v7503_v14 = vadd.f32 %v7448_v39, %v567_v41  ;;  %v5428_v11 = vpop.f32.mrb[75].mxu0  ;;  %v1196_v20 = vld [vmem:[#allocation2 + $0xed] sm:$0xff] }
 0x195   : > { %6567 = vrcp.f32 %v741_v62  ;;  %v742_v9 = vadd.f32 1.0, %v6558_v10  ;;  %v1275_v19 = vld [vmem:[#allocation2 + $0xf6] sm:$0xff] }
 0x196   : > { %v1197_v18 = vld [vmem:[#allocation2 + $0xf5] sm:$0xff]  ;;  %1156 = vst [vmem:[#allocation2 + $0x108] sm:$0xff] %v1107_v13  ;;  %v699_v4 = vmul.f32 1.442695, %v622_v16  ;;  %v623_v21 = vsub.f32 0.0, %v7503_v14  ;;  %v1301_v22 = vpack.c.bf16 %v1275_v19, %v1274_v15 }
 0x197   : > { %v1223_v23 = vpack.c.bf16 %v1197_v18, %v1196_v20  ;;  %v6560_v24 = vpop.eup %6559  ;;  %6569 = vrcp.f32 %v742_v9 }
 0x198   : > { %v821_v26 = vmul.f32 %v6560_v24, %v7451_v38  ;;  %6571 = vpow2.f32 %v699_v4  ;;  %v701_v12 = vmul.f32 1.442695, %v623_v21  ;;  %5510 = vmatmul.mubr.bf16.gmra.mrb[56].mxu1 %v1301_v22  ;;  %v1031_v38 = vpop.permute.xlu1 %1030  ;;  %v1046_v24 = vpop.permute.xlu0 %1045 }
 0x199   : > { %v6562_v27 = vpop.eup %6561  ;;  %5610 = vmatmul.mubr.bf16.gmra.mrb[140].mxu0 %v1223_v23  ;;  %v572_v31 = vpop.f32.mrb[76].mxu0  ;;  %5513 = vmatprep.mubr.msk.bf16.mxu1 %vm6816_vm0, %v7477_v32 }
 0x19a   : > { %v6564_v34 = vpop.eup %6563  ;;  %v1108_v35 = vmul.f32 %v1026_v30, %v821_v26  ;;  %v822_v36 = vmul.f32 %v6562_v27, %v7459_v40  ;;  %6573 = vpow2.f32 %v701_v12  ;;  %v7511_v37 = vadd.f32 %v7448_v39, %v572_v31  ;;  %v5431_v49 = vpop.f32.mrb[77].mxu0  ;;  %5613 = vmatprep.mubr.msk.bf16.mxu0 %vm6816_vm0, %v7477_v32 }
 0x19b   : > { %v743_v42 = vadd.f32 1.0, %v6564_v34  ;;  %v575_v43 = vpop.f32.mrb[78].mxu0  ;;  %v1276_v46 = vld [vmem:[#allocation2 + $0xfe] sm:$0xff] }
 0x19c   : > { %v6566_v29 = vpop.eup %6565  ;;  %1157 = vst [vmem:[#allocation2 + $0x110] sm:$0xff] %v1108_v35  ;;  %v1109_v45 = vmul.f32 %v1031_v38, %v822_v36  ;;  %v624_v47 = vsub.f32 0.0, %v7511_v37  ;;  %v7517_v44 = vadd.f32 %v7448_v39, %v575_v43  ;;  %v5432_v40 = vpop.f32.mrb[79].mxu0  ;;  %v1198_v51 = vld [vmem:[#allocation2 + $0xfd] sm:$0xff] }
 0x19d   : > { %6575 = vrcp.f32 %v743_v42  ;;  %v744_v48 = vadd.f32 1.0, %v6566_v29  ;;  %v1277_v50 = vld [vmem:[#allocation2 + $0x106] sm:$0xff]  ;;  %v1041_v3 = vpop.permute.xlu1 %1040 }
 0x19e   : > { %v1199_v52 = vld [vmem:[#allocation2 + $0x105] sm:$0xff]  ;;  %1158 = vst [vmem:[#allocation2 + $0x118] sm:$0xff] %v1109_v45  ;;  %v703_v53 = vmul.f32 1.442695, %v624_v47  ;;  %v625_v54 = vsub.f32 0.0, %v7517_v44  ;;  %v1302_v56 = vpack.c.bf16 %v1277_v50, %v1276_v46 }
 0x19f   : > { %v1224_v57 = vpack.c.bf16 %v1199_v52, %v1198_v51  ;;  %v6568_v58 = vpop.eup %6567  ;;  %6577 = vrcp.f32 %v744_v48  ;;  %v1056_v52 = vpop.permute.xlu0 %1055 }
 0x1a0   : > { %v823_v59 = vmul.f32 %v6568_v58, %v7467_v6  ;;  %6579 = vpow2.f32 %v703_v53  ;;  %v705_v60 = vmul.f32 1.442695, %v625_v54  ;;  %5514 = vmatmul.mubr.bf16.gmra.mrb[60].mxu1 %v1302_v56 }
 0x1a1   : > { %v6570_v61 = vpop.eup %6569  ;;  %5614 = vmatmul.mubr.bf16.gmra.mrb[144].mxu0 %v1224_v57  ;;  %v580_v63 = vpop.f32.mrb[80].mxu0  ;;  %5517 = vmatprep.mubr.msk.bf16.mxu1 %vm6816_vm0, %v7477_v32 }
 0x1a2   : > { %v6572_v0 = vpop.eup %6571  ;;  %v1110_v2 = vmul.f32 %v1036_v1, %v823_v59  ;;  %v824_v7 = vmul.f32 %v6570_v61, %v7473_v17  ;;  %6581 = vpow2.f32 %v705_v60  ;;  %v7525_v5 = vadd.f32 %v7448_v39, %v580_v63  ;;  %5617 = vmatprep.mubr.msk.bf16.mxu0 %vm6816_vm0, %v7477_v32  ;;  %v5435_v6 = vpop.f32.mrb[81].mxu0 }
 0x1a3   : > { %v745_v62 = vadd.f32 1.0, %v6572_v0  ;;  %v583_v41 = vpop.f32.mrb[82].mxu0  ;;  %v1278_v11 = vld [vmem:[#allocation2 + $0x10e] sm:$0xff]  ;;  %v1051_v34 = vpop.permute.xlu1 %1050 }
 0x1a4   : > { %v6574_v10 = vpop.eup %6573  ;;  %1159 = vst [vmem:[#allocation2 + $0x120] sm:$0xff] %v1110_v2  ;;  %v1111_v13 = vmul.f32 %v1041_v3, %v824_v7  ;;  %v626_v16 = vsub.f32 0.0, %v7525_v5  ;;  %v5436_v15 = vpop.f32.mrb[83].mxu0  ;;  %v1200_v19 = vld [vmem:[#allocation2 + $0x10d] sm:$0xff] }
 0x1a5   : > { %6583 = vrcp.f32 %v745_v62  ;;  %v746_v17 = vadd.f32 1.0, %v6574_v10  ;;  %v1279_v9 = vld [vmem:[#allocation2 + $0x116] sm:$0xff]  ;;  %v1066_v7 = vpop.permute.xlu0 %1065 }
 0x1a6   : > { %v1201_v39 = vld [vmem:[#allocation2 + $0x115] sm:$0xff]  ;;  %1160 = vst [vmem:[#allocation2 + $0x128] sm:$0xff] %v1111_v13  ;;  %v707_v20 = vmul.f32 1.442695, %v626_v16  ;;  %v1303_v18 = vpack.c.bf16 %v1279_v9, %v1278_v11 }
 0x1a7   : > { %v1225_v4 = vpack.c.bf16 %v1201_v39, %v1200_v19  ;;  %v6576_v21 = vpop.eup %6575  ;;  %6585 = vrcp.f32 %v746_v17  ;;  %v1061_v56 = vpop.permute.xlu1 %1060 }
 0x1a8   : > { %v825_v22 = vmul.f32 %v6576_v21, %v7483_v33  ;;  %6587 = vpow2.f32 %v707_v20  ;;  %5518 = vmatmul.mubr.bf16.gmra.mrb[64].mxu1 %v1303_v18  ;;  %v1822_v21 = vld [vmem:[#allocation2 + $0x17] sm:$0xff] }
 0x1a9   : > { %v6578_v23 = vpop.eup %6577  ;;  %5618 = vmatmul.mubr.bf16.gmra.mrb[148].mxu0 %v1225_v4  ;;  %5521 = vmatprep.mubr.msk.bf16.mxu1 %vm6816_vm0, %v7477_v32  ;;  %v1655_v26 = vpop.f32.mrb[84].mxu0 }
 0x1aa   : > { %v6580_v12 = vpop.eup %6579  ;;  %v1112_v27 = vmul.f32 %v1046_v24, %v825_v22  ;;  %v826_v30 = vmul.f32 %v6578_v23, %v7489_v55  ;;  %5621 = vmatprep.mubr.msk.bf16.mxu0 %vm6816_vm0, %v7477_v32  ;;  %v7537_v31 = vadd.f32 %v1655_v26, %v7440_v28  ;;  %v5555_v33 = vpop.f32.mrb[85].mxu0  ;;  %v2190_v23 = vld [vmem:[#allocation2 + $0x27] sm:$0xff]  ;;  %v2189_v26 = vld [vmem:[#allocation2 + $0x1f] sm:$0xff] }
 0x1ab   : > { %v747_v35 = vadd.f32 1.0, %v6580_v12  ;;  %v1658_v36 = vpop.f32.mrb[86].mxu0  ;;  %v1280_v42 = vld [vmem:[#allocation2 + $0x11e] sm:$0xff]  ;;  %v1071_v62 = vpop.permute.xlu1 %1070  ;;  %v2230_v12 = vpack.c.bf16 %v2190_v23, %v2189_v26  ;;  %v2191_v33 = vld [vmem:[#allocation2 + $0x2f] sm:$0xff] }
 0x1ac   : > { %v6582_v49 = vpop.eup %6581  ;;  %1161 = vst [vmem:[#allocation2 + $0x130] sm:$0xff] %v1112_v27  ;;  %v1113_v38 = vmul.f32 %v1051_v34, %v826_v30  ;;  %v7540_v43 = vadd.f32 %v1658_v36, %v7455_v25  ;;  %v5556_v29 = vpop.f32.mrb[87].mxu0  ;;  %v1202_v47 = vld [vmem:[#allocation2 + $0x11d] sm:$0xff]  ;;  %v6392_v27 = vld [vmem:[%s8884_s3 + $0x108] sm:$0xff]   ;;  %v6393_v34 = vld [vmem:[%s8884_s3 + $0x110] sm:$0xff]  }
 0x1ad   : > { %6589 = vrcp.f32 %v747_v35  ;;  %v748_v55 = vadd.f32 1.0, %v6582_v49  ;;  %v1281_v45 = vld [vmem:[#allocation2 + $0x126] sm:$0xff]  ;;  %v1076_v19 = vpop.permute.xlu0 %1075  ;;  %v2192_v30 = vld [vmem:[#allocation2 + $0x37] sm:$0xff] }
 0x1ae   : > { %v1203_v40 = vld [vmem:[#allocation2 + $0x125] sm:$0xff]  ;;  %1162 = vst [vmem:[#allocation2 + $0x138] sm:$0xff] %v1113_v38  ;;  %v1304_v28 = vpack.c.bf16 %v1281_v45, %v1280_v42  ;;  %v2231_v35 = vpack.c.bf16 %v2192_v30, %v2191_v33  ;;  %v6394_v49 = vld [vmem:[%s8884_s3 + $0x118] sm:$0xff]  }
 0x1af   : > { %v1226_v46 = vpack.c.bf16 %v1203_v40, %v1202_v47  ;;  %v6584_v48 = vpop.eup %6583  ;;  %6591 = vrcp.f32 %v748_v55  ;;  %v6391_v24 = vld [vmem:[%s8884_s3 + $0x100] sm:$0xff]   ;;  %v6399_v42 = vld [vmem:[%s8884_s3 + $0x148] sm:$0xff]   ;;  %v6400_v47 = vld [vmem:[%s8884_s3 + $0x150] sm:$0xff]  }
 0x1b0   : > { %v827_v50 = vmul.f32 %v6584_v48, %v7497_v8  ;;  %5522 = vmatmul.mubr.bf16.gmra.mrb[68].mxu1 %v1304_v28  ;;  %v6398_v36 = vld [vmem:[%s8884_s3 + $0x140] sm:$0xff]   ;;  %v6396_v40 = vld [vmem:[%s8884_s3 + $0x128] sm:$0xff]   ;;  %v2196_v28 = vld [vmem:[#allocation2 + $0x57] sm:$0xff] }
 0x1b1   : > { %v6586_v51 = vpop.eup %6585  ;;  %5622 = vmatmul.mubr.bf16.gmra.mrb[152].mxu0 %v1226_v46  ;;  %5525 = vmatprep.mubr.msk.bf16.mxu1 %vm6816_vm0, %v7477_v32  ;;  %v2194_v38 = vld [vmem:[#allocation2 + $0x47] sm:$0xff]  ;;  %v2193_v29 = vld [vmem:[#allocation2 + $0x3f] sm:$0xff]  ;;  %v2195_v48 = vld [vmem:[#allocation2 + $0x4f] sm:$0xff] }
 0x1b2   : > { %v6588_v25 = vpop.eup %6587  ;;  %v1114_v53 = vmul.f32 %v1056_v52, %v827_v50  ;;  %v828_v54 = vmul.f32 %v6586_v51, %v7503_v14  ;;  %5625 = vmatprep.mubr.msk.bf16.mxu0 %vm6816_vm0, %v7477_v32  ;;  %v6395_v55 = vld [vmem:[%s8884_s3 + $0x120] sm:$0xff]   ;;  %v2232_v45 = vpack.c.bf16 %v2194_v38, %v2193_v29  ;;  %v6402_v46 = vld [vmem:[%s8884_s3 + $0x158] sm:$0xff]   ;;  %v6397_v50 = vld [vmem:[%s8884_s3 + $0x130] sm:$0xff]   ;;  %v2233_v51 = vpack.c.bf16 %v2196_v28, %v2195_v48 }
 0x1b3   : > { %v749_v57 = vadd.f32 1.0, %v6588_v25  ;;  %v1282_v59 = vld [vmem:[#allocation2 + $0x12e] sm:$0xff]  ;;  %v6403_v52 = vld [vmem:[%s8884_s3 + $0x160] sm:$0xff]   ;;  %v6401_v25 = vld [vmem:[%s8884_s3 + $0x138] sm:$0xff]  }
 0x1b4   : > { %1163 = vst [vmem:[#allocation2 + $0x140] sm:$0xff] %v1114_v53  ;;  %v1115_v58 = vmul.f32 %v1061_v56, %v828_v54  ;;  %v1204_v60 = vld [vmem:[#allocation2 + $0x12d] sm:$0xff]  ;;  %v2197_v56 = vld [vmem:[#allocation2 + $0x5f] sm:$0xff]  ;;  %v2208_v30 = vld [vmem:[#allocation2 + $0xb7] sm:$0xff] }
 0x1b5   : > { %6593 = vrcp.f32 %v749_v57  ;;  %v1283_v8 = vld [vmem:[#allocation2 + $0x136] sm:$0xff]  ;;  %v2198_v53 = vld [vmem:[#allocation2 + $0x67] sm:$0xff] }
 0x1b6   : > { %v1205_v61 = vld [vmem:[#allocation2 + $0x135] sm:$0xff]  ;;  %1164 = vst [vmem:[#allocation2 + $0x148] sm:$0xff] %v1115_v58  ;;  %v1305_v1 = vpack.c.bf16 %v1283_v8, %v1282_v59  ;;  %v6404_v54 = vld [vmem:[%s8884_s3 + $0x168] sm:$0xff]   ;;  %v2234_v57 = vpack.c.bf16 %v2198_v53, %v2197_v56 }
 0x1b7   : > { %v1227_v63 = vpack.c.bf16 %v1205_v61, %v1204_v60  ;;  %v6590_v0 = vpop.eup %6589  ;;  %v6405_v58 = vld [vmem:[%s8884_s3 + $0x170] sm:$0xff]   ;;  %v6406_v8 = vld [vmem:[%s8884_s3 + $0x178] sm:$0xff]   ;;  %v2210_v28 = vld [vmem:[#allocation2 + $0xc7] sm:$0xff] }
 0x1b8   : > { %v829_v2 = vmul.f32 %v6590_v0, %v7511_v37  ;;  %5526 = vmatmul.mubr.bf16.gmra.mrb[72].mxu1 %v1305_v1  ;;  %v2200_v59 = vld [vmem:[#allocation2 + $0x77] sm:$0xff]  ;;  %v2199_v60 = vld [vmem:[#allocation2 + $0x6f] sm:$0xff]  ;;  %v2202_v1 = vld [vmem:[#allocation2 + $0x87] sm:$0xff] }
 0x1b9   : > { %v6592_v14 = vpop.eup %6591  ;;  %5626 = vmatmul.mubr.bf16.gmra.mrb[156].mxu0 %v1227_v63  ;;  %5529 = vmatprep.mubr.msk.bf16.mxu1 %vm6816_vm0, %v7477_v32  ;;  %v2235_v61 = vpack.c.bf16 %v2200_v59, %v2199_v60  ;;  %v2201_v63 = vld [vmem:[#allocation2 + $0x7f] sm:$0xff]  ;;  %v2207_v38 = vld [vmem:[#allocation2 + $0xaf] sm:$0xff] }
 0x1ba   : > { %v1116_v6 = vmul.f32 %v1066_v7, %v829_v2  ;;  %v830_v3 = vmul.f32 %v6592_v14, %v7517_v44  ;;  %5629 = vmatprep.mubr.msk.bf16.mxu0 %vm6816_vm0, %v7477_v32  ;;  %v2236_v0 = vpack.c.bf16 %v2202_v1, %v2201_v63 }
 0x1bb   : > { %v1284_v10 = vld [vmem:[#allocation2 + $0x13e] sm:$0xff] }
 0x1bc   : > { %1165 = vst [vmem:[#allocation2 + $0x150] sm:$0xff] %v1116_v6  ;;  %v1117_v41 = vmul.f32 %v1071_v62, %v830_v3  ;;  %v1206_v16 = vld [vmem:[#allocation2 + $0x13d] sm:$0xff] }
 0x1bd   : > { %v1285_v13 = vld [vmem:[#allocation2 + $0x146] sm:$0xff]  ;;  %v2204_v62 = vld [vmem:[#allocation2 + $0x97] sm:$0xff] }
 0x1be   : > { %v1207_v37 = vld [vmem:[#allocation2 + $0x145] sm:$0xff]  ;;  %1166 = vst [vmem:[#allocation2 + $0x158] sm:$0xff] %v1117_v41  ;;  %v1306_v11 = vpack.c.bf16 %v1285_v13, %v1284_v10 }
 0x1bf   : > { %v1228_v15 = vpack.c.bf16 %v1207_v37, %v1206_v16  ;;  %v6594_v17 = vpop.eup %6593 }
 0x1c0   : > { %v831_v9 = vmul.f32 %v6594_v17, %v7525_v5  ;;  %5530 = vmatmul.mubr.bf16.gmra.mrb[76].mxu1 %v1306_v11  ;;  %v1821_v5 = vld [vmem:[#allocation2 + $0xf] sm:$0xff] }
 0x1c1   : > { %5630 = vmatmul.mubr.bf16.gmra.mrb[160].mxu0 %v1228_v15  ;;  %5533 = vmatprep.mubr.msk.bf16.mxu1 %vm6816_vm0, %v7477_v32  ;;  %v1862_v22 = vpack.c.bf16 %v1822_v21, %v1821_v5  ;;  %v2203_v11 = vld [vmem:[#allocation2 + $0x8f] sm:$0xff]  ;;  %v2205_v21 = vld [vmem:[#allocation2 + $0x9f] sm:$0xff] }
 0x1c2   : > { %v1118_v44 = vmul.f32 %v1076_v19, %v831_v9  ;;  %5633 = vmatprep.mubr.msk.bf16.mxu0 %vm6816_vm0, %v7477_v32  ;;  %v2237_v15 = vpack.c.bf16 %v2204_v62, %v2203_v11 }
 0x1c3   : > { %v1286_v39 = vld [vmem:[#allocation2 + $0x14e] sm:$0xf] }
 0x1c4   : > { %1167 = vst [vmem:[#allocation2 + $0x160] sm:$0xf] %v1118_v44  ;;  %v1208_v20 = vld [vmem:[#allocation2 + $0x14d] sm:$0xf]  ;;  %v1307_v18 = vpack.c.bf16 %v1286_v39, %v1286_v39 }
 0x1c5   : > { %v1229_v4 = vpack.c.bf16 %v1208_v20, %v1208_v20  ;;  %v2206_v44 = vld [vmem:[#allocation2 + $0xa7] sm:$0xff] }
 0x1c8   : > { %5534 = vmatmul.mubr.bf16.gmra.mrb[80].mxu1 %v1307_v18 }
 0x1c9   : > { %5634 = vmatmul.mubr.bf16.gmra.mrb[164].mxu0 %v1229_v4  ;;  %5653 = vmatprep.mubr.msk.bf16.mxu1 %vm6816_vm0, %v7477_v32 }
 0x1ca   : > { %5753 = vmatprep.mubr.msk.bf16.mxu0 %vm6816_vm0, %v7477_v32 }
 0x1d0   : > { %5654 = vmatmul.mubr.bf16.vlgmr.msra.gmra.mrb[84].mxu1 %v1862_v22 }
 0x1d1   : > { %5754 = vmatmul.mubr.bf16.vlgmr.msra.gmra.mrb[168].mxu0 %v2230_v12  ;;  %5838 = vmatpush3.bf16.msra.mxu1 %v6391_v24  ;;  %v2238_v24 = vpack.c.bf16 %v2206_v44, %v2205_v21 }
 0x1d2   : > { %5657 = vmatprep.mubr.msk.bf16.mxu1 %vm6816_vm0, %v7477_v32  ;;  %5757 = vmatprep.mubr.msk.bf16.mxu0 %vm6816_vm0, %v7477_v32 }
 0x1d3   : > { %5839 = vmatprep.subr.bf16.mxu1 %v7477_v32  ;;  %5938 = vmatpush3.bf16.msra.mxu0 %v6398_v36 }
 0x1d4   : > { %5939 = vmatprep.subr.bf16.mxu0 %v7477_v32 }
 0x1d5   : > { %5840 = vmatpush3.bf16.msra.mxu1 %v6392_v27 }
 0x1d6   : > { %5841 = vmatprep.subr.bf16.mxu1 %v7477_v32 }
 0x1d7   : > { %5940 = vmatpush3.bf16.msra.mxu0 %v6399_v42 }
 0x1d8   : > { %5658 = vmatmul.mubr.bf16.gmra.mrb[88].mxu1 %v2230_v12  ;;  %5941 = vmatprep.subr.bf16.mxu0 %v7477_v32 }
 0x1d9   : > { %5758 = vmatmul.mubr.bf16.gmra.mrb[172].mxu0 %v2231_v35  ;;  %5661 = vmatprep.mubr.msk.bf16.mxu1 %vm6816_vm0, %v7477_v32 }
 0x1da   : > { %5761 = vmatprep.mubr.msk.bf16.mxu0 %vm6816_vm0, %v7477_v32  ;;  %5842 = vmatpush3.bf16.msra.mxu1 %v6393_v34 }
 0x1db   : > { %5843 = vmatprep.subr.bf16.mxu1 %v7477_v32  ;;  %5942 = vmatpush3.bf16.msra.mxu0 %v6400_v47 }
 0x1dc   : > { %5943 = vmatprep.subr.bf16.mxu0 %v7477_v32 }
 0x1de   : > { %5844 = vmatpush3.bf16.msra.mxu1 %v6394_v49 }
 0x1df   : > { %5845 = vmatprep.subr.bf16.mxu1 %v7477_v32  ;;  %5944 = vmatpush3.bf16.msra.mxu0 %v6402_v46 }
 0x1e0   : > { %5662 = vmatmul.mubr.bf16.gmra.mrb[92].mxu1 %v2231_v35  ;;  %5945 = vmatprep.subr.bf16.mxu0 %v7477_v32 }
 0x1e1   : > { %5762 = vmatmul.mubr.bf16.gmra.mrb[176].mxu0 %v2232_v45  ;;  %5665 = vmatprep.mubr.msk.bf16.mxu1 %vm6816_vm0, %v7477_v32 }
 0x1e2   : > { %5765 = vmatprep.mubr.msk.bf16.mxu0 %vm6816_vm0, %v7477_v32  ;;  %5846 = vmatpush3.bf16.msra.mxu1 %v6395_v55  ;;  %v2239_v55 = vpack.c.bf16 %v2208_v30, %v2207_v38 }
 0x1e3   : > { %5847 = vmatprep.subr.bf16.mxu1 %v7477_v32  ;;  %5946 = vmatpush3.bf16.msra.mxu0 %v6403_v52 }
 0x1e4   : > { %5947 = vmatprep.subr.bf16.mxu0 %v7477_v32 }
 0x1e6   : > { %5848 = vmatpush3.bf16.msra.mxu1 %v6396_v40 }
 0x1e7   : > { %5849 = vmatprep.subr.bf16.mxu1 %v7477_v32  ;;  %5948 = vmatpush3.bf16.msra.mxu0 %v6404_v54 }
 0x1e8   : > { %5666 = vmatmul.mubr.bf16.gmra.mrb[96].mxu1 %v2232_v45  ;;  %5949 = vmatprep.subr.bf16.mxu0 %v7477_v32 }
 0x1e9   : > { %5766 = vmatmul.mubr.bf16.gmra.mrb[180].mxu0 %v2233_v51  ;;  %5669 = vmatprep.mubr.msk.bf16.mxu1 %vm6816_vm0, %v7477_v32 }
 0x1ea   : > { %5769 = vmatprep.mubr.msk.bf16.mxu0 %vm6816_vm0, %v7477_v32  ;;  %5850 = vmatpush3.bf16.msra.mxu1 %v6397_v50 }
 0x1eb   : > { %5851 = vmatprep.subr.bf16.mxu1 %v7477_v32  ;;  %5950 = vmatpush3.bf16.msra.mxu0 %v6405_v58 }
 0x1ec   : > { %5951 = vmatprep.subr.bf16.mxu0 %v7477_v32 }
 0x1ee   : > { %5852 = vmatpush3.bf16.msra.mxu1 %v6401_v25  ;;  %v2209_v25 = vld [vmem:[#allocation2 + $0xbf] sm:$0xff] }
 0x1ef   : > { %6037 = vmatprep.subr.bf16.mxu1 %v7477_v32  ;;  %5952 = vmatpush3.bf16.msra.mxu0 %v6406_v8  ;;  %v2240_v56 = vpack.c.bf16 %v2210_v28, %v2209_v25  ;;  %v2212_v8 = vld [vmem:[#allocation2 + $0xd7] sm:$0xff] }
 0x1f0   : > { %5670 = vmatmul.mubr.bf16.gmra.mrb[100].mxu1 %v2233_v51  ;;  %6137 = vmatprep.subr.bf16.mxu0 %v7477_v32 }
 0x1f1   : > { %5770 = vmatmul.mubr.bf16.gmra.mrb[184].mxu0 %v2234_v57  ;;  %5673 = vmatprep.mubr.msk.bf16.mxu1 %vm6816_vm0, %v7477_v32 }
 0x1f2   : > { %5773 = vmatprep.mubr.msk.bf16.mxu0 %vm6816_vm0, %v7477_v32 }
 0x1f8   : > { %5674 = vmatmul.mubr.bf16.gmra.mrb[104].mxu1 %v2234_v57 }
 0x1f9   : > { %5774 = vmatmul.mubr.bf16.gmra.mrb[188].mxu0 %v2235_v61  ;;  %5677 = vmatprep.mubr.msk.bf16.mxu1 %vm6816_vm0, %v7477_v32 }
 0x1fa   : > { %5777 = vmatprep.mubr.msk.bf16.mxu0 %vm6816_vm0, %v7477_v32 }
 0x200   : > { %5678 = vmatmul.mubr.bf16.gmra.mrb[108].mxu1 %v2235_v61 }
 0x201   : > { %5778 = vmatmul.mubr.bf16.gmra.mrb[192].mxu0 %v2236_v0  ;;  %5681 = vmatprep.mubr.msk.bf16.mxu1 %vm6816_vm0, %v7477_v32 }
 0x202   : > { %5781 = vmatprep.mubr.msk.bf16.mxu0 %vm6816_vm0, %v7477_v32 }
 0x203   : > { %v1415_v2 = vpop.f32.mrb[4].mxu1 }
 0x204   : > { %v1663_v14 = vpop.f32.mrb[88].mxu0  ;;  %v5459_v6 = vpop.f32.mrb[5].mxu1 }
 0x205   : > { %v7655_v7 = vadd.f32 %v1663_v14, %v1415_v2  ;;  %v5559_v3 = vpop.f32.mrb[89].mxu0  ;;  %v1418_v41 = vpop.f32.mrb[6].mxu1  ;;  %v2211_v2 = vld [vmem:[#allocation2 + $0xcf] sm:$0xff] }
 0x206   : > { %v1666_v10 = vpop.f32.mrb[90].mxu0  ;;  %v5460_v16 = vpop.f32.mrb[7].mxu1  ;;  %v2241_v3 = vpack.c.bf16 %v2212_v8, %v2211_v2  ;;  %v2219_v2 = vld [vmem:[#allocation2 + $0x10f] sm:$0xff] }
 0x207   : > { %v7657_v13 = vadd.f32 %v1666_v10, %v1418_v41  ;;  %v5560_v37 = vpop.f32.mrb[91].mxu0  ;;  %v2214_v16 = vld [vmem:[#allocation2 + $0xe7] sm:$0xff] }
 0x208   : > { %5682 = vmatmul.mubr.bf16.gmra.mrb[112].mxu1 %v2236_v0 }
 0x209   : > { %5782 = vmatmul.mubr.bf16.gmra.mrb[196].mxu0 %v2237_v15  ;;  %5685 = vmatprep.mubr.msk.bf16.mxu1 %vm6816_vm0, %v7477_v32 }
 0x20a   : > { %5785 = vmatprep.mubr.msk.bf16.mxu0 %vm6816_vm0, %v7477_v32 }
 0x20b   : > { %v1423_v17 = vpop.f32.mrb[8].mxu1 }
 0x20c   : > { %v1671_v9 = vpop.f32.mrb[92].mxu0  ;;  %v5463_v19 = vpop.f32.mrb[9].mxu1 }
 0x20d   : > { %v7663_v39 = vadd.f32 %v1671_v9, %v1423_v17  ;;  %v5563_v20 = vpop.f32.mrb[93].mxu0  ;;  %v1426_v18 = vpop.f32.mrb[10].mxu1  ;;  %v2213_v19 = vld [vmem:[#allocation2 + $0xdf] sm:$0xff] }
 0x20e   : > { %v1674_v4 = vpop.f32.mrb[94].mxu0  ;;  %v5464_v5 = vpop.f32.mrb[11].mxu1 }
 0x20f   : > { %v7665_v22 = vadd.f32 %v1674_v4, %v1426_v18  ;;  %v5564_v23 = vpop.f32.mrb[95].mxu0  ;;  %v2242_v18 = vpack.c.bf16 %v2214_v16, %v2213_v19 }
 0x210   : > { %5686 = vmatmul.mubr.bf16.gmra.mrb[116].mxu1 %v2237_v15  ;;  %v2216_v23 = vld [vmem:[#allocation2 + $0xf7] sm:$0xff] }
 0x211   : > { %5786 = vmatmul.mubr.bf16.gmra.mrb[200].mxu0 %v2238_v24  ;;  %5689 = vmatprep.mubr.msk.bf16.mxu1 %vm6816_vm0, %v7477_v32 }
 0x212   : > { %5789 = vmatprep.mubr.msk.bf16.mxu0 %vm6816_vm0, %v7477_v32 }
 0x213   : > { %v1431_v26 = vpop.f32.mrb[12].mxu1 }
 0x214   : > { %v1679_v12 = vpop.f32.mrb[96].mxu0  ;;  %v5467_v27 = vpop.f32.mrb[13].mxu1 }
 0x215   : > { %v7671_v33 = vadd.f32 %v1679_v12, %v1431_v26  ;;  %v5567_v34 = vpop.f32.mrb[97].mxu0  ;;  %v1434_v35 = vpop.f32.mrb[14].mxu1 }
 0x216   : > { %v1682_v36 = vpop.f32.mrb[98].mxu0  ;;  %v5468_v49 = vpop.f32.mrb[15].mxu1  ;;  %v2215_v34 = vld [vmem:[#allocation2 + $0xef] sm:$0xff] }
 0x217   : > { %v7673_v42 = vadd.f32 %v1682_v36, %v1434_v35  ;;  %v5568_v29 = vpop.f32.mrb[99].mxu0  ;;  %v2243_v49 = vpack.c.bf16 %v2216_v23, %v2215_v34 }
 0x218   : > { %5690 = vmatmul.mubr.bf16.gmra.mrb[120].mxu1 %v2238_v24 }
 0x219   : > { %5790 = vmatmul.mubr.bf16.gmra.mrb[204].mxu0 %v2239_v55  ;;  %5693 = vmatprep.mubr.msk.bf16.mxu1 %vm6816_vm0, %v7477_v32 }
 0x21a   : > { %5793 = vmatprep.mubr.msk.bf16.mxu0 %vm6816_vm0, %v7477_v32 }
 0x21b   : > { %v1439_v45 = vpop.f32.mrb[16].mxu1 }
 0x21c   : > { %v1687_v47 = vpop.f32.mrb[100].mxu0  ;;  %v5471_v40 = vpop.f32.mrb[17].mxu1 }
 0x21d   : > { %v7679_v46 = vadd.f32 %v1687_v47, %v1439_v45  ;;  %v5571_v48 = vpop.f32.mrb[101].mxu0  ;;  %v1442_v50 = vpop.f32.mrb[18].mxu1  ;;  %v2218_v45 = vld [vmem:[#allocation2 + $0x107] sm:$0xff] }
 0x21e   : > { %v1690_v51 = vpop.f32.mrb[102].mxu0  ;;  %v5472_v52 = vpop.f32.mrb[19].mxu1 }
 0x21f   : > { %v7681_v53 = vadd.f32 %v1690_v51, %v1442_v50  ;;  %v5572_v54 = vpop.f32.mrb[103].mxu0  ;;  %v2217_v51 = vld [vmem:[#allocation2 + $0xff] sm:$0xff] }
 0x220   : > { %5694 = vmatmul.mubr.bf16.gmra.mrb[124].mxu1 %v2239_v55  ;;  %v2244_v54 = vpack.c.bf16 %v2218_v45, %v2217_v51  ;;  %v2226_v51 = vld [vmem:[#allocation2 + $0x147] sm:$0xff] }
 0x221   : > { %5794 = vmatmul.mubr.bf16.gmra.mrb[208].mxu0 %v2240_v56  ;;  %5697 = vmatprep.mubr.msk.bf16.mxu1 %vm6816_vm0, %v7477_v32 }
 0x222   : > { %5797 = vmatprep.mubr.msk.bf16.mxu0 %vm6816_vm0, %v7477_v32 }
 0x223   : > { %v1447_v57 = vpop.f32.mrb[20].mxu1 }
 0x224   : > { %v1695_v58 = vpop.f32.mrb[104].mxu0  ;;  %v5475_v59 = vpop.f32.mrb[21].mxu1 }
 0x225   : > { %v7687_v60 = vadd.f32 %v1695_v58, %v1447_v57  ;;  %v5575_v61 = vpop.f32.mrb[105].mxu0  ;;  %v1450_v1 = vpop.f32.mrb[22].mxu1  ;;  %v2220_v59 = vld [vmem:[#allocation2 + $0x117] sm:$0xff] }
 0x226   : > { %v1698_v63 = vpop.f32.mrb[106].mxu0  ;;  %v5476_v0 = vpop.f32.mrb[23].mxu1 }
 0x227   : > { %v7689_v14 = vadd.f32 %v1698_v63, %v1450_v1  ;;  %v5576_v6 = vpop.f32.mrb[107].mxu0 }
 0x228   : > { %5698 = vmatmul.mubr.bf16.gmra.mrb[128].mxu1 %v2240_v56 }
 0x229   : > { %5798 = vmatmul.mubr.bf16.gmra.mrb[212].mxu0 %v2241_v3  ;;  %5701 = vmatprep.mubr.msk.bf16.mxu1 %vm6816_vm0, %v7477_v32 }
 0x22a   : > { %5801 = vmatprep.mubr.msk.bf16.mxu0 %vm6816_vm0, %v7477_v32 }
 0x22b   : > { %v1455_v62 = vpop.f32.mrb[24].mxu1 }
 0x22c   : > { %v1703_v41 = vpop.f32.mrb[108].mxu0  ;;  %v5479_v10 = vpop.f32.mrb[25].mxu1 }
 0x22d   : > { %v7695_v37 = vadd.f32 %v1703_v41, %v1455_v62  ;;  %v5579_v11 = vpop.f32.mrb[109].mxu0  ;;  %v1458_v15 = vpop.f32.mrb[26].mxu1  ;;  %v2245_v62 = vpack.c.bf16 %v2220_v59, %v2219_v2  ;;  %v2225_v59 = vld [vmem:[#allocation2 + $0x13f] sm:$0xff] }
 0x22e   : > { %v1706_v17 = vpop.f32.mrb[110].mxu0  ;;  %v5480_v9 = vpop.f32.mrb[27].mxu1  ;;  %v2222_v11 = vld [vmem:[#allocation2 + $0x127] sm:$0xff] }
 0x22f   : > { %v7697_v44 = vadd.f32 %v1706_v17, %v1458_v15  ;;  %v5580_v20 = vpop.f32.mrb[111].mxu0 }
 0x230   : > { %5702 = vmatmul.mubr.bf16.gmra.mrb[132].mxu1 %v2241_v3 }
 0x231   : > { %5802 = vmatmul.mubr.bf16.gmra.mrb[216].mxu0 %v2242_v18  ;;  %5705 = vmatprep.mubr.msk.bf16.mxu1 %vm6816_vm0, %v7477_v32 }
 0x232   : > { %5805 = vmatprep.mubr.msk.bf16.mxu0 %vm6816_vm0, %v7477_v32 }
 0x233   : > { %v1463_v4 = vpop.f32.mrb[28].mxu1 }
 0x234   : > { %v1711_v5 = vpop.f32.mrb[112].mxu0  ;;  %v5483_v21 = vpop.f32.mrb[29].mxu1 }
 0x235   : > { %v7703_v24 = vadd.f32 %v1711_v5, %v1463_v4  ;;  %v5583_v26 = vpop.f32.mrb[113].mxu0  ;;  %v1466_v12 = vpop.f32.mrb[30].mxu1 }
 0x236   : > { %v1714_v27 = vpop.f32.mrb[114].mxu0  ;;  %v5484_v30 = vpop.f32.mrb[31].mxu1 }
 0x237   : > { %v7705_v35 = vadd.f32 %v1714_v27, %v1466_v12  ;;  %v5584_v36 = vpop.f32.mrb[115].mxu0  ;;  %v2224_v27 = vld [vmem:[#allocation2 + $0x137] sm:$0xff] }
 0x238   : > { %5706 = vmatmul.mubr.bf16.gmra.mrb[136].mxu1 %v2242_v18  ;;  %v2221_v18 = vld [vmem:[#allocation2 + $0x11f] sm:$0xff] }
 0x239   : > { %5806 = vmatmul.mubr.bf16.gmra.mrb[220].mxu0 %v2243_v49  ;;  %5709 = vmatprep.mubr.msk.bf16.mxu1 %vm6816_vm0, %v7477_v32  ;;  %v2246_v21 = vpack.c.bf16 %v2222_v11, %v2221_v18 }
 0x23a   : > { %5809 = vmatprep.mubr.msk.bf16.mxu0 %vm6816_vm0, %v7477_v32 }
 0x23b   : > { %v1471_v38 = vpop.f32.mrb[32].mxu1 }
 0x23c   : > { %v1719_v29 = vpop.f32.mrb[116].mxu0  ;;  %v5487_v55 = vpop.f32.mrb[33].mxu1 }
 0x23d   : > { %v7711_v47 = vadd.f32 %v1719_v29, %v1471_v38  ;;  %v5587_v40 = vpop.f32.mrb[117].mxu0  ;;  %v1474_v28 = vpop.f32.mrb[34].mxu1  ;;  %v2223_v29 = vld [vmem:[#allocation2 + $0x12f] sm:$0xff] }
 0x23e   : > { %v1722_v48 = vpop.f32.mrb[118].mxu0  ;;  %v5488_v50 = vpop.f32.mrb[35].mxu1  ;;  %v2247_v40 = vpack.c.bf16 %v2224_v27, %v2223_v29 }
 0x23f   : > { %v7713_v52 = vadd.f32 %v1722_v48, %v1474_v28  ;;  %v5588_v25 = vpop.f32.mrb[119].mxu0  ;;  %v7739_v28 = vld [vmem:[#allocation2] sm:$0xff] }
 0x240   : > { %5710 = vmatmul.mubr.bf16.gmra.mrb[140].mxu1 %v2243_v49 }
 0x241   : > { %5810 = vmatmul.mubr.bf16.gmra.mrb[224].mxu0 %v2244_v54  ;;  %5713 = vmatprep.mubr.msk.bf16.mxu1 %vm6816_vm0, %v7477_v32 }
 0x242   : > { %5813 = vmatprep.mubr.msk.bf16.mxu0 %vm6816_vm0, %v7477_v32 }
 0x243   : > { %v1479_v56 = vpop.f32.mrb[36].mxu1 }
 0x244   : > { %v1727_v57 = vpop.f32.mrb[120].mxu0  ;;  %v5491_v58 = vpop.f32.mrb[37].mxu1 }
 0x245   : > { %v7719_v8 = vadd.f32 %v1727_v57, %v1479_v56  ;;  %v5591_v61 = vpop.f32.mrb[121].mxu0  ;;  %v1482_v1 = vpop.f32.mrb[38].mxu1 }
 0x246   : > { %v1730_v63 = vpop.f32.mrb[122].mxu0  ;;  %v5492_v0 = vpop.f32.mrb[39].mxu1 }
 0x247   : > { %v7721_v6 = vadd.f32 %v1730_v63, %v1482_v1  ;;  %v5592_v3 = vpop.f32.mrb[123].mxu0  ;;  %v2248_v63 = vpack.c.bf16 %v2226_v51, %v2225_v59 }
 0x248   : > { %5714 = vmatmul.mubr.bf16.gmra.mrb[144].mxu1 %v2244_v54 }
 0x249   : > { %5814 = vmatmul.mubr.bf16.gmra.mrb[228].mxu0 %v2245_v62  ;;  %5717 = vmatprep.mubr.msk.bf16.mxu1 %vm6816_vm0, %v7477_v32 }
 0x24a   : > { %5817 = vmatprep.mubr.msk.bf16.mxu0 %vm6816_vm0, %v7477_v32 }
 0x24b   : > { %v1487_v41 = vpop.f32.mrb[40].mxu1 }
 0x24c   : > { %v1735_v10 = vpop.f32.mrb[124].mxu0  ;;  %v5495_v16 = vpop.f32.mrb[41].mxu1 }
 0x24d   : > { %v7727_v15 = vadd.f32 %v1735_v10, %v1487_v41  ;;  %v5595_v17 = vpop.f32.mrb[125].mxu0  ;;  %v1490_v9 = vpop.f32.mrb[42].mxu1 }
 0x24e   : > { %v1738_v19 = vpop.f32.mrb[126].mxu0  ;;  %v5496_v20 = vpop.f32.mrb[43].mxu1 }
 0x24f   : > { %v7729_v4 = vadd.f32 %v1738_v19, %v1490_v9  ;;  %v5596_v5 = vpop.f32.mrb[127].mxu0  ;;  %v2227_v9 = vld [vmem:[#allocation2 + $0x14f] sm:$0xff] }
 0x250   : > { %5718 = vmatmul.mubr.bf16.gmra.mrb[148].mxu1 %v2245_v62  ;;  %v2228_v62 = vld [vmem:[#allocation2 + $0x157] sm:$0xff] }
 0x251   : > { %5818 = vmatmul.mubr.bf16.gmra.mrb[232].mxu0 %v2246_v21  ;;  %5721 = vmatprep.mubr.msk.bf16.mxu1 %vm6816_vm0, %v7477_v32  ;;  %v2249_v18 = vpack.c.bf16 %v2228_v62, %v2227_v9  ;;  %v2925_v62 = vld [vmem:[#allocation2 + $0x21] sm:$0xff] }
 0x252   : > { %5821 = vmatprep.mubr.msk.bf16.mxu0 %vm6816_vm0, %v7477_v32 }
 0x253   : > { %v1495_v23 = vpop.f32.mrb[44].mxu1 }
 0x254   : > { %v1743_v26 = vpop.f32.mrb[128].mxu0  ;;  %v5499_v12 = vpop.f32.mrb[45].mxu1 }
 0x255   : > { %v7735_v30 = vadd.f32 %v1743_v26, %v1495_v23  ;;  %v5599_v34 = vpop.f32.mrb[129].mxu0  ;;  %v1498_v36 = vpop.f32.mrb[46].mxu1  ;;  %v2229_v12 = vld [vmem:[#allocation2 + $0x15f] sm:$0xf] }
 0x256   : > { %v1746_v49 = vpop.f32.mrb[130].mxu0  ;;  %v5500_v38 = vpop.f32.mrb[47].mxu1 }
 0x257   : > { %v7737_v55 = vadd.f32 %v1746_v49, %v1498_v36  ;;  %v5600_v45 = vpop.f32.mrb[131].mxu0 }
 0x258   : > { %5722 = vmatmul.mubr.bf16.gmra.mrb[152].mxu1 %v2246_v21  ;;  %v1861_v21 = vld [vmem:[#allocation2 + $0x14f] sm:$0xf] }
 0x259   : > { %5822 = vmatmul.mubr.bf16.gmra.mrb[236].mxu0 %v2247_v40  ;;  %5725 = vmatprep.mubr.msk.bf16.mxu1 %vm6816_vm0, %v7739_v28  ;;  %v1882_v29 = vpack.c.bf16 %v1861_v21, %v1861_v21  ;;  %v2928_v21 = vld [vmem:[#allocation2 + $0x39] sm:$0xff] }
 0x25a   : > { %5825 = vmatprep.mubr.msk.bf16.mxu0 %vm6816_vm0, %v7739_v28 }
 0x25b   : > { %v1503_v32 = vpop.f32.mrb[48].mxu1 }
 0x25c   : > { %v1751_v48 = vpop.f32.mrb[132].mxu0  ;;  %v5503_v50 = vpop.f32.mrb[49].mxu1 }
 0x25d   : > { %v7745_v25 = vadd.f32 %v1751_v48, %v1503_v32  ;;  %v5603_v54 = vpop.f32.mrb[133].mxu0  ;;  %v1506_v56 = vpop.f32.mrb[50].mxu1  ;;  %v2250_v32 = vpack.c.bf16 %v2229_v12, %v2229_v12  ;;  %v2558_v50 = vld [vmem:[#allocation2 + $0x28] sm:$0xff] }
 0x25e   : > { %v1754_v57 = vpop.f32.mrb[134].mxu0  ;;  %v5504_v58 = vpop.f32.mrb[51].mxu1 }
 0x25f   : > { %v7747_v61 = vadd.f32 %v1754_v57, %v1506_v56  ;;  %v5604_v1 = vpop.f32.mrb[135].mxu0  ;;  %v2926_v56 = vld [vmem:[#allocation2 + $0x29] sm:$0xff] }
 0x260   : > { %5726 = vmatmul.mubr.bf16.gmra.mrb[156].mxu1 %v2247_v40  ;;  %v2557_v1 = vld [vmem:[#allocation2 + $0x20] sm:$0xff] }
 0x261   : > { %5826 = vmatmul.mubr.bf16.gmra.mrb[240].mxu0 %v2248_v63  ;;  %5729 = vmatprep.mubr.msk.bf16.mxu1 %vm6816_vm0, %v7739_v28 }
 0x262   : > { %5829 = vmatprep.mubr.msk.bf16.mxu0 %vm6816_vm0, %v7739_v28 }
 0x263   : > { %v1511_v0 = vpop.f32.mrb[52].mxu1 }
 0x264   : > { %v1759_v2 = vpop.f32.mrb[136].mxu0  ;;  %v5507_v3 = vpop.f32.mrb[53].mxu1 }
 0x265   : > { %v7753_v41 = vadd.f32 %v1759_v2, %v1511_v0  ;;  %v5607_v10 = vpop.f32.mrb[137].mxu0  ;;  %v1514_v16 = vpop.f32.mrb[54].mxu1  ;;  %v2598_v3 = vpack.c.bf16 %v2558_v50, %v2557_v1 }
 0x266   : > { %v1762_v11 = vpop.f32.mrb[138].mxu0  ;;  %v5508_v17 = vpop.f32.mrb[55].mxu1 }
 0x267   : > { %v7755_v19 = vadd.f32 %v1762_v11, %v1514_v16  ;;  %v5608_v20 = vpop.f32.mrb[139].mxu0  ;;  %v2966_v11 = vpack.c.bf16 %v2926_v56, %v2925_v62  ;;  %v6408_v17 = vld [vmem:[%s8884_s3 + $0x188] sm:$0xff]   ;;  %v2561_v62 = vld [vmem:[#allocation2 + $0x40] sm:$0xff] }
 0x268   : > { %5730 = vmatmul.mubr.bf16.gmra.mrb[160].mxu1 %v2248_v63  ;;  %v6407_v63 = vld [vmem:[%s8884_s3 + $0x180] sm:$0xff]   ;;  %v2560_v20 = vld [vmem:[#allocation2 + $0x38] sm:$0xff] }
 0x269   : > { %5830 = vmatmul.mubr.bf16.gmra.mrb[244].mxu0 %v2249_v18  ;;  %5733 = vmatprep.mubr.msk.bf16.mxu1 %vm6816_vm0, %v7739_v28 }
 0x26a   : > { %5833 = vmatprep.mubr.msk.bf16.mxu0 %vm6816_vm0, %v7739_v28 }
 0x26b   : > { %v1519_v5 = vpop.f32.mrb[56].mxu1 }
 0x26c   : > { %v1767_v23 = vpop.f32.mrb[140].mxu0  ;;  %v5511_v26 = vpop.f32.mrb[57].mxu1 }
 0x26d   : > { %v7761_v27 = vadd.f32 %v1767_v23, %v1519_v5  ;;  %v5611_v34 = vpop.f32.mrb[141].mxu0  ;;  %v1522_v36 = vpop.f32.mrb[58].mxu1 }
 0x26e   : > { %v1770_v49 = vpop.f32.mrb[142].mxu0  ;;  %v5512_v38 = vpop.f32.mrb[59].mxu1  ;;  %v2559_v34 = vld [vmem:[#allocation2 + $0x30] sm:$0xff] }
 0x26f   : > { %v7763_v45 = vadd.f32 %v1770_v49, %v1522_v36  ;;  %v5612_v40 = vpop.f32.mrb[143].mxu0  ;;  %v2599_v38 = vpack.c.bf16 %v2560_v20, %v2559_v34  ;;  %v6411_v20 = vld [vmem:[%s8884_s3 + $0x1a0] sm:$0xff]   ;;  %v6412_v34 = vld [vmem:[%s8884_s3 + $0x1a8] sm:$0xff]  }
 0x270   : > { %5734 = vmatmul.mubr.bf16.gmra.mrb[164].mxu1 %v1882_v29  ;;  %v2927_v29 = vld [vmem:[#allocation2 + $0x31] sm:$0xff] }
 0x271   : > { %5834 = vmatmul.mubr.bf16.gmra.mrb[248].mxu0 %v2250_v32  ;;  %5853 = vmatprep.mubr.msk.bf16.mxu1 %vm6816_vm0, %v7739_v28  ;;  %v6409_v40 = vld [vmem:[%s8884_s3 + $0x190] sm:$0xff]   ;;  %v7792_v50 = vpack.c.bf16 %v2928_v21, %v2927_v29 }
 0x272   : > { %5953 = vmatprep.mubr.msk.bf16.mxu0 %vm6816_vm0, %v7739_v28 }
 0x273   : > { %v1527_v48 = vpop.f32.mrb[60].mxu1 }
 0x274   : > { %v1775_v51 = vpop.f32.mrb[144].mxu0  ;;  %v5515_v54 = vpop.f32.mrb[61].mxu1 }
 0x275   : > { %v7769_v57 = vadd.f32 %v1775_v51, %v1527_v48  ;;  %v5615_v58 = vpop.f32.mrb[145].mxu0  ;;  %v1530_v59 = vpop.f32.mrb[62].mxu1  ;;  %v6414_v51 = vld [vmem:[%s8884_s3 + $0x1c0] sm:$0xff]   ;;  %v6410_v54 = vld [vmem:[%s8884_s3 + $0x198] sm:$0xff]  }
 0x276   : > { %v1778_v0 = vpop.f32.mrb[146].mxu0  ;;  %v5516_v2 = vpop.f32.mrb[63].mxu1  ;;  %v2562_v58 = vld [vmem:[#allocation2 + $0x48] sm:$0xff] }
 0x277   : > { %v7774_v10 = vadd.f32 %v1778_v0, %v1530_v59  ;;  %v5616_v16 = vpop.f32.mrb[147].mxu0 }
 0x278   : > { %5854 = vmatmul.mubr.bf16.vlgmr.msra.gmra.mrb[168].mxu1 %v2598_v3 }
 0x279   : > { %5954 = vmatmul.mubr.bf16.vlgmr.msra.gmra.mrb[252].mxu0 %v2966_v11  ;;  %6038 = vmatpush3.bf16.msra.mxu1 %v6407_v63  ;;  %v2930_v63 = vld [vmem:[#allocation2 + $0x49] sm:$0xff] }
 0x27a   : > { %5857 = vmatprep.mubr.msk.bf16.mxu1 %vm6816_vm0, %v7739_v28  ;;  %5957 = vmatprep.mubr.msk.bf16.mxu0 %vm6816_vm0, %v7739_v28 }
 0x27b   : > { %v1535_v9 = vpop.f32.mrb[64].mxu1  ;;  %6039 = vmatprep.subr.bf16.mxu1 %v7739_v28  ;;  %6138 = vmatpush3.bf16.msra.mxu0 %v6414_v51 }
 0x27c   : > { %v1783_v18 = vpop.f32.mrb[148].mxu0  ;;  %v5519_v5 = vpop.f32.mrb[65].mxu1  ;;  %6139 = vmatprep.subr.bf16.mxu0 %v7739_v28 }
 0x27d   : > { %v7784_v23 = vadd.f32 %v1783_v18, %v1535_v9  ;;  %v5619_v26 = vpop.f32.mrb[149].mxu0  ;;  %v1538_v12 = vpop.f32.mrb[66].mxu1  ;;  %6040 = vmatpush3.bf16.msra.mxu1 %v6408_v17  ;;  %v2600_v17 = vpack.c.bf16 %v2562_v58, %v2561_v62  ;;  %v2929_v9 = vld [vmem:[#allocation2 + $0x41] sm:$0xff] }
 0x27e   : > { %v1786_v36 = vpop.f32.mrb[150].mxu0  ;;  %v5520_v49 = vpop.f32.mrb[67].mxu1  ;;  %6041 = vmatprep.subr.bf16.mxu1 %v7739_v28  ;;  %v6415_v18 = vld [vmem:[%s8884_s3 + $0x1c8] sm:$0xff]   ;;  %v7817_v26 = vpack.c.bf16 %v2930_v63, %v2929_v9  ;;  %v2931_v63 = vld [vmem:[#allocation2 + $0x51] sm:$0xff] }
 0x27f   : > { %v7790_v32 = vadd.f32 %v1786_v36, %v1538_v12  ;;  %v5620_v48 = vpop.f32.mrb[151].mxu0  ;;  %6140 = vmatpush3.bf16.msra.mxu0 %v6415_v18  ;;  %v6416_v12 = vld [vmem:[%s8884_s3 + $0x1d0] sm:$0xff]   ;;  %v2564_v49 = vld [vmem:[#allocation2 + $0x58] sm:$0xff]  ;;  %v2566_v18 = vld [vmem:[#allocation2 + $0x68] sm:$0xff] }
 0x280   : > { %5858 = vmatmul.mubr.bf16.gmra.mrb[172].mxu1 %v2599_v38  ;;  %6141 = vmatprep.subr.bf16.mxu0 %v7739_v28  ;;  %v6417_v9 = vld [vmem:[%s8884_s3 + $0x1b8] sm:$0xff]  }
 0x281   : > { %5958 = vmatmul.mubr.bf16.gmra.mrb[0].mxu0 %v7792_v50  ;;  %5861 = vmatprep.mubr.msk.bf16.mxu1 %vm6816_vm0, %v7739_v28 }
 0x282   : > { %5961 = vmatprep.mubr.msk.bf16.mxu0 %vm6816_vm0, %v7739_v28  ;;  %6042 = vmatpush3.bf16.msra.mxu1 %v6409_v40  ;;  %v2932_v40 = vld [vmem:[#allocation2 + $0x59] sm:$0xff] }
 0x283   : > { %v1543_v56 = vpop.f32.mrb[68].mxu1  ;;  %6043 = vmatprep.subr.bf16.mxu1 %v7739_v28  ;;  %6142 = vmatpush3.bf16.msra.mxu0 %v6416_v12 }
 0x284   : > { %v1791_v59 = vpop.f32.mrb[152].mxu0  ;;  %v5523_v1 = vpop.f32.mrb[69].mxu1  ;;  %6143 = vmatprep.subr.bf16.mxu0 %v7739_v28 }
 0x285   : > { %v7807_v0 = vadd.f32 %v1791_v59, %v1543_v56  ;;  %v5623_v2 = vpop.f32.mrb[153].mxu0  ;;  %v1546_v3 = vpop.f32.mrb[70].mxu1  ;;  %v2563_v56 = vld [vmem:[#allocation2 + $0x50] sm:$0xff] }
 0x286   : > { %v1794_v16 = vpop.f32.mrb[154].mxu0  ;;  %v5524_v11 = vpop.f32.mrb[71].mxu1  ;;  %6044 = vmatpush3.bf16.msra.mxu1 %v6410_v54  ;;  %v2601_v1 = vpack.c.bf16 %v2564_v49, %v2563_v56  ;;  %v6413_v2 = vld [vmem:[%s8884_s3 + $0x1b0] sm:$0xff]   ;;  %v2933_v56 = vld [vmem:[#allocation2 + $0x61] sm:$0xff] }
 0x287   : > { %v7815_v5 = vadd.f32 %v1794_v16, %v1546_v3  ;;  %v5624_v21 = vpop.f32.mrb[155].mxu0  ;;  %6045 = vmatprep.subr.bf16.mxu1 %v7739_v28  ;;  %v6418_v3 = vld [vmem:[%s8884_s3 + $0x1d8] sm:$0xff]   ;;  %v7844_v11 = vpack.c.bf16 %v2932_v40, %v2931_v63 }
 0x288   : > { %5862 = vmatmul.mubr.bf16.gmra.mrb[176].mxu1 %v2600_v17  ;;  %6144 = vmatpush3.bf16.msra.mxu0 %v6418_v3  ;;  %v6419_v17 = vld [vmem:[%s8884_s3 + $0x1e0] sm:$0xff]  }
 0x289   : > { %5962 = vmatmul.mubr.bf16.gmra.mrb[4].mxu0 %v7817_v26  ;;  %5865 = vmatprep.mubr.msk.bf16.mxu1 %vm6816_vm0, %v7739_v28 }
 0x28a   : > { %5965 = vmatprep.mubr.msk.bf16.mxu0 %vm6816_vm0, %v7739_v28  ;;  %6046 = vmatpush3.bf16.msra.mxu1 %v6411_v20 }
 0x28b   : > { %v1551_v36 = vpop.f32.mrb[72].mxu1  ;;  %6047 = vmatprep.subr.bf16.mxu1 %v7739_v28  ;;  %6145 = vmatprep.subr.bf16.mxu0 %v7739_v28 }
 0x28c   : > { %v1799_v38 = vpop.f32.mrb[156].mxu0  ;;  %v5527_v29 = vpop.f32.mrb[73].mxu1  ;;  %6146 = vmatpush3.bf16.msra.mxu0 %v6419_v17 }
 0x28d   : > { %v7833_v48 = vadd.f32 %v1799_v38, %v1551_v36  ;;  %v5627_v51 = vpop.f32.mrb[157].mxu0  ;;  %v1554_v54 = vpop.f32.mrb[74].mxu1  ;;  %v2565_v29 = vld [vmem:[#allocation2 + $0x60] sm:$0xff]  ;;  %6147 = vmatprep.subr.bf16.mxu0 %v7739_v28 }
 0x28e   : > { %v1802_v58 = vpop.f32.mrb[158].mxu0  ;;  %v5528_v59 = vpop.f32.mrb[75].mxu1  ;;  %6048 = vmatpush3.bf16.msra.mxu1 %v6412_v34  ;;  %v2934_v34 = vld [vmem:[#allocation2 + $0x69] sm:$0xff] }
 0x28f   : > { %v7842_v62 = vadd.f32 %v1802_v58, %v1554_v54  ;;  %v5628_v16 = vpop.f32.mrb[159].mxu0  ;;  %6049 = vmatprep.subr.bf16.mxu1 %v7739_v28  ;;  %v2602_v54 = vpack.c.bf16 %v2566_v18, %v2565_v29  ;;  %v6420_v58 = vld [vmem:[%s8884_s3 + $0x1e8] sm:$0xff]   ;;  %v7868_v63 = vpack.c.bf16 %v2934_v34, %v2933_v56  ;;  %v2567_v34 = vld [vmem:[#allocation2 + $0x70] sm:$0xff] }
 0x290   : > { %5866 = vmatmul.mubr.bf16.gmra.mrb[180].mxu1 %v2601_v1  ;;  %6148 = vmatpush3.bf16.msra.mxu0 %v6420_v58  ;;  %v2568_v16 = vld [vmem:[#allocation2 + $0x78] sm:$0xff] }
 0x291   : > { %5966 = vmatmul.mubr.bf16.gmra.mrb[8].mxu0 %v7844_v11  ;;  %5869 = vmatprep.mubr.msk.bf16.mxu1 %vm6816_vm0, %v7739_v28  ;;  %v2603_v29 = vpack.c.bf16 %v2568_v16, %v2567_v34 }
 0x292   : > { %5969 = vmatprep.mubr.msk.bf16.mxu0 %vm6816_vm0, %v7739_v28  ;;  %6050 = vmatpush3.bf16.msra.mxu1 %v6413_v2  ;;  %v6421_v2 = vld [vmem:[%s8884_s3 + $0x1f0] sm:$0xff]  }
 0x293   : > { %v1559_v20 = vpop.f32.mrb[76].mxu1  ;;  %6051 = vmatprep.subr.bf16.mxu1 %v7739_v28  ;;  %6149 = vmatprep.subr.bf16.mxu0 %v7739_v28 }
 0x294   : > { %v1807_v21 = vpop.f32.mrb[160].mxu0  ;;  %v5531_v12 = vpop.f32.mrb[77].mxu1  ;;  %6150 = vmatpush3.bf16.msra.mxu0 %v6421_v2 }
 0x295   : > { %v7860_v36 = vadd.f32 %v1807_v21, %v1559_v20  ;;  %v5631_v49 = vpop.f32.mrb[161].mxu0  ;;  %v1562_v38 = vpop.f32.mrb[78].mxu1  ;;  %v2936_v20 = vld [vmem:[#allocation2 + $0x79] sm:$0xff]  ;;  %6151 = vmatprep.subr.bf16.mxu0 %v7739_v28 }
 0x296   : > { %v1810_v40 = vpop.f32.mrb[162].mxu0  ;;  %v5532_v51 = vpop.f32.mrb[79].mxu1  ;;  %6052 = vmatpush3.bf16.msra.mxu1 %v6417_v9 }
 0x297   : > { %v7866_v59 = vadd.f32 %v1810_v40, %v1562_v38  ;;  %v5632_v1 = vpop.f32.mrb[163].mxu0  ;;  %6237 = vmatprep.subr.bf16.mxu1 %v7739_v28  ;;  %v2935_v40 = vld [vmem:[#allocation2 + $0x71] sm:$0xff] }
 0x298   : > { %5870 = vmatmul.mubr.bf16.gmra.mrb[184].mxu1 %v2602_v54  ;;  %v6422_v51 = vld [vmem:[%s8884_s3 + $0x1f8] sm:$0xff]   ;;  %v7886_v56 = vpack.c.bf16 %v2936_v20, %v2935_v40  ;;  %v2570_v1 = vld [vmem:[#allocation2 + $0x88] sm:$0xff] }
 0x299   : > { %5970 = vmatmul.mubr.bf16.gmra.mrb[12].mxu0 %v7868_v63  ;;  %5873 = vmatprep.mubr.msk.bf16.mxu1 %vm6816_vm0, %v7739_v28  ;;  %v2937_v40 = vld [vmem:[#allocation2 + $0x81] sm:$0xff] }
 0x29a   : > { %5973 = vmatprep.mubr.msk.bf16.mxu0 %vm6816_vm0, %v7739_v28  ;;  %6152 = vmatpush3.bf16.msra.mxu0 %v6422_v51 }
 0x29b   : > { %v1567_v3 = vpop.f32.mrb[80].mxu1 }
 0x29c   : > { %v1815_v17 = vpop.f32.mrb[164].mxu0  ;;  %v5535_v9 = vpop.f32.mrb[81].mxu1 }
 0x29d   : > { %v7880_v18 = vadd.f32 %v1815_v17, %v1567_v3  ;;  %v5635_v21 = vpop.f32.mrb[165].mxu0  ;;  %v1570_v12 = vpop.f32.mrb[82].mxu1  ;;  %v2938_v17 = vld [vmem:[#allocation2 + $0x89] sm:$0xff] }
 0x29e   : > { %v1818_v49 = vpop.f32.mrb[166].mxu0  ;;  %v5536_v38 = vpop.f32.mrb[83].mxu1  ;;  %v2569_v21 = vld [vmem:[#allocation2 + $0x80] sm:$0xff] }
 0x29f   : > { %8888 = vst [vmem:[#allocation3_spill] sm:$0xff] %v7880_v18  ;;  %v5636_v54 = vpop.f32.mrb[167].mxu0 }
 0x2a0   : > { %5874 = vmatmul.mubr.bf16.gmra.mrb[188].mxu1 %v2603_v29  ;;  %v2604_v29 = vpack.c.bf16 %v2570_v1, %v2569_v21  ;;  %v7897_v54 = vpack.c.bf16 %v2938_v17, %v2937_v40 }
 0x2a1   : > { %5974 = vmatmul.mubr.bf16.gmra.mrb[16].mxu0 %v7886_v56  ;;  %5877 = vmatprep.mubr.msk.bf16.mxu1 %vm6816_vm0, %v7739_v28 }
 0x2a2   : > { %5977 = vmatprep.mubr.msk.bf16.mxu0 %vm6816_vm0, %v7739_v28 }
 0x2a3   : > { %v1982_v58 = vpop.f32.mrb[84].mxu1 }
 0x2a4   : > { %v2148_v2 = vadd.f32 %v1982_v58, %v7537_v31  ;;  %v2350_v3 = vpop.f32.mrb[168].mxu0  ;;  %v5655_v16 = vpop.f32.mrb[85].mxu1 }
 0x2a5   : > { %v5755_v9 = vpop.f32.mrb[169].mxu0  ;;  %v1985_v20 = vpop.f32.mrb[86].mxu1 }
 0x2a6   : > { %v7894_v12 = vadd.f32 %v2350_v3, %v2148_v2  ;;  %v2149_v34 = vadd.f32 %v1985_v20, %v7540_v43  ;;  %v2353_v49 = vpop.f32.mrb[170].mxu0  ;;  %v5656_v38 = vpop.f32.mrb[87].mxu1  ;;  %v2572_v43 = vld [vmem:[#allocation2 + $0x98] sm:$0xff]  ;;  %v2571_v9 = vld [vmem:[#allocation2 + $0x90] sm:$0xff] }
 0x2a7   : > { %v5756_v51 = vpop.f32.mrb[171].mxu0  ;;  %v2940_v3 = vld [vmem:[#allocation2 + $0x99] sm:$0xff]  ;;  %v2605_v38 = vpack.c.bf16 %v2572_v43, %v2571_v9 }
 0x2a8   : > { %v7899_v18 = vadd.f32 %v2353_v49, %v2149_v34  ;;  %5878 = vmatmul.mubr.bf16.gmra.mrb[192].mxu1 %v2604_v29  ;;  %v2939_v29 = vld [vmem:[#allocation2 + $0x91] sm:$0xff] }
 0x2a9   : > { %5978 = vmatmul.mubr.bf16.gmra.mrb[20].mxu0 %v7897_v54  ;;  %5881 = vmatprep.mubr.msk.bf16.mxu1 %vm6816_vm0, %v7739_v28  ;;  %v7910_v51 = vpack.c.bf16 %v2940_v3, %v2939_v29 }
 0x2aa   : > { %8889 = vst [vmem:[#allocation4_spill] sm:$0xff] %v7899_v18  ;;  %5981 = vmatprep.mubr.msk.bf16.mxu0 %vm6816_vm0, %v7739_v28 }
 0x2ab   : > { %v1990_v31 = vpop.f32.mrb[88].mxu1 }
 0x2ac   : > { %v2150_v58 = vadd.f32 %v1990_v31, %v7655_v7  ;;  %v2358_v1 = vpop.f32.mrb[172].mxu0  ;;  %v5659_v2 = vpop.f32.mrb[89].mxu1 }
 0x2ad   : > { %v5759_v16 = vpop.f32.mrb[173].mxu0  ;;  %v1993_v17 = vpop.f32.mrb[90].mxu1 }
 0x2ae   : > { %v7907_v20 = vadd.f32 %v2358_v1, %v2150_v58  ;;  %v2151_v21 = vadd.f32 %v1993_v17, %v7657_v13  ;;  %v2361_v34 = vpop.f32.mrb[174].mxu0  ;;  %v5660_v49 = vpop.f32.mrb[91].mxu1  ;;  %v2574_v13 = vld [vmem:[#allocation2 + $0xa8] sm:$0xff]  ;;  %v2573_v16 = vld [vmem:[#allocation2 + $0xa0] sm:$0xff] }
 0x2af   : > { %v5760_v40 = vpop.f32.mrb[175].mxu0  ;;  %v2942_v1 = vld [vmem:[#allocation2 + $0xa9] sm:$0xff]  ;;  %v2606_v49 = vpack.c.bf16 %v2574_v13, %v2573_v16 }
 0x2b0   : > { %v7912_v18 = vadd.f32 %v2361_v34, %v2151_v21  ;;  %5882 = vmatmul.mubr.bf16.gmra.mrb[196].mxu1 %v2605_v38  ;;  %v2941_v38 = vld [vmem:[#allocation2 + $0xa1] sm:$0xff] }
 0x2b1   : > { %5982 = vmatmul.mubr.bf16.gmra.mrb[24].mxu0 %v7910_v51  ;;  %5885 = vmatprep.mubr.msk.bf16.mxu1 %vm6816_vm0, %v7739_v28  ;;  %v7923_v40 = vpack.c.bf16 %v2942_v1, %v2941_v38 }
 0x2b2   : > { %8890 = vst [vmem:[#allocation5_spill] sm:$0xff] %v7912_v18  ;;  %5985 = vmatprep.mubr.msk.bf16.mxu0 %vm6816_vm0, %v7739_v28 }
 0x2b3   : > { %v1998_v7 = vpop.f32.mrb[92].mxu1 }
 0x2b4   : > { %v2152_v31 = vadd.f32 %v1998_v7, %v7663_v39  ;;  %v2366_v43 = vpop.f32.mrb[176].mxu0  ;;  %v5663_v58 = vpop.f32.mrb[93].mxu1 }
 0x2b5   : > { %v5763_v2 = vpop.f32.mrb[177].mxu0  ;;  %v2001_v3 = vpop.f32.mrb[94].mxu1 }
 0x2b6   : > { %v7920_v17 = vadd.f32 %v2366_v43, %v2152_v31  ;;  %v2153_v9 = vadd.f32 %v2001_v3, %v7665_v22  ;;  %v2369_v21 = vpop.f32.mrb[178].mxu0  ;;  %v5664_v34 = vpop.f32.mrb[95].mxu1  ;;  %v2576_v22 = vld [vmem:[#allocation2 + $0xb8] sm:$0xff]  ;;  %v2575_v2 = vld [vmem:[#allocation2 + $0xb0] sm:$0xff] }
 0x2b7   : > { %v5764_v29 = vpop.f32.mrb[179].mxu0  ;;  %v2944_v43 = vld [vmem:[#allocation2 + $0xb9] sm:$0xff]  ;;  %v2607_v34 = vpack.c.bf16 %v2576_v22, %v2575_v2 }
 0x2b8   : > { %v7925_v18 = vadd.f32 %v2369_v21, %v2153_v9  ;;  %5886 = vmatmul.mubr.bf16.gmra.mrb[200].mxu1 %v2606_v49  ;;  %v2943_v49 = vld [vmem:[#allocation2 + $0xb1] sm:$0xff] }
 0x2b9   : > { %5986 = vmatmul.mubr.bf16.gmra.mrb[28].mxu0 %v7923_v40  ;;  %5889 = vmatprep.mubr.msk.bf16.mxu1 %vm6816_vm0, %v7739_v28  ;;  %v7936_v29 = vpack.c.bf16 %v2944_v43, %v2943_v49 }
 0x2ba   : > { %8891 = vst [vmem:[#allocation6_spill] sm:$0xff] %v7925_v18  ;;  %5989 = vmatprep.mubr.msk.bf16.mxu0 %vm6816_vm0, %v7739_v28 }
 0x2bb   : > { %v2006_v39 = vpop.f32.mrb[96].mxu1 }
 0x2bc   : > { %v2154_v7 = vadd.f32 %v2006_v39, %v7671_v33  ;;  %v2374_v13 = vpop.f32.mrb[180].mxu0  ;;  %v5667_v31 = vpop.f32.mrb[97].mxu1 }
 0x2bd   : > { %v5767_v58 = vpop.f32.mrb[181].mxu0  ;;  %v2009_v1 = vpop.f32.mrb[98].mxu1 }
 0x2be   : > { %v7933_v3 = vadd.f32 %v2374_v13, %v2154_v7  ;;  %v2155_v16 = vadd.f32 %v2009_v1, %v7673_v42  ;;  %v2377_v9 = vpop.f32.mrb[182].mxu0  ;;  %v5668_v21 = vpop.f32.mrb[99].mxu1  ;;  %v2578_v42 = vld [vmem:[#allocation2 + $0xc8] sm:$0xff]  ;;  %v2577_v58 = vld [vmem:[#allocation2 + $0xc0] sm:$0xff] }
 0x2bf   : > { %v5768_v38 = vpop.f32.mrb[183].mxu0  ;;  %v2946_v13 = vld [vmem:[#allocation2 + $0xc9] sm:$0xff]  ;;  %v2608_v21 = vpack.c.bf16 %v2578_v42, %v2577_v58 }
 0x2c0   : > { %v7938_v18 = vadd.f32 %v2377_v9, %v2155_v16  ;;  %5890 = vmatmul.mubr.bf16.gmra.mrb[204].mxu1 %v2607_v34  ;;  %v2945_v34 = vld [vmem:[#allocation2 + $0xc1] sm:$0xff] }
 0x2c1   : > { %5990 = vmatmul.mubr.bf16.gmra.mrb[32].mxu0 %v7936_v29  ;;  %5893 = vmatprep.mubr.msk.bf16.mxu1 %vm6816_vm0, %v7739_v28  ;;  %v7949_v38 = vpack.c.bf16 %v2946_v13, %v2945_v34 }
 0x2c2   : > { %8892 = vst [vmem:[#allocation7_spill] sm:$0xff] %v7938_v18  ;;  %5993 = vmatprep.mubr.msk.bf16.mxu0 %vm6816_vm0, %v7739_v28 }
 0x2c3   : > { %v2014_v33 = vpop.f32.mrb[100].mxu1 }
 0x2c4   : > { %v2156_v39 = vadd.f32 %v2014_v33, %v7679_v46  ;;  %v2382_v22 = vpop.f32.mrb[184].mxu0  ;;  %v5671_v7 = vpop.f32.mrb[101].mxu1 }
 0x2c5   : > { %v5771_v31 = vpop.f32.mrb[185].mxu0  ;;  %v2017_v43 = vpop.f32.mrb[102].mxu1 }
 0x2c6   : > { %v7946_v1 = vadd.f32 %v2382_v22, %v2156_v39  ;;  %v2157_v2 = vadd.f32 %v2017_v43, %v7681_v53  ;;  %v2385_v16 = vpop.f32.mrb[186].mxu0  ;;  %v5672_v9 = vpop.f32.mrb[103].mxu1  ;;  %v2580_v53 = vld [vmem:[#allocation2 + $0xd8] sm:$0xff]  ;;  %v2579_v31 = vld [vmem:[#allocation2 + $0xd0] sm:$0xff] }
 0x2c7   : > { %v5772_v49 = vpop.f32.mrb[187].mxu0  ;;  %v2948_v22 = vld [vmem:[#allocation2 + $0xd9] sm:$0xff]  ;;  %v2609_v9 = vpack.c.bf16 %v2580_v53, %v2579_v31 }
 0x2c8   : > { %v7951_v18 = vadd.f32 %v2385_v16, %v2157_v2  ;;  %5894 = vmatmul.mubr.bf16.gmra.mrb[208].mxu1 %v2608_v21  ;;  %v2947_v21 = vld [vmem:[#allocation2 + $0xd1] sm:$0xff] }
 0x2c9   : > { %5994 = vmatmul.mubr.bf16.gmra.mrb[36].mxu0 %v7949_v38  ;;  %5897 = vmatprep.mubr.msk.bf16.mxu1 %vm6816_vm0, %v7739_v28  ;;  %v7962_v49 = vpack.c.bf16 %v2948_v22, %v2947_v21 }
 0x2ca   : > { %8893 = vst [vmem:[#allocation8_spill] sm:$0xff] %v7951_v18  ;;  %5997 = vmatprep.mubr.msk.bf16.mxu0 %vm6816_vm0, %v7739_v28 }
 0x2cb   : > { %v2022_v46 = vpop.f32.mrb[104].mxu1 }
 0x2cc   : > { %v2158_v33 = vadd.f32 %v2022_v46, %v7687_v60  ;;  %v2390_v42 = vpop.f32.mrb[188].mxu0  ;;  %v5675_v39 = vpop.f32.mrb[105].mxu1 }
 0x2cd   : > { %v5775_v7 = vpop.f32.mrb[189].mxu0  ;;  %v2025_v13 = vpop.f32.mrb[106].mxu1 }
 0x2ce   : > { %v7959_v43 = vadd.f32 %v2390_v42, %v2158_v33  ;;  %v2159_v58 = vadd.f32 %v2025_v13, %v7689_v14  ;;  %v2393_v2 = vpop.f32.mrb[190].mxu0  ;;  %v5676_v16 = vpop.f32.mrb[107].mxu1  ;;  %v2582_v14 = vld [vmem:[#allocation2 + $0xe8] sm:$0xff]  ;;  %v2581_v7 = vld [vmem:[#allocation2 + $0xe0] sm:$0xff] }
 0x2cf   : > { %v5776_v34 = vpop.f32.mrb[191].mxu0  ;;  %v2950_v42 = vld [vmem:[#allocation2 + $0xe9] sm:$0xff]  ;;  %v2610_v16 = vpack.c.bf16 %v2582_v14, %v2581_v7 }
 0x2d0   : > { %v7964_v18 = vadd.f32 %v2393_v2, %v2159_v58  ;;  %5898 = vmatmul.mubr.bf16.gmra.mrb[212].mxu1 %v2609_v9  ;;  %v2949_v9 = vld [vmem:[#allocation2 + $0xe1] sm:$0xff] }
 0x2d1   : > { %5998 = vmatmul.mubr.bf16.gmra.mrb[40].mxu0 %v7962_v49  ;;  %5901 = vmatprep.mubr.msk.bf16.mxu1 %vm6816_vm0, %v7739_v28  ;;  %v7975_v34 = vpack.c.bf16 %v2950_v42, %v2949_v9 }
 0x2d2   : > { %8894 = vst [vmem:[#allocation9_spill] sm:$0xff] %v7964_v18  ;;  %6001 = vmatprep.mubr.msk.bf16.mxu0 %vm6816_vm0, %v7739_v28 }
 0x2d3   : > { %v2030_v60 = vpop.f32.mrb[108].mxu1 }
 0x2d4   : > { %v2160_v46 = vadd.f32 %v2030_v60, %v7695_v37  ;;  %v2398_v53 = vpop.f32.mrb[192].mxu0  ;;  %v5679_v33 = vpop.f32.mrb[109].mxu1 }
 0x2d5   : > { %v5779_v39 = vpop.f32.mrb[193].mxu0  ;;  %v2033_v22 = vpop.f32.mrb[110].mxu1 }
 0x2d6   : > { %v7972_v13 = vadd.f32 %v2398_v53, %v2160_v46  ;;  %v2161_v31 = vadd.f32 %v2033_v22, %v7697_v44  ;;  %v2401_v58 = vpop.f32.mrb[194].mxu0  ;;  %v5680_v2 = vpop.f32.mrb[111].mxu1  ;;  %v2584_v44 = vld [vmem:[#allocation2 + $0xf8] sm:$0xff]  ;;  %v2583_v39 = vld [vmem:[#allocation2 + $0xf0] sm:$0xff] }
 0x2d7   : > { %v5780_v21 = vpop.f32.mrb[195].mxu0  ;;  %v2952_v53 = vld [vmem:[#allocation2 + $0xf9] sm:$0xff]  ;;  %v2611_v2 = vpack.c.bf16 %v2584_v44, %v2583_v39 }
 0x2d8   : > { %v7977_v18 = vadd.f32 %v2401_v58, %v2161_v31  ;;  %5902 = vmatmul.mubr.bf16.gmra.mrb[216].mxu1 %v2610_v16  ;;  %v2951_v16 = vld [vmem:[#allocation2 + $0xf1] sm:$0xff] }
 0x2d9   : > { %6002 = vmatmul.mubr.bf16.gmra.mrb[44].mxu0 %v7975_v34  ;;  %5905 = vmatprep.mubr.msk.bf16.mxu1 %vm6816_vm0, %v7739_v28  ;;  %v7988_v21 = vpack.c.bf16 %v2952_v53, %v2951_v16 }
 0x2da   : > { %8895 = vst [vmem:[#allocation10_spill] sm:$0xff] %v7977_v18  ;;  %6005 = vmatprep.mubr.msk.bf16.mxu0 %vm6816_vm0, %v7739_v28 }
 0x2db   : > { %v2038_v37 = vpop.f32.mrb[112].mxu1 }
 0x2dc   : > { %v2162_v60 = vadd.f32 %v2038_v37, %v7703_v24  ;;  %v2406_v14 = vpop.f32.mrb[196].mxu0  ;;  %v5683_v46 = vpop.f32.mrb[113].mxu1 }
 0x2dd   : > { %v5783_v33 = vpop.f32.mrb[197].mxu0  ;;  %v2041_v42 = vpop.f32.mrb[114].mxu1 }
 0x2de   : > { %v7985_v22 = vadd.f32 %v2406_v14, %v2162_v60  ;;  %v2163_v7 = vadd.f32 %v2041_v42, %v7705_v35  ;;  %v2409_v31 = vpop.f32.mrb[198].mxu0  ;;  %v5684_v58 = vpop.f32.mrb[115].mxu1  ;;  %v2586_v35 = vld [vmem:[#allocation2 + $0x108] sm:$0xff]  ;;  %v2585_v33 = vld [vmem:[#allocation2 + $0x100] sm:$0xff] }
 0x2df   : > { %v5784_v9 = vpop.f32.mrb[199].mxu0  ;;  %v2954_v14 = vld [vmem:[#allocation2 + $0x109] sm:$0xff]  ;;  %v2612_v58 = vpack.c.bf16 %v2586_v35, %v2585_v33 }
 0x2e0   : > { %v7990_v18 = vadd.f32 %v2409_v31, %v2163_v7  ;;  %5906 = vmatmul.mubr.bf16.gmra.mrb[220].mxu1 %v2611_v2  ;;  %v2953_v2 = vld [vmem:[#allocation2 + $0x101] sm:$0xff] }
 0x2e1   : > { %6006 = vmatmul.mubr.bf16.gmra.mrb[48].mxu0 %v7988_v21  ;;  %5909 = vmatprep.mubr.msk.bf16.mxu1 %vm6816_vm0, %v7739_v28  ;;  %v8001_v9 = vpack.c.bf16 %v2954_v14, %v2953_v2 }
 0x2e2   : > { %8896 = vst [vmem:[#allocation11_spill] sm:$0xff] %v7990_v18  ;;  %6009 = vmatprep.mubr.msk.bf16.mxu0 %vm6816_vm0, %v7739_v28 }
 0x2e3   : > { %v2046_v24 = vpop.f32.mrb[116].mxu1 }
 0x2e4   : > { %v2164_v37 = vadd.f32 %v2046_v24, %v7711_v47  ;;  %v2414_v44 = vpop.f32.mrb[200].mxu0  ;;  %v5687_v60 = vpop.f32.mrb[117].mxu1 }
 0x2e5   : > { %v5787_v46 = vpop.f32.mrb[201].mxu0  ;;  %v2049_v53 = vpop.f32.mrb[118].mxu1 }
 0x2e6   : > { %v7998_v42 = vadd.f32 %v2414_v44, %v2164_v37  ;;  %v2165_v39 = vadd.f32 %v2049_v53, %v7713_v52  ;;  %v2417_v7 = vpop.f32.mrb[202].mxu0  ;;  %v5688_v31 = vpop.f32.mrb[119].mxu1  ;;  %v2588_v52 = vld [vmem:[#allocation2 + $0x118] sm:$0xff]  ;;  %v2587_v46 = vld [vmem:[#allocation2 + $0x110] sm:$0xff] }
 0x2e7   : > { %v5788_v16 = vpop.f32.mrb[203].mxu0  ;;  %v2956_v44 = vld [vmem:[#allocation2 + $0x119] sm:$0xff]  ;;  %v2613_v31 = vpack.c.bf16 %v2588_v52, %v2587_v46 }
 0x2e8   : > { %v8003_v18 = vadd.f32 %v2417_v7, %v2165_v39  ;;  %5910 = vmatmul.mubr.bf16.gmra.mrb[224].mxu1 %v2612_v58  ;;  %v2955_v58 = vld [vmem:[#allocation2 + $0x111] sm:$0xff] }
 0x2e9   : > { %6010 = vmatmul.mubr.bf16.gmra.mrb[52].mxu0 %v8001_v9  ;;  %5913 = vmatprep.mubr.msk.bf16.mxu1 %vm6816_vm0, %v7739_v28  ;;  %v8014_v16 = vpack.c.bf16 %v2956_v44, %v2955_v58 }
 0x2ea   : > { %8897 = vst [vmem:[#allocation12_spill] sm:$0xff] %v8003_v18  ;;  %6013 = vmatprep.mubr.msk.bf16.mxu0 %vm6816_vm0, %v7739_v28 }
 0x2eb   : > { %v2054_v47 = vpop.f32.mrb[120].mxu1 }
 0x2ec   : > { %v2166_v24 = vadd.f32 %v2054_v47, %v7719_v8  ;;  %v2422_v35 = vpop.f32.mrb[204].mxu0  ;;  %v5691_v37 = vpop.f32.mrb[121].mxu1 }
 0x2ed   : > { %v5791_v60 = vpop.f32.mrb[205].mxu0  ;;  %v2057_v14 = vpop.f32.mrb[122].mxu1 }
 0x2ee   : > { %v8011_v53 = vadd.f32 %v2422_v35, %v2166_v24  ;;  %v2167_v33 = vadd.f32 %v2057_v14, %v7721_v6  ;;  %v2425_v39 = vpop.f32.mrb[206].mxu0  ;;  %v5692_v7 = vpop.f32.mrb[123].mxu1  ;;  %v2590_v6 = vld [vmem:[#allocation2 + $0x128] sm:$0xff]  ;;  %v2589_v60 = vld [vmem:[#allocation2 + $0x120] sm:$0xff] }
 0x2ef   : > { %v5792_v2 = vpop.f32.mrb[207].mxu0  ;;  %v2958_v35 = vld [vmem:[#allocation2 + $0x129] sm:$0xff]  ;;  %v2614_v7 = vpack.c.bf16 %v2590_v6, %v2589_v60 }
 0x2f0   : > { %v8016_v18 = vadd.f32 %v2425_v39, %v2167_v33  ;;  %5914 = vmatmul.mubr.bf16.gmra.mrb[228].mxu1 %v2613_v31  ;;  %v2957_v31 = vld [vmem:[#allocation2 + $0x121] sm:$0xff] }
 0x2f1   : > { %6014 = vmatmul.mubr.bf16.gmra.mrb[56].mxu0 %v8014_v16  ;;  %5917 = vmatprep.mubr.msk.bf16.mxu1 %vm6816_vm0, %v7739_v28  ;;  %v8027_v2 = vpack.c.bf16 %v2958_v35, %v2957_v31 }
 0x2f2   : > { %8898 = vst [vmem:[#allocation13_spill] sm:$0xff] %v8016_v18  ;;  %6017 = vmatprep.mubr.msk.bf16.mxu0 %vm6816_vm0, %v7739_v28 }
 0x2f3   : > { %v2062_v8 = vpop.f32.mrb[124].mxu1 }
 0x2f4   : > { %v2168_v47 = vadd.f32 %v2062_v8, %v7727_v15  ;;  %v2430_v52 = vpop.f32.mrb[208].mxu0  ;;  %v5695_v24 = vpop.f32.mrb[125].mxu1 }
 0x2f5   : > { %v5795_v37 = vpop.f32.mrb[209].mxu0  ;;  %v2065_v44 = vpop.f32.mrb[126].mxu1 }
 0x2f6   : > { %v8024_v14 = vadd.f32 %v2430_v52, %v2168_v47  ;;  %v2169_v46 = vadd.f32 %v2065_v44, %v7729_v4  ;;  %v2433_v33 = vpop.f32.mrb[210].mxu0  ;;  %v5696_v39 = vpop.f32.mrb[127].mxu1  ;;  %v2592_v4 = vld [vmem:[#allocation2 + $0x138] sm:$0xff]  ;;  %v2591_v37 = vld [vmem:[#allocation2 + $0x130] sm:$0xff] }
 0x2f7   : > { %v5796_v58 = vpop.f32.mrb[211].mxu0  ;;  %v2960_v52 = vld [vmem:[#allocation2 + $0x139] sm:$0xff]  ;;  %v2615_v39 = vpack.c.bf16 %v2592_v4, %v2591_v37 }
 0x2f8   : > { %v8029_v18 = vadd.f32 %v2433_v33, %v2169_v46  ;;  %5918 = vmatmul.mubr.bf16.gmra.mrb[232].mxu1 %v2614_v7  ;;  %v2959_v7 = vld [vmem:[#allocation2 + $0x131] sm:$0xff] }
 0x2f9   : > { %6018 = vmatmul.mubr.bf16.gmra.mrb[60].mxu0 %v8027_v2  ;;  %5921 = vmatprep.mubr.msk.bf16.mxu1 %vm6816_vm0, %v7739_v28  ;;  %v8040_v58 = vpack.c.bf16 %v2960_v52, %v2959_v7 }
 0x2fa   : > { %8899 = vst [vmem:[#allocation14_spill] sm:$0xff] %v8029_v18  ;;  %6021 = vmatprep.mubr.msk.bf16.mxu0 %vm6816_vm0, %v7739_v28 }
 0x2fb   : > { %v2070_v15 = vpop.f32.mrb[128].mxu1 }
 0x2fc   : > { %v2170_v8 = vadd.f32 %v2070_v15, %v7735_v30  ;;  %v2438_v6 = vpop.f32.mrb[212].mxu0  ;;  %v5699_v47 = vpop.f32.mrb[129].mxu1 }
 0x2fd   : > { %v5799_v24 = vpop.f32.mrb[213].mxu0  ;;  %v2073_v35 = vpop.f32.mrb[130].mxu1 }
 0x2fe   : > { %v8037_v44 = vadd.f32 %v2438_v6, %v2170_v8  ;;  %v2171_v60 = vadd.f32 %v2073_v35, %v7737_v55  ;;  %v2441_v46 = vpop.f32.mrb[214].mxu0  ;;  %v5700_v33 = vpop.f32.mrb[131].mxu1  ;;  %v2594_v55 = vld [vmem:[#allocation2 + $0x148] sm:$0xff]  ;;  %v2593_v24 = vld [vmem:[#allocation2 + $0x140] sm:$0xff] }
 0x2ff   : > { %v5800_v31 = vpop.f32.mrb[215].mxu0  ;;  %v2962_v6 = vld [vmem:[#allocation2 + $0x149] sm:$0xff]  ;;  %v2616_v33 = vpack.c.bf16 %v2594_v55, %v2593_v24 }
 0x300   : > { %v8042_v18 = vadd.f32 %v2441_v46, %v2171_v60  ;;  %5922 = vmatmul.mubr.bf16.gmra.mrb[236].mxu1 %v2615_v39  ;;  %v2961_v39 = vld [vmem:[#allocation2 + $0x141] sm:$0xff] }
 0x301   : > { %6022 = vmatmul.mubr.bf16.gmra.mrb[64].mxu0 %v8040_v58  ;;  %5925 = vmatprep.mubr.msk.bf16.mxu1 %vm6816_vm0, %v7739_v28  ;;  %v8053_v31 = vpack.c.bf16 %v2962_v6, %v2961_v39 }
 0x302   : > { %8900 = vst [vmem:[#allocation15_spill] sm:$0xff] %v8042_v18  ;;  %6025 = vmatprep.mubr.msk.bf16.mxu0 %vm6816_vm0, %v7739_v28 }
 0x303   : > { %v2078_v30 = vpop.f32.mrb[132].mxu1 }
 0x304   : > { %v2172_v15 = vadd.f32 %v2078_v30, %v7745_v25  ;;  %v2446_v4 = vpop.f32.mrb[216].mxu0  ;;  %v5703_v8 = vpop.f32.mrb[133].mxu1 }
 0x305   : > { %v5803_v47 = vpop.f32.mrb[217].mxu0  ;;  %v2081_v52 = vpop.f32.mrb[134].mxu1 }
 0x306   : > { %v8050_v35 = vadd.f32 %v2446_v4, %v2172_v15  ;;  %v2173_v37 = vadd.f32 %v2081_v52, %v7747_v61  ;;  %v2449_v60 = vpop.f32.mrb[218].mxu0  ;;  %v5704_v46 = vpop.f32.mrb[135].mxu1  ;;  %v2596_v61 = vld [vmem:[#allocation2 + $0x158] sm:$0xff]  ;;  %v2595_v47 = vld [vmem:[#allocation2 + $0x150] sm:$0xff] }
 0x307   : > { %v5804_v7 = vpop.f32.mrb[219].mxu0  ;;  %v2964_v4 = vld [vmem:[#allocation2 + $0x159] sm:$0xff]  ;;  %v2617_v46 = vpack.c.bf16 %v2596_v61, %v2595_v47 }
 0x308   : > { %v8055_v18 = vadd.f32 %v2449_v60, %v2173_v37  ;;  %5926 = vmatmul.mubr.bf16.gmra.mrb[240].mxu1 %v2616_v33  ;;  %v2963_v33 = vld [vmem:[#allocation2 + $0x151] sm:$0xff] }
 0x309   : > { %6026 = vmatmul.mubr.bf16.gmra.mrb[68].mxu0 %v8053_v31  ;;  %5929 = vmatprep.mubr.msk.bf16.mxu1 %vm6816_vm0, %v7739_v28 }
 0x30a   : > { %6029 = vmatprep.mubr.msk.bf16.mxu0 %vm6816_vm0, %v7739_v28  ;;  %v8066_v28 = vpack.c.bf16 %v2964_v4, %v2963_v33 }
 0x30b   : > { %v2086_v25 = vpop.f32.mrb[136].mxu1 }
 0x30c   : > { %v2174_v30 = vadd.f32 %v2086_v25, %v7753_v41  ;;  %v2454_v55 = vpop.f32.mrb[220].mxu0  ;;  %v5707_v15 = vpop.f32.mrb[137].mxu1  ;;  %v8071_v41 = vld [vmem:[#allocation2] sm:$0xff] }
 0x30d   : > { %v5807_v8 = vpop.f32.mrb[221].mxu0  ;;  %v2089_v6 = vpop.f32.mrb[138].mxu1  ;;  %v2597_v25 = vld [vmem:[#allocation2 + $0x160] sm:$0xf] }
 0x30e   : > { %v8063_v52 = vadd.f32 %v2454_v55, %v2174_v30  ;;  %v2175_v24 = vadd.f32 %v2089_v6, %v7755_v19  ;;  %v2457_v37 = vpop.f32.mrb[222].mxu0  ;;  %v5708_v60 = vpop.f32.mrb[139].mxu1  ;;  %v2965_v15 = vld [vmem:[#allocation2 + $0x161] sm:$0xf] }
 0x30f   : > { %v5808_v39 = vpop.f32.mrb[223].mxu0  ;;  %v2618_v60 = vpack.c.bf16 %v2597_v25, %v2597_v25  ;;  %v2986_v33 = vpack.c.bf16 %v2965_v15, %v2965_v15  ;;  %v6423_v15 = vld [vmem:[%s8884_s3 + $0x200] sm:$0xff]  }
 0x310   : > { %v8068_v7 = vadd.f32 %v2457_v37, %v2175_v24  ;;  %5930 = vmatmul.mubr.bf16.gmra.mrb[244].mxu1 %v2617_v46 }
 0x311   : > { %6030 = vmatmul.mubr.bf16.gmra.mrb[72].mxu0 %v8066_v28  ;;  %5933 = vmatprep.mubr.msk.bf16.mxu1 %vm6816_vm0, %v8071_v41 }
 0x312   : > { %6033 = vmatprep.mubr.msk.bf16.mxu0 %vm6816_vm0, %v8071_v41 }
 0x313   : > { %v2094_v19 = vpop.f32.mrb[140].mxu1 }
 0x314   : > { %v2176_v61 = vadd.f32 %v2094_v19, %v7761_v27  ;;  %v2462_v30 = vpop.f32.mrb[224].mxu0  ;;  %v5711_v55 = vpop.f32.mrb[141].mxu1  ;;  %v3662_v19 = vld [vmem:[#allocation2 + $0x3a] sm:$0xff] }
 0x315   : > { %v5811_v4 = vpop.f32.mrb[225].mxu0  ;;  %v2097_v8 = vpop.f32.mrb[142].mxu1 }
 0x316   : > { %v8078_v6 = vadd.f32 %v2462_v30, %v2176_v61  ;;  %v2177_v47 = vadd.f32 %v2097_v8, %v7763_v45  ;;  %v2465_v24 = vpop.f32.mrb[226].mxu0  ;;  %v5712_v37 = vpop.f32.mrb[143].mxu1  ;;  %v3661_v4 = vld [vmem:[#allocation2 + $0x32] sm:$0xff] }
 0x317   : > { %v5812_v46 = vpop.f32.mrb[227].mxu0 }
 0x318   : > { %v8081_v39 = vadd.f32 %v2465_v24, %v2177_v47  ;;  %5934 = vmatmul.mubr.bf16.gmra.mrb[248].mxu1 %v2618_v60  ;;  %v3702_v46 = vpack.c.bf16 %v3662_v19, %v3661_v4 }
 0x319   : > { %6034 = vmatmul.mubr.bf16.gmra.mrb[76].mxu0 %v2986_v33  ;;  %6053 = vmatprep.mubr.msk.bf16.mxu1 %vm6816_vm0, %v8071_v41 }
 0x31a   : > { %6153 = vmatprep.mubr.msk.bf16.mxu0 %vm6816_vm0, %v8071_v41 }
 0x31b   : > { %v2102_v27 = vpop.f32.mrb[144].mxu1 }
 0x31c   : > { %v2178_v61 = vadd.f32 %v2102_v27, %v7769_v57  ;;  %v2470_v45 = vpop.f32.mrb[228].mxu0  ;;  %v5715_v30 = vpop.f32.mrb[145].mxu1  ;;  %v6424_v57 = vld [vmem:[%s8884_s3 + $0x208] sm:$0xff]  }
 0x31d   : > { %v5815_v55 = vpop.f32.mrb[229].mxu0  ;;  %v2105_v25 = vpop.f32.mrb[146].mxu1 }
 0x31e   : > { %v8091_v8 = vadd.f32 %v2470_v45, %v2178_v61  ;;  %v2179_v47 = vadd.f32 %v2105_v25, %v7774_v10  ;;  %v2473_v24 = vpop.f32.mrb[230].mxu0  ;;  %v5716_v37 = vpop.f32.mrb[147].mxu1 }
 0x31f   : > { %v5816_v60 = vpop.f32.mrb[231].mxu0 }
 0x320   : > { %v8094_v33 = vadd.f32 %v2473_v24, %v2179_v47  ;;  %6054 = vmatmul.mubr.bf16.vlgmr.msra.gmra.mrb[252].mxu1 %v7792_v50  ;;  %v3664_v50 = vld [vmem:[#allocation2 + $0x4a] sm:$0xff]  ;;  %v3663_v47 = vld [vmem:[#allocation2 + $0x42] sm:$0xff] }
 0x321   : > { %6154 = vmatmul.mubr.bf16.vlgmr.msra.gmra.mrb[80].mxu0 %v3702_v46  ;;  %6238 = vmatpush3.bf16.msra.mxu1 %v6423_v15  ;;  %v6425_v24 = vld [vmem:[%s8884_s3 + $0x210] sm:$0xff]   ;;  %v3703_v37 = vpack.c.bf16 %v3664_v50, %v3663_v47 }
 0x322   : > { %6057 = vmatprep.mubr.msk.bf16.mxu1 %vm6816_vm0, %v8071_v41  ;;  %6157 = vmatprep.mubr.msk.bf16.mxu0 %vm6816_vm0, %v8071_v41 }
 0x323   : > { %v2110_v10 = vpop.f32.mrb[148].mxu1  ;;  %6239 = vmatprep.subr.bf16.mxu1 %v8071_v41 }
 0x324   : > { %v2180_v27 = vadd.f32 %v2110_v10, %v7784_v23  ;;  %v2478_v19 = vpop.f32.mrb[232].mxu0  ;;  %v5719_v61 = vpop.f32.mrb[149].mxu1 }
 0x325   : > { %v5819_v45 = vpop.f32.mrb[233].mxu0  ;;  %v2113_v30 = vpop.f32.mrb[150].mxu1  ;;  %6240 = vmatpush3.bf16.msra.mxu1 %v6424_v57 }
 0x326   : > { %v8106_v55 = vadd.f32 %v2478_v19, %v2180_v27  ;;  %v2181_v25 = vadd.f32 %v2113_v30, %v7790_v32  ;;  %v2481_v15 = vpop.f32.mrb[234].mxu0  ;;  %v5720_v4 = vpop.f32.mrb[151].mxu1  ;;  %6241 = vmatprep.subr.bf16.mxu1 %v8071_v41  ;;  %v6426_v32 = vld [vmem:[%s8884_s3 + $0x218] sm:$0xff]  }
 0x327   : > { %v5820_v23 = vpop.f32.mrb[235].mxu0  ;;  %v6427_v4 = vld [vmem:[%s8884_s3 + $0x220] sm:$0xff]  }
 0x328   : > { %v8113_v60 = vadd.f32 %v2481_v15, %v2181_v25  ;;  %6058 = vmatmul.mubr.bf16.gmra.mrb[0].mxu1 %v7817_v26  ;;  %v3666_v26 = vld [vmem:[#allocation2 + $0x5a] sm:$0xff]  ;;  %v3665_v15 = vld [vmem:[#allocation2 + $0x52] sm:$0xff] }
 0x329   : > { %6158 = vmatmul.mubr.bf16.gmra.mrb[84].mxu0 %v3703_v37  ;;  %6061 = vmatprep.mubr.msk.bf16.mxu1 %vm6816_vm0, %v8071_v41 }
 0x32a   : > { %6161 = vmatprep.mubr.msk.bf16.mxu0 %vm6816_vm0, %v8071_v41  ;;  %6242 = vmatpush3.bf16.msra.mxu1 %v6425_v24  ;;  %v3704_v24 = vpack.c.bf16 %v3666_v26, %v3665_v15 }
 0x32b   : > { %v2118_v46 = vpop.f32.mrb[152].mxu1  ;;  %6243 = vmatprep.subr.bf16.mxu1 %v8071_v41 }
 0x32c   : > { %v2182_v57 = vadd.f32 %v2118_v46, %v7807_v0  ;;  %v2486_v10 = vpop.f32.mrb[236].mxu0  ;;  %v5723_v27 = vpop.f32.mrb[153].mxu1 }
 0x32d   : > { %v5823_v19 = vpop.f32.mrb[237].mxu0  ;;  %v2121_v61 = vpop.f32.mrb[154].mxu1 }
 0x32e   : > { %v8125_v50 = vadd.f32 %v2486_v10, %v2182_v57  ;;  %v2183_v45 = vadd.f32 %v2121_v61, %v7815_v5  ;;  %v2489_v30 = vpop.f32.mrb[238].mxu0  ;;  %v5724_v25 = vpop.f32.mrb[155].mxu1  ;;  %6244 = vmatpush3.bf16.msra.mxu1 %v6426_v32  ;;  %v6428_v5 = vld [vmem:[%s8884_s3 + $0x228] sm:$0xff]  }
 0x32f   : > { %v5824_v47 = vpop.f32.mrb[239].mxu0  ;;  %6245 = vmatprep.subr.bf16.mxu1 %v8071_v41 }
 0x330   : > { %v8132_v0 = vadd.f32 %v2489_v30, %v2183_v45  ;;  %6062 = vmatmul.mubr.bf16.gmra.mrb[4].mxu1 %v7844_v11  ;;  %v3668_v11 = vld [vmem:[#allocation2 + $0x6a] sm:$0xff]  ;;  %v3667_v45 = vld [vmem:[#allocation2 + $0x62] sm:$0xff] }
 0x331   : > { %6162 = vmatmul.mubr.bf16.gmra.mrb[88].mxu0 %v3704_v24  ;;  %6065 = vmatprep.mubr.msk.bf16.mxu1 %vm6816_vm0, %v8071_v41  ;;  %v6429_v30 = vld [vmem:[%s8884_s3 + $0x230] sm:$0xff]   ;;  %v3705_v15 = vpack.c.bf16 %v3668_v11, %v3667_v45  ;;  %v8901_v45 = vld [vmem:[#allocation3_spill] sm:$0xff] }
 0x332   : > { %6165 = vmatprep.mubr.msk.bf16.mxu0 %vm6816_vm0, %v8071_v41  ;;  %6246 = vmatpush3.bf16.msra.mxu1 %v6427_v4 }
 0x333   : > { %v2126_v23 = vpop.f32.mrb[156].mxu1  ;;  %6247 = vmatprep.subr.bf16.mxu1 %v8071_v41 }
 0x334   : > { %v2184_v37 = vadd.f32 %v2126_v23, %v7833_v48  ;;  %v2494_v32 = vpop.f32.mrb[240].mxu0  ;;  %v5727_v46 = vpop.f32.mrb[157].mxu1 }
 0x335   : > { %v5827_v57 = vpop.f32.mrb[241].mxu0  ;;  %v2129_v10 = vpop.f32.mrb[158].mxu1 }
 0x336   : > { %v8144_v27 = vadd.f32 %v2494_v32, %v2184_v37  ;;  %v2185_v26 = vadd.f32 %v2129_v10, %v7842_v62  ;;  %v2497_v19 = vpop.f32.mrb[242].mxu0  ;;  %v5728_v61 = vpop.f32.mrb[159].mxu1  ;;  %6248 = vmatpush3.bf16.msra.mxu1 %v6428_v5  ;;  %v6430_v62 = vld [vmem:[%s8884_s3 + $0x238] sm:$0xff]  }
 0x337   : > { %v5828_v25 = vpop.f32.mrb[243].mxu0  ;;  %6249 = vmatprep.subr.bf16.mxu1 %v8071_v41  ;;  %v3669_v10 = vld [vmem:[#allocation2 + $0x72] sm:$0xff] }
 0x338   : > { %v8151_v48 = vadd.f32 %v2497_v19, %v2185_v26  ;;  %6066 = vmatmul.mubr.bf16.gmra.mrb[8].mxu1 %v7868_v63  ;;  %v3670_v63 = vld [vmem:[#allocation2 + $0x7a] sm:$0xff] }
 0x339   : > { %6166 = vmatmul.mubr.bf16.gmra.mrb[92].mxu0 %v3705_v15  ;;  %6069 = vmatprep.mubr.msk.bf16.mxu1 %vm6816_vm0, %v8071_v41  ;;  %v3706_v19 = vpack.c.bf16 %v3670_v63, %v3669_v10  ;;  %v3672_v15 = vld [vmem:[#allocation2 + $0x8a] sm:$0xff]  ;;  %v3674_v10 = vld [vmem:[#allocation2 + $0x9a] sm:$0xff] }
 0x33a   : > { %6169 = vmatprep.mubr.msk.bf16.mxu0 %vm6816_vm0, %v8071_v41  ;;  %6250 = vmatpush3.bf16.msra.mxu1 %v6429_v30 }
 0x33b   : > { %v2134_v4 = vpop.f32.mrb[160].mxu1  ;;  %6251 = vmatprep.subr.bf16.mxu1 %v8071_v41 }
 0x33c   : > { %v2186_v47 = vadd.f32 %v2134_v4, %v7860_v36  ;;  %v2502_v24 = vpop.f32.mrb[244].mxu0  ;;  %v5731_v5 = vpop.f32.mrb[161].mxu1 }
 0x33d   : > { %v5831_v23 = vpop.f32.mrb[245].mxu0  ;;  %v2137_v37 = vpop.f32.mrb[162].mxu1 }
 0x33e   : > { %v8163_v32 = vadd.f32 %v2502_v24, %v2186_v47  ;;  %v2187_v46 = vadd.f32 %v2137_v37, %v7866_v59  ;;  %v2505_v11 = vpop.f32.mrb[246].mxu0  ;;  %v5732_v57 = vpop.f32.mrb[163].mxu1  ;;  %6252 = vmatpush3.bf16.msra.mxu1 %v6430_v62 }
 0x33f   : > { %v5832_v26 = vpop.f32.mrb[247].mxu0 }
 0x340   : > { %v8166_v61 = vadd.f32 %v2505_v11, %v2187_v46  ;;  %6070 = vmatmul.mubr.bf16.gmra.mrb[12].mxu1 %v7886_v56  ;;  %v3671_v56 = vld [vmem:[#allocation2 + $0x82] sm:$0xff] }
 0x341   : > { %6170 = vmatmul.mubr.bf16.gmra.mrb[96].mxu0 %v3706_v19  ;;  %6073 = vmatprep.mubr.msk.bf16.mxu1 %vm6816_vm0, %v8071_v41  ;;  %v3707_v23 = vpack.c.bf16 %v3672_v15, %v3671_v56 }
 0x342   : > { %6173 = vmatprep.mubr.msk.bf16.mxu0 %vm6816_vm0, %v8071_v41 }
 0x343   : > { %v2142_v36 = vpop.f32.mrb[164].mxu1 }
 0x344   : > { %v2188_v59 = vadd.f32 %v2142_v36, %v8901_v45  ;;  %v2510_v30 = vpop.f32.mrb[248].mxu0  ;;  %v5735_v25 = vpop.f32.mrb[165].mxu1  ;;  %v8902_v45 = vld [vmem:[#allocation4_spill] sm:$0xff] }
 0x345   : > { %v5835_v62 = vpop.f32.mrb[249].mxu0  ;;  %v2145_v4 = vpop.f32.mrb[166].mxu1  ;;  %v3673_v25 = vld [vmem:[#allocation2 + $0x92] sm:$0xff] }
 0x346   : > { %v8174_v47 = vadd.f32 %v2510_v30, %v2188_v59  ;;  %v2513_v24 = vpop.f32.mrb[250].mxu0  ;;  %v5736_v5 = vpop.f32.mrb[167].mxu1  ;;  %v3708_v62 = vpack.c.bf16 %v3674_v10, %v3673_v25 }
 0x347   : > { %v5836_v63 = vpop.f32.mrb[251].mxu0 }
 0x348   : > { %6074 = vmatmul.mubr.bf16.gmra.mrb[16].mxu1 %v7897_v54  ;;  %v3676_v63 = vld [vmem:[#allocation2 + $0xaa] sm:$0xff] }
 0x349   : > { %6174 = vmatmul.mubr.bf16.gmra.mrb[100].mxu0 %v3707_v23  ;;  %6077 = vmatprep.mubr.msk.bf16.mxu1 %vm6816_vm0, %v8071_v41 }
 0x34a   : > { %6177 = vmatprep.mubr.msk.bf16.mxu0 %vm6816_vm0, %v8071_v41 }
 0x34b   : > { %v2718_v37 = vpop.f32.mrb[168].mxu1 }
 0x34c   : > { %v2884_v46 = vadd.f32 %v2718_v37, %v7894_v12  ;;  %v3086_v11 = vpop.f32.mrb[252].mxu0  ;;  %v5855_v57 = vpop.f32.mrb[169].mxu1 }
 0x34d   : > { %v5955_v26 = vpop.f32.mrb[253].mxu0  ;;  %v2721_v19 = vpop.f32.mrb[170].mxu1 }
 0x34e   : > { %v8182_v36 = vadd.f32 %v3086_v11, %v2884_v46  ;;  %v2885_v59 = vadd.f32 %v2721_v19, %v8902_v45  ;;  %v3089_v54 = vpop.f32.mrb[254].mxu0  ;;  %v5856_v30 = vpop.f32.mrb[171].mxu1  ;;  %v8903_v11 = vld [vmem:[#allocation5_spill] sm:$0xff]  ;;  %v3675_v26 = vld [vmem:[#allocation2 + $0xa2] sm:$0xff] }
 0x34f   : > { %v5956_v15 = vpop.f32.mrb[255].mxu0  ;;  %v3709_v45 = vpack.c.bf16 %v3676_v63, %v3675_v26 }
 0x350   : > { %v8185_v4 = vadd.f32 %v3089_v54, %v2885_v59  ;;  %6078 = vmatmul.mubr.bf16.gmra.mrb[20].mxu1 %v7910_v51  ;;  %v3678_v15 = vld [vmem:[#allocation2 + $0xba] sm:$0xff] }
 0x351   : > { %6178 = vmatmul.mubr.bf16.gmra.mrb[104].mxu0 %v3708_v62  ;;  %6081 = vmatprep.mubr.msk.bf16.mxu1 %vm6816_vm0, %v8071_v41 }
 0x352   : > { %6181 = vmatprep.mubr.msk.bf16.mxu0 %vm6816_vm0, %v8071_v41 }
 0x353   : > { %v2726_v12 = vpop.f32.mrb[172].mxu1 }
 0x354   : > { %v2886_v24 = vadd.f32 %v2726_v12, %v7907_v20  ;;  %v3094_v5 = vpop.f32.mrb[0].mxu0  ;;  %v5859_v56 = vpop.f32.mrb[173].mxu1 }
 0x355   : > { %v5959_v23 = vpop.f32.mrb[1].mxu0  ;;  %v2729_v37 = vpop.f32.mrb[174].mxu1 }
 0x356   : > { %v8193_v46 = vadd.f32 %v3094_v5, %v2886_v24  ;;  %v2887_v57 = vadd.f32 %v2729_v37, %v8903_v11  ;;  %v3097_v51 = vpop.f32.mrb[2].mxu0  ;;  %v5860_v10 = vpop.f32.mrb[175].mxu1  ;;  %v8904_v5 = vld [vmem:[#allocation6_spill] sm:$0xff]  ;;  %v3677_v23 = vld [vmem:[#allocation2 + $0xb2] sm:$0xff] }
 0x357   : > { %v5960_v19 = vpop.f32.mrb[3].mxu0  ;;  %v3710_v11 = vpack.c.bf16 %v3678_v15, %v3677_v23 }
 0x358   : > { %v8196_v59 = vadd.f32 %v3097_v51, %v2887_v57  ;;  %6082 = vmatmul.mubr.bf16.gmra.mrb[24].mxu1 %v7923_v40  ;;  %v3680_v19 = vld [vmem:[#allocation2 + $0xca] sm:$0xff] }
 0x359   : > { %6182 = vmatmul.mubr.bf16.gmra.mrb[108].mxu0 %v3709_v45  ;;  %6085 = vmatprep.mubr.msk.bf16.mxu1 %vm6816_vm0, %v8071_v41 }
 0x35a   : > { %6185 = vmatprep.mubr.msk.bf16.mxu0 %vm6816_vm0, %v8071_v41 }
 0x35b   : > { %v2734_v20 = vpop.f32.mrb[176].mxu1 }
 0x35c   : > { %v2888_v54 = vadd.f32 %v2734_v20, %v7920_v17  ;;  %v3102_v30 = vpop.f32.mrb[4].mxu0  ;;  %v5863_v25 = vpop.f32.mrb[177].mxu1 }
 0x35d   : > { %v5963_v62 = vpop.f32.mrb[5].mxu0  ;;  %v2737_v12 = vpop.f32.mrb[178].mxu1 }
 0x35e   : > { %v8204_v24 = vadd.f32 %v3102_v30, %v2888_v54  ;;  %v2889_v56 = vadd.f32 %v2737_v12, %v8904_v5  ;;  %v3105_v40 = vpop.f32.mrb[6].mxu0  ;;  %v5864_v63 = vpop.f32.mrb[179].mxu1  ;;  %v8905_v30 = vld [vmem:[#allocation7_spill] sm:$0xff] }
 0x35f   : > { %v5964_v37 = vpop.f32.mrb[7].mxu0  ;;  %v3679_v62 = vld [vmem:[#allocation2 + $0xc2] sm:$0xff] }
 0x360   : > { %v8207_v57 = vadd.f32 %v3105_v40, %v2889_v56  ;;  %6086 = vmatmul.mubr.bf16.gmra.mrb[28].mxu1 %v7936_v29  ;;  %v3711_v5 = vpack.c.bf16 %v3680_v19, %v3679_v62  ;;  %v3682_v37 = vld [vmem:[#allocation2 + $0xda] sm:$0xff] }
 0x361   : > { %6186 = vmatmul.mubr.bf16.gmra.mrb[112].mxu0 %v3710_v11  ;;  %6089 = vmatprep.mubr.msk.bf16.mxu1 %vm6816_vm0, %v8071_v41 }
 0x362   : > { %6189 = vmatprep.mubr.msk.bf16.mxu0 %vm6816_vm0, %v8071_v41 }
 0x363   : > { %v2742_v17 = vpop.f32.mrb[180].mxu1 }
 0x364   : > { %v2890_v51 = vadd.f32 %v2742_v17, %v7933_v3  ;;  %v3110_v10 = vpop.f32.mrb[8].mxu0  ;;  %v5867_v26 = vpop.f32.mrb[181].mxu1 }
 0x365   : > { %v5967_v45 = vpop.f32.mrb[9].mxu0  ;;  %v2745_v20 = vpop.f32.mrb[182].mxu1 }
 0x366   : > { %v8215_v54 = vadd.f32 %v3110_v10, %v2890_v51  ;;  %v2891_v25 = vadd.f32 %v2745_v20, %v8905_v30  ;;  %v3113_v29 = vpop.f32.mrb[10].mxu0  ;;  %v5868_v15 = vpop.f32.mrb[183].mxu1  ;;  %v8906_v10 = vld [vmem:[#allocation8_spill] sm:$0xff] }
 0x367   : > { %v5968_v12 = vpop.f32.mrb[11].mxu0  ;;  %v3681_v45 = vld [vmem:[#allocation2 + $0xd2] sm:$0xff] }
 0x368   : > { %v8218_v56 = vadd.f32 %v3113_v29, %v2891_v25  ;;  %6090 = vmatmul.mubr.bf16.gmra.mrb[32].mxu1 %v7949_v38  ;;  %v3712_v30 = vpack.c.bf16 %v3682_v37, %v3681_v45  ;;  %v3684_v12 = vld [vmem:[#allocation2 + $0xea] sm:$0xff] }
 0x369   : > { %6190 = vmatmul.mubr.bf16.gmra.mrb[116].mxu0 %v3711_v5  ;;  %6093 = vmatprep.mubr.msk.bf16.mxu1 %vm6816_vm0, %v8071_v41 }
 0x36a   : > { %6193 = vmatprep.mubr.msk.bf16.mxu0 %vm6816_vm0, %v8071_v41 }
 0x36b   : > { %v2750_v3 = vpop.f32.mrb[184].mxu1 }
 0x36c   : > { %v2892_v40 = vadd.f32 %v2750_v3, %v7946_v1  ;;  %v3118_v63 = vpop.f32.mrb[12].mxu0  ;;  %v5871_v23 = vpop.f32.mrb[185].mxu1 }
 0x36d   : > { %v5971_v11 = vpop.f32.mrb[13].mxu0  ;;  %v2753_v17 = vpop.f32.mrb[186].mxu1 }
 0x36e   : > { %v8226_v51 = vadd.f32 %v3118_v63, %v2892_v40  ;;  %v2893_v26 = vadd.f32 %v2753_v17, %v8906_v10  ;;  %v3121_v38 = vpop.f32.mrb[14].mxu0  ;;  %v5872_v19 = vpop.f32.mrb[187].mxu1  ;;  %v8907_v63 = vld [vmem:[#allocation9_spill] sm:$0xff]  ;;  %v3683_v11 = vld [vmem:[#allocation2 + $0xe2] sm:$0xff] }
 0x36f   : > { %v5972_v20 = vpop.f32.mrb[15].mxu0  ;;  %v3713_v10 = vpack.c.bf16 %v3684_v12, %v3683_v11 }
 0x370   : > { %v8229_v25 = vadd.f32 %v3121_v38, %v2893_v26  ;;  %6094 = vmatmul.mubr.bf16.gmra.mrb[36].mxu1 %v7962_v49  ;;  %v3686_v20 = vld [vmem:[#allocation2 + $0xfa] sm:$0xff] }
 0x371   : > { %6194 = vmatmul.mubr.bf16.gmra.mrb[120].mxu0 %v3712_v30  ;;  %6097 = vmatprep.mubr.msk.bf16.mxu1 %vm6816_vm0, %v8071_v41 }
 0x372   : > { %6197 = vmatprep.mubr.msk.bf16.mxu0 %vm6816_vm0, %v8071_v41 }
 0x373   : > { %v2758_v1 = vpop.f32.mrb[188].mxu1 }
 0x374   : > { %v2894_v29 = vadd.f32 %v2758_v1, %v7959_v43  ;;  %v3126_v15 = vpop.f32.mrb[16].mxu0  ;;  %v5875_v62 = vpop.f32.mrb[189].mxu1 }
 0x375   : > { %v5975_v5 = vpop.f32.mrb[17].mxu0  ;;  %v2761_v3 = vpop.f32.mrb[190].mxu1 }
 0x376   : > { %v8237_v40 = vadd.f32 %v3126_v15, %v2894_v29  ;;  %v2895_v23 = vadd.f32 %v2761_v3, %v8907_v63  ;;  %v3129_v49 = vpop.f32.mrb[18].mxu0  ;;  %v5876_v37 = vpop.f32.mrb[191].mxu1  ;;  %v8908_v15 = vld [vmem:[#allocation10_spill] sm:$0xff]  ;;  %v3685_v5 = vld [vmem:[#allocation2 + $0xf2] sm:$0xff] }
 0x377   : > { %v5976_v17 = vpop.f32.mrb[19].mxu0  ;;  %v3714_v63 = vpack.c.bf16 %v3686_v20, %v3685_v5 }
 0x378   : > { %v8240_v26 = vadd.f32 %v3129_v49, %v2895_v23  ;;  %6098 = vmatmul.mubr.bf16.gmra.mrb[40].mxu1 %v7975_v34  ;;  %v3688_v17 = vld [vmem:[#allocation2 + $0x10a] sm:$0xff] }
 0x379   : > { %6198 = vmatmul.mubr.bf16.gmra.mrb[124].mxu0 %v3713_v10  ;;  %6101 = vmatprep.mubr.msk.bf16.mxu1 %vm6816_vm0, %v8071_v41 }
 0x37a   : > { %6201 = vmatprep.mubr.msk.bf16.mxu0 %vm6816_vm0, %v8071_v41 }
 0x37b   : > { %v2766_v43 = vpop.f32.mrb[192].mxu1 }
 0x37c   : > { %v2896_v38 = vadd.f32 %v2766_v43, %v7972_v13  ;;  %v3134_v19 = vpop.f32.mrb[20].mxu0  ;;  %v5879_v45 = vpop.f32.mrb[193].mxu1 }
 0x37d   : > { %v5979_v30 = vpop.f32.mrb[21].mxu0  ;;  %v2769_v1 = vpop.f32.mrb[194].mxu1 }
 0x37e   : > { %v8248_v29 = vadd.f32 %v3134_v19, %v2896_v38  ;;  %v2897_v62 = vadd.f32 %v2769_v1, %v8908_v15  ;;  %v3137_v34 = vpop.f32.mrb[22].mxu0  ;;  %v5880_v12 = vpop.f32.mrb[195].mxu1  ;;  %v8909_v19 = vld [vmem:[#allocation11_spill] sm:$0xff] }
 0x37f   : > { %v5980_v3 = vpop.f32.mrb[23].mxu0  ;;  %v3687_v30 = vld [vmem:[#allocation2 + $0x102] sm:$0xff] }
 0x380   : > { %v8251_v23 = vadd.f32 %v3137_v34, %v2897_v62  ;;  %6102 = vmatmul.mubr.bf16.gmra.mrb[44].mxu1 %v7988_v21  ;;  %v3715_v15 = vpack.c.bf16 %v3688_v17, %v3687_v30  ;;  %v3690_v3 = vld [vmem:[#allocation2 + $0x11a] sm:$0xff] }
 0x381   : > { %6202 = vmatmul.mubr.bf16.gmra.mrb[128].mxu0 %v3714_v63  ;;  %6105 = vmatprep.mubr.msk.bf16.mxu1 %vm6816_vm0, %v8071_v41 }
 0x382   : > { %6205 = vmatprep.mubr.msk.bf16.mxu0 %vm6816_vm0, %v8071_v41 }
 0x383   : > { %v2774_v13 = vpop.f32.mrb[196].mxu1 }
 0x384   : > { %v2898_v49 = vadd.f32 %v2774_v13, %v7985_v22  ;;  %v3142_v37 = vpop.f32.mrb[24].mxu0  ;;  %v5883_v11 = vpop.f32.mrb[197].mxu1 }
 0x385   : > { %v5983_v10 = vpop.f32.mrb[25].mxu0  ;;  %v2777_v43 = vpop.f32.mrb[198].mxu1 }
 0x386   : > { %v8259_v38 = vadd.f32 %v3142_v37, %v2898_v49  ;;  %v2899_v45 = vadd.f32 %v2777_v43, %v8909_v19  ;;  %v3145_v21 = vpop.f32.mrb[26].mxu0  ;;  %v5884_v20 = vpop.f32.mrb[199].mxu1  ;;  %v8910_v37 = vld [vmem:[#allocation12_spill] sm:$0xff] }
 0x387   : > { %v5984_v1 = vpop.f32.mrb[27].mxu0  ;;  %v3689_v10 = vld [vmem:[#allocation2 + $0x112] sm:$0xff] }
 0x388   : > { %v8262_v62 = vadd.f32 %v3145_v21, %v2899_v45  ;;  %6106 = vmatmul.mubr.bf16.gmra.mrb[48].mxu1 %v8001_v9  ;;  %v3716_v19 = vpack.c.bf16 %v3690_v3, %v3689_v10  ;;  %v3692_v1 = vld [vmem:[#allocation2 + $0x12a] sm:$0xff] }
 0x389   : > { %6206 = vmatmul.mubr.bf16.gmra.mrb[132].mxu0 %v3715_v15  ;;  %6109 = vmatprep.mubr.msk.bf16.mxu1 %vm6816_vm0, %v8071_v41 }
 0x38a   : > { %6209 = vmatprep.mubr.msk.bf16.mxu0 %vm6816_vm0, %v8071_v41 }
 0x38b   : > { %v2782_v22 = vpop.f32.mrb[200].mxu1 }
 0x38c   : > { %v2900_v34 = vadd.f32 %v2782_v22, %v7998_v42  ;;  %v3150_v12 = vpop.f32.mrb[28].mxu0  ;;  %v5887_v5 = vpop.f32.mrb[201].mxu1 }
 0x38d   : > { %v5987_v63 = vpop.f32.mrb[29].mxu0  ;;  %v2785_v13 = vpop.f32.mrb[202].mxu1 }
 0x38e   : > { %v8270_v49 = vadd.f32 %v3150_v12, %v2900_v34  ;;  %v2901_v11 = vadd.f32 %v2785_v13, %v8910_v37  ;;  %v3153_v9 = vpop.f32.mrb[30].mxu0  ;;  %v5888_v17 = vpop.f32.mrb[203].mxu1  ;;  %v8911_v12 = vld [vmem:[#allocation13_spill] sm:$0xff]  ;;  %v3691_v63 = vld [vmem:[#allocation2 + $0x122] sm:$0xff] }
 0x38f   : > { %v5988_v43 = vpop.f32.mrb[31].mxu0  ;;  %v3717_v37 = vpack.c.bf16 %v3692_v1, %v3691_v63 }
 0x390   : > { %v8273_v45 = vadd.f32 %v3153_v9, %v2901_v11  ;;  %6110 = vmatmul.mubr.bf16.gmra.mrb[52].mxu1 %v8014_v16  ;;  %v3694_v43 = vld [vmem:[#allocation2 + $0x13a] sm:$0xff] }
 0x391   : > { %6210 = vmatmul.mubr.bf16.gmra.mrb[136].mxu0 %v3716_v19  ;;  %6113 = vmatprep.mubr.msk.bf16.mxu1 %vm6816_vm0, %v8071_v41 }
 0x392   : > { %6213 = vmatprep.mubr.msk.bf16.mxu0 %vm6816_vm0, %v8071_v41 }
 0x393   : > { %v2790_v42 = vpop.f32.mrb[204].mxu1 }
 0x394   : > { %v2902_v21 = vadd.f32 %v2790_v42, %v8011_v53  ;;  %v3158_v20 = vpop.f32.mrb[32].mxu0  ;;  %v5891_v30 = vpop.f32.mrb[205].mxu1 }
 0x395   : > { %v5991_v15 = vpop.f32.mrb[33].mxu0  ;;  %v2793_v22 = vpop.f32.mrb[206].mxu1 }
 0x396   : > { %v8281_v34 = vadd.f32 %v3158_v20, %v2902_v21  ;;  %v2903_v5 = vadd.f32 %v2793_v22, %v8911_v12  ;;  %v3161_v16 = vpop.f32.mrb[34].mxu0  ;;  %v5892_v3 = vpop.f32.mrb[207].mxu1  ;;  %v8912_v20 = vld [vmem:[#allocation14_spill] sm:$0xff]  ;;  %v3693_v15 = vld [vmem:[#allocation2 + $0x132] sm:$0xff] }
 0x397   : > { %v5992_v13 = vpop.f32.mrb[35].mxu0  ;;  %v3718_v12 = vpack.c.bf16 %v3694_v43, %v3693_v15 }
 0x398   : > { %v8284_v11 = vadd.f32 %v3161_v16, %v2903_v5  ;;  %6114 = vmatmul.mubr.bf16.gmra.mrb[56].mxu1 %v8027_v2  ;;  %v3696_v13 = vld [vmem:[#allocation2 + $0x14a] sm:$0xff] }
 0x399   : > { %6214 = vmatmul.mubr.bf16.gmra.mrb[140].mxu0 %v3717_v37  ;;  %6117 = vmatprep.mubr.msk.bf16.mxu1 %vm6816_vm0, %v8071_v41 }
 0x39a   : > { %6217 = vmatprep.mubr.msk.bf16.mxu0 %vm6816_vm0, %v8071_v41 }
 0x39b   : > { %v2798_v53 = vpop.f32.mrb[208].mxu1 }
 0x39c   : > { %v2904_v9 = vadd.f32 %v2798_v53, %v8024_v14  ;;  %v3166_v17 = vpop.f32.mrb[36].mxu0  ;;  %v5895_v10 = vpop.f32.mrb[209].mxu1 }
 0x39d   : > { %v5995_v19 = vpop.f32.mrb[37].mxu0  ;;  %v2801_v42 = vpop.f32.mrb[210].mxu1 }
 0x39e   : > { %v8292_v21 = vadd.f32 %v3166_v17, %v2904_v9  ;;  %v2905_v30 = vadd.f32 %v2801_v42, %v8912_v20  ;;  %v3169_v2 = vpop.f32.mrb[38].mxu0  ;;  %v5896_v1 = vpop.f32.mrb[211].mxu1  ;;  %v8913_v17 = vld [vmem:[#allocation15_spill] sm:$0xff] }
 0x39f   : > { %v5996_v22 = vpop.f32.mrb[39].mxu0  ;;  %v3695_v19 = vld [vmem:[#allocation2 + $0x142] sm:$0xff] }
 0x3a0   : > { %v8295_v5 = vadd.f32 %v3169_v2, %v2905_v30  ;;  %6118 = vmatmul.mubr.bf16.gmra.mrb[60].mxu1 %v8040_v58  ;;  %v3719_v20 = vpack.c.bf16 %v3696_v13, %v3695_v19  ;;  %v3698_v22 = vld [vmem:[#allocation2 + $0x15a] sm:$0xff]  ;;  %v3697_v13 = vld [vmem:[#allocation2 + $0x152] sm:$0xff] }
 0x3a1   : > { %6218 = vmatmul.mubr.bf16.gmra.mrb[144].mxu0 %v3718_v12  ;;  %6121 = vmatprep.mubr.msk.bf16.mxu1 %vm6816_vm0, %v8071_v41 }
 0x3a2   : > { %6221 = vmatprep.mubr.msk.bf16.mxu0 %vm6816_vm0, %v8071_v41 }
 0x3a3   : > { %v2806_v14 = vpop.f32.mrb[212].mxu1 }
 0x3a4   : > { %v2906_v16 = vadd.f32 %v2806_v14, %v8037_v44  ;;  %v3174_v3 = vpop.f32.mrb[40].mxu0  ;;  %v5899_v63 = vpop.f32.mrb[213].mxu1 }
 0x3a5   : > { %v5999_v37 = vpop.f32.mrb[41].mxu0  ;;  %v2809_v53 = vpop.f32.mrb[214].mxu1 }
 0x3a6   : > { %v8303_v9 = vadd.f32 %v3174_v3, %v2906_v16  ;;  %v2907_v10 = vadd.f32 %v2809_v53, %v8913_v17  ;;  %v3177_v58 = vpop.f32.mrb[42].mxu0  ;;  %v5900_v43 = vpop.f32.mrb[215].mxu1  ;;  %v3720_v53 = vpack.c.bf16 %v3698_v22, %v3697_v13 }
 0x3a7   : > { %v6000_v42 = vpop.f32.mrb[43].mxu0 }
 0x3a8   : > { %v8306_v30 = vadd.f32 %v3177_v58, %v2907_v10  ;;  %6122 = vmatmul.mubr.bf16.gmra.mrb[64].mxu1 %v8053_v31  ;;  %v3331_v10 = vld [vmem:[#allocation2 + $0x161] sm:$0xff]  ;;  %v3332_v58 = vld [vmem:[#allocation2 + $0x169] sm:$0xff] }
 0x3a9   : > { %6222 = vmatmul.mubr.bf16.gmra.mrb[148].mxu0 %v3719_v20  ;;  %6125 = vmatprep.mubr.msk.bf16.mxu1 %vm6816_vm0, %v8071_v41  ;;  %v3699_v42 = vld [vmem:[#allocation2 + $0x162] sm:$0xff]  ;;  %v3700_v20 = vld [vmem:[#allocation2 + $0x16a] sm:$0xff] }
 0x3aa   : > { %6225 = vmatprep.mubr.msk.bf16.mxu0 %vm6816_vm0, %v8071_v41 }
 0x3ab   : > { %v2814_v44 = vpop.f32.mrb[216].mxu1 }
 0x3ac   : > { %v2908_v2 = vadd.f32 %v2814_v44, %v8050_v35  ;;  %v3182_v1 = vpop.f32.mrb[44].mxu0  ;;  %v5903_v15 = vpop.f32.mrb[217].mxu1 }
 0x3ad   : > { %v6003_v12 = vpop.f32.mrb[45].mxu0  ;;  %v2817_v14 = vpop.f32.mrb[218].mxu1 }
 0x3ae   : > { %v8314_v16 = vadd.f32 %v3182_v1, %v2908_v2  ;;  %v2909_v3 = vadd.f32 %v2817_v14, %v8055_v18  ;;  %v3185_v31 = vpop.f32.mrb[46].mxu0  ;;  %v5904_v63 = vpop.f32.mrb[219].mxu1  ;;  %v3353_v12 = vpack.c.bf16 %v3332_v58, %v3331_v10 }
 0x3af   : > { %v6004_v37 = vpop.f32.mrb[47].mxu0  ;;  %v3701_v63 = vld [vmem:[#allocation2 + $0x172] sm:$0xf] }
 0x3b0   : > { %v8317_v17 = vadd.f32 %v3185_v31, %v2909_v3  ;;  %6126 = vmatmul.mubr.bf16.gmra.mrb[68].mxu1 %v8066_v28  ;;  %v3721_v3 = vpack.c.bf16 %v3700_v20, %v3699_v42 }
 0x3b1   : > { %6226 = vmatmul.mubr.bf16.gmra.mrb[152].mxu0 %v3720_v53  ;;  %6129 = vmatprep.mubr.msk.bf16.mxu1 %vm6816_vm0, %v8071_v41 }
 0x3b2   : > { %6229 = vmatprep.mubr.msk.bf16.mxu0 %vm6816_vm0, %v8071_v41 }
 0x3b3   : > { %v2822_v35 = vpop.f32.mrb[220].mxu1 }
 0x3b4   : > { %v2910_v18 = vadd.f32 %v2822_v35, %v8063_v52  ;;  %v3190_v43 = vpop.f32.mrb[48].mxu0  ;;  %v5907_v19 = vpop.f32.mrb[221].mxu1  ;;  %v3333_v52 = vld [vmem:[#allocation2 + $0x171] sm:$0xf] }
 0x3b5   : > { %v6007_v44 = vpop.f32.mrb[49].mxu0  ;;  %v2825_v2 = vpop.f32.mrb[222].mxu1  ;;  %v3354_v35 = vpack.c.bf16 %v3333_v52, %v3333_v52 }
 0x3b6   : > { %v8325_v1 = vadd.f32 %v3190_v43, %v2910_v18  ;;  %v2911_v28 = vadd.f32 %v2825_v2, %v8068_v7  ;;  %v3193_v15 = vpop.f32.mrb[50].mxu0  ;;  %v5908_v22 = vpop.f32.mrb[223].mxu1  ;;  %v3722_v18 = vpack.c.bf16 %v3701_v63, %v3701_v63 }
 0x3b7   : > { %v6008_v14 = vpop.f32.mrb[51].mxu0 }
 0x3b8   : > { %v8328_v31 = vadd.f32 %v3193_v15, %v2911_v28  ;;  %6130 = vmatmul.mubr.bf16.gmra.mrb[72].mxu1 %v3353_v12  ;;  %v4029_v14 = vld [vmem:[#allocation2 + $0x33] sm:$0xff] }
 0x3b9   : > { %6230 = vmatmul.mubr.bf16.gmra.mrb[156].mxu0 %v3721_v3  ;;  %6133 = vmatprep.mubr.msk.bf16.mxu1 %vm6816_vm0, %v8071_v41 }
 0x3ba   : > { %6233 = vmatprep.mubr.msk.bf16.mxu0 %vm6816_vm0, %v8071_v41 }
 0x3bb   : > { %v2830_v13 = vpop.f32.mrb[224].mxu1 }
 0x3bc   : > { %v2912_v7 = vadd.f32 %v2830_v13, %v8078_v6  ;;  %v3198_v37 = vpop.f32.mrb[52].mxu0  ;;  %v5911_v53 = vpop.f32.mrb[225].mxu1  ;;  %v4030_v6 = vld [vmem:[#allocation2 + $0x3b] sm:$0xff] }
 0x3bd   : > { %v6011_v10 = vpop.f32.mrb[53].mxu0  ;;  %v2833_v58 = vpop.f32.mrb[226].mxu1 }
 0x3be   : > { %v8335_v43 = vadd.f32 %v3198_v37, %v2912_v7  ;;  %v2913_v19 = vadd.f32 %v2833_v58, %v8081_v39  ;;  %v3201_v42 = vpop.f32.mrb[54].mxu0  ;;  %v5912_v20 = vpop.f32.mrb[227].mxu1  ;;  %v4070_v37 = vpack.c.bf16 %v4030_v6, %v4029_v14  ;;  %v4032_v10 = vld [vmem:[#allocation2 + $0x4b] sm:$0xff] }
 0x3bf   : > { %v6012_v44 = vpop.f32.mrb[55].mxu0 }
 0x3c0   : > { %v8338_v2 = vadd.f32 %v3201_v42, %v2913_v19  ;;  %6134 = vmatmul.mubr.bf16.gmra.mrb[76].mxu1 %v3354_v35  ;;  %v4031_v44 = vld [vmem:[#allocation2 + $0x43] sm:$0xff] }
 0x3c1   : > { %6234 = vmatmul.mubr.bf16.gmra.mrb[160].mxu0 %v3722_v18  ;;  %6253 = vmatprep.mubr.msk.bf16.mxu1 %vm6816_vm0, %v8071_v41 }
 0x3c3   : > { %v2838_v28 = vpop.f32.mrb[228].mxu1 }
 0x3c4   : > { %v2914_v15 = vadd.f32 %v2838_v28, %v8091_v8  ;;  %v3206_v22 = vpop.f32.mrb[56].mxu0  ;;  %v5915_v12 = vpop.f32.mrb[229].mxu1 }
 0x3c5   : > { %v6015_v3 = vpop.f32.mrb[57].mxu0  ;;  %v2841_v52 = vpop.f32.mrb[230].mxu1 }
 0x3c6   : > { %v8343_v39 = vadd.f32 %v3206_v22, %v2914_v15  ;;  %v2915_v63 = vadd.f32 %v2841_v52, %v8094_v33  ;;  %v3209_v13 = vpop.f32.mrb[58].mxu0  ;;  %v5916_v7 = vpop.f32.mrb[231].mxu1  ;;  %v4071_v22 = vpack.c.bf16 %v4032_v10, %v4031_v44  ;;  %v4034_v3 = vld [vmem:[#allocation2 + $0x5b] sm:$0xff] }
 0x3c7   : > { %v6016_v53 = vpop.f32.mrb[59].mxu0 }
 0x3c8   : > { %v8346_v35 = vadd.f32 %v3209_v13, %v2915_v63  ;;  %6254 = vmatmul.mubr.bf16.vlgmr.msra.gmra.mrb[80].mxu1 %v4070_v37  ;;  %v4033_v53 = vld [vmem:[#allocation2 + $0x53] sm:$0xff] }
 0x3c9   : > { %6257 = vmatprep.mubr.msk.bf16.mxu1 %vm6816_vm0, %v8071_v41 }
 0x3cb   : > { %v2846_v8 = vpop.f32.mrb[232].mxu1 }
 0x3cc   : > { %v2916_v58 = vadd.f32 %v2846_v8, %v8106_v55  ;;  %v3214_v18 = vpop.f32.mrb[60].mxu0  ;;  %v5919_v19 = vpop.f32.mrb[233].mxu1 }
 0x3cd   : > { %v6019_v42 = vpop.f32.mrb[61].mxu0  ;;  %v2849_v20 = vpop.f32.mrb[234].mxu1 }
 0x3ce   : > { %v8351_v33 = vadd.f32 %v3214_v18, %v2916_v58  ;;  %v2917_v6 = vadd.f32 %v2849_v20, %v8113_v60  ;;  %v3217_v28 = vpop.f32.mrb[62].mxu0  ;;  %v5920_v15 = vpop.f32.mrb[235].mxu1  ;;  %v4072_v18 = vpack.c.bf16 %v4034_v3, %v4033_v53  ;;  %v4036_v20 = vld [vmem:[#allocation2 + $0x6b] sm:$0xff] }
 0x3cf   : > { %v6020_v12 = vpop.f32.mrb[63].mxu0 }
 0x3d0   : > { %v8354_v14 = vadd.f32 %v3217_v28, %v2917_v6  ;;  %6258 = vmatmul.mubr.bf16.gmra.mrb[84].mxu1 %v4071_v22  ;;  %v4035_v12 = vld [vmem:[#allocation2 + $0x63] sm:$0xff] }
 0x3d1   : > { %6261 = vmatprep.mubr.msk.bf16.mxu1 %vm6816_vm0, %v8071_v41 }
 0x3d3   : > { %v2854_v55 = vpop.f32.mrb[236].mxu1 }
 0x3d4   : > { %v2918_v52 = vadd.f32 %v2854_v55, %v8125_v50  ;;  %v3222_v63 = vpop.f32.mrb[64].mxu0  ;;  %v5923_v13 = vpop.f32.mrb[237].mxu1 }
 0x3d5   : > { %v6023_v7 = vpop.f32.mrb[65].mxu0  ;;  %v2857_v37 = vpop.f32.mrb[238].mxu1 }
 0x3d6   : > { %v8359_v60 = vadd.f32 %v3222_v63, %v2918_v52  ;;  %v2919_v8 = vadd.f32 %v2857_v37, %v8132_v0  ;;  %v3225_v10 = vpop.f32.mrb[66].mxu0  ;;  %v5924_v58 = vpop.f32.mrb[239].mxu1  ;;  %v4073_v63 = vpack.c.bf16 %v4036_v20, %v4035_v12  ;;  %v4038_v37 = vld [vmem:[#allocation2 + $0x7b] sm:$0xff] }
 0x3d7   : > { %v6024_v19 = vpop.f32.mrb[67].mxu0 }
 0x3d8   : > { %v8362_v42 = vadd.f32 %v3225_v10, %v2919_v8  ;;  %6262 = vmatmul.mubr.bf16.gmra.mrb[88].mxu1 %v4072_v18  ;;  %v4037_v18 = vld [vmem:[#allocation2 + $0x73] sm:$0xff] }
 0x3d9   : > { %6265 = vmatprep.mubr.msk.bf16.mxu1 %vm6816_vm0, %v8071_v41  ;;  %v8372_v41 = vld [vmem:[#allocation2] sm:$0xff] }
 0x3db   : > { %v2862_v50 = vpop.f32.mrb[240].mxu1 }
 0x3dc   : > { %v2920_v44 = vadd.f32 %v2862_v50, %v8144_v27  ;;  %v3230_v6 = vpop.f32.mrb[68].mxu0  ;;  %v5927_v28 = vpop.f32.mrb[241].mxu1 }
 0x3dd   : > { %v6027_v15 = vpop.f32.mrb[69].mxu0  ;;  %v2865_v22 = vpop.f32.mrb[242].mxu1 }
 0x3de   : > { %v8367_v0 = vadd.f32 %v3230_v6, %v2920_v44  ;;  %v2921_v55 = vadd.f32 %v2865_v22, %v8151_v48  ;;  %v3233_v3 = vpop.f32.mrb[70].mxu0  ;;  %v5928_v52 = vpop.f32.mrb[243].mxu1  ;;  %v4074_v6 = vpack.c.bf16 %v4038_v37, %v4037_v18  ;;  %v4040_v22 = vld [vmem:[#allocation2 + $0x8b] sm:$0xff] }
 0x3df   : > { %v6028_v13 = vpop.f32.mrb[71].mxu0 }
 0x3e0   : > { %v8370_v7 = vadd.f32 %v3233_v3, %v2921_v55  ;;  %6266 = vmatmul.mubr.bf16.gmra.mrb[92].mxu1 %v4073_v63  ;;  %v4039_v13 = vld [vmem:[#allocation2 + $0x83] sm:$0xff] }
 0x3e1   : > { %6269 = vmatprep.mubr.msk.bf16.mxu1 %vm6816_vm0, %v8372_v41 }
 0x3e3   : > { %v2870_v27 = vpop.f32.mrb[244].mxu1 }
 0x3e4   : > { %v2922_v53 = vadd.f32 %v2870_v27, %v8163_v32  ;;  %v3238_v8 = vpop.f32.mrb[72].mxu0  ;;  %v5931_v10 = vpop.f32.mrb[245].mxu1 }
 0x3e5   : > { %v6031_v58 = vpop.f32.mrb[73].mxu0  ;;  %v2873_v48 = vpop.f32.mrb[246].mxu1 }
 0x3e6   : > { %v8377_v19 = vadd.f32 %v3238_v8, %v2922_v53  ;;  %v2923_v50 = vadd.f32 %v2873_v48, %v8166_v61  ;;  %v3241_v20 = vpop.f32.mrb[74].mxu0  ;;  %v5932_v44 = vpop.f32.mrb[247].mxu1  ;;  %v4075_v53 = vpack.c.bf16 %v4040_v22, %v4039_v13  ;;  %v4042_v58 = vld [vmem:[#allocation2 + $0x9b] sm:$0xff] }
 0x3e7   : > { %v6032_v28 = vpop.f32.mrb[75].mxu0  ;;  %v4041_v44 = vld [vmem:[#allocation2 + $0x93] sm:$0xff] }
 0x3e8   : > { %v8380_v15 = vadd.f32 %v3241_v20, %v2923_v50  ;;  %6270 = vmatmul.mubr.bf16.gmra.mrb[96].mxu1 %v4074_v6 }
 0x3e9   : > { %6273 = vmatprep.mubr.msk.bf16.mxu1 %vm6816_vm0, %v8372_v41 }
 0x3eb   : > { %v2878_v32 = vpop.f32.mrb[248].mxu1 }
 0x3ec   : > { %v2924_v12 = vadd.f32 %v2878_v32, %v8174_v47  ;;  %v3246_v55 = vpop.f32.mrb[76].mxu0  ;;  %v5935_v3 = vpop.f32.mrb[249].mxu1 }
 0x3ed   : > { %v6035_v52 = vpop.f32.mrb[77].mxu0  ;;  %v2881_v63 = vpop.f32.mrb[250].mxu1 }
 0x3ee   : > { %v8385_v61 = vadd.f32 %v3246_v55, %v2924_v12  ;;  %v3249_v27 = vpop.f32.mrb[78].mxu0  ;;  %v5936_v37 = vpop.f32.mrb[251].mxu1  ;;  %v4076_v12 = vpack.c.bf16 %v4042_v58, %v4041_v44  ;;  %v4044_v52 = vld [vmem:[#allocation2 + $0xab] sm:$0xff] }
 0x3ef   : > { %v6036_v8 = vpop.f32.mrb[79].mxu0 }
 0x3f0   : > { %6274 = vmatmul.mubr.bf16.gmra.mrb[100].mxu1 %v4075_v53  ;;  %v4043_v8 = vld [vmem:[#allocation2 + $0xa3] sm:$0xff] }
 0x3f1   : > { %6277 = vmatprep.mubr.msk.bf16.mxu1 %vm6816_vm0, %v8372_v41 }
 0x3f3   : > { %v3454_v10 = vpop.f32.mrb[252].mxu1 }
 0x3f4   : > { %v3620_v48 = vadd.f32 %v3454_v10, %v8182_v36  ;;  %v3822_v47 = vpop.f32.mrb[80].mxu0  ;;  %v6055_v18 = vpop.f32.mrb[253].mxu1 }
 0x3f5   : > { %v6155_v50 = vpop.f32.mrb[81].mxu0  ;;  %v3457_v20 = vpop.f32.mrb[254].mxu1 }
 0x3f6   : > { %v8390_v6 = vadd.f32 %v3822_v47, %v3620_v48  ;;  %v3621_v28 = vadd.f32 %v3457_v20, %v8185_v4  ;;  %v3825_v32 = vpop.f32.mrb[82].mxu0  ;;  %v6056_v22 = vpop.f32.mrb[255].mxu1  ;;  %v4077_v47 = vpack.c.bf16 %v4044_v52, %v4043_v8  ;;  %v4046_v20 = vld [vmem:[#allocation2 + $0xbb] sm:$0xff] }
 0x3f7   : > { %v6156_v55 = vpop.f32.mrb[83].mxu0 }
 0x3f8   : > { %v8393_v3 = vadd.f32 %v3825_v32, %v3621_v28  ;;  %6278 = vmatmul.mubr.bf16.gmra.mrb[104].mxu1 %v4076_v12  ;;  %v4045_v55 = vld [vmem:[#allocation2 + $0xb3] sm:$0xff] }
 0x3f9   : > { %6281 = vmatprep.mubr.msk.bf16.mxu1 %vm6816_vm0, %v8372_v41 }
 0x3fb   : > { %v3462_v36 = vpop.f32.mrb[0].mxu1 }
 0x3fc   : > { %v3622_v63 = vadd.f32 %v3462_v36, %v8193_v46  ;;  %v3830_v13 = vpop.f32.mrb[84].mxu0  ;;  %v6059_v27 = vpop.f32.mrb[1].mxu1 }
 0x3fd   : > { %v6159_v37 = vpop.f32.mrb[85].mxu0  ;;  %v3465_v53 = vpop.f32.mrb[2].mxu1 }
 0x3fe   : > { %v8398_v4 = vadd.f32 %v3830_v13, %v3622_v63  ;;  %v3623_v10 = vadd.f32 %v3465_v53, %v8196_v59  ;;  %v3833_v58 = vpop.f32.mrb[86].mxu0  ;;  %v6060_v48 = vpop.f32.mrb[3].mxu1  ;;  %v4078_v13 = vpack.c.bf16 %v4046_v20, %v4045_v55  ;;  %v4048_v53 = vld [vmem:[#allocation2 + $0xcb] sm:$0xff] }
 0x3ff   : > { %v6160_v18 = vpop.f32.mrb[87].mxu0 }
 0x400   : > { %v8401_v50 = vadd.f32 %v3833_v58, %v3623_v10  ;;  %6282 = vmatmul.mubr.bf16.gmra.mrb[108].mxu1 %v4077_v47  ;;  %v4047_v18 = vld [vmem:[#allocation2 + $0xc3] sm:$0xff] }
 0x401   : > { %6285 = vmatprep.mubr.msk.bf16.mxu1 %vm6816_vm0, %v8372_v41 }
 0x403   : > { %v3470_v46 = vpop.f32.mrb[4].mxu1 }
 0x404   : > { %v3624_v44 = vadd.f32 %v3470_v46, %v8204_v24  ;;  %v3838_v28 = vpop.f32.mrb[88].mxu0  ;;  %v6063_v32 = vpop.f32.mrb[5].mxu1 }
 0x405   : > { %v6163_v22 = vpop.f32.mrb[89].mxu0  ;;  %v3473_v12 = vpop.f32.mrb[6].mxu1 }
 0x406   : > { %v8406_v59 = vadd.f32 %v3838_v28, %v3624_v44  ;;  %v3625_v36 = vadd.f32 %v3473_v12, %v8207_v57  ;;  %v3841_v52 = vpop.f32.mrb[90].mxu0  ;;  %v6064_v63 = vpop.f32.mrb[7].mxu1  ;;  %v4079_v28 = vpack.c.bf16 %v4048_v53, %v4047_v18  ;;  %v4050_v12 = vld [vmem:[#allocation2 + $0xdb] sm:$0xff] }
 0x407   : > { %v6164_v27 = vpop.f32.mrb[91].mxu0 }
 0x408   : > { %v8409_v37 = vadd.f32 %v3841_v52, %v3625_v36  ;;  %6286 = vmatmul.mubr.bf16.gmra.mrb[112].mxu1 %v4078_v13  ;;  %v4049_v27 = vld [vmem:[#allocation2 + $0xd3] sm:$0xff] }
 0x409   : > { %6289 = vmatprep.mubr.msk.bf16.mxu1 %vm6816_vm0, %v8372_v41 }
 0x40b   : > { %v3478_v24 = vpop.f32.mrb[8].mxu1 }
 0x40c   : > { %v3626_v8 = vadd.f32 %v3478_v24, %v8215_v54  ;;  %v3846_v10 = vpop.f32.mrb[92].mxu0  ;;  %v6067_v58 = vpop.f32.mrb[9].mxu1 }
 0x40d   : > { %v6167_v48 = vpop.f32.mrb[93].mxu0  ;;  %v3481_v47 = vpop.f32.mrb[10].mxu1 }
 0x40e   : > { %v8414_v57 = vadd.f32 %v3846_v10, %v3626_v8  ;;  %v3627_v46 = vadd.f32 %v3481_v47, %v8218_v56  ;;  %v3849_v20 = vpop.f32.mrb[94].mxu0  ;;  %v6068_v44 = vpop.f32.mrb[11].mxu1  ;;  %v4080_v10 = vpack.c.bf16 %v4050_v12, %v4049_v27  ;;  %v4052_v47 = vld [vmem:[#allocation2 + $0xeb] sm:$0xff] }
 0x40f   : > { %v6168_v32 = vpop.f32.mrb[95].mxu0 }
 0x410   : > { %v8417_v22 = vadd.f32 %v3849_v20, %v3627_v46  ;;  %6290 = vmatmul.mubr.bf16.gmra.mrb[116].mxu1 %v4079_v28  ;;  %v4051_v32 = vld [vmem:[#allocation2 + $0xe3] sm:$0xff] }
 0x411   : > { %6293 = vmatprep.mubr.msk.bf16.mxu1 %vm6816_vm0, %v8372_v41 }
 0x413   : > { %v3486_v54 = vpop.f32.mrb[12].mxu1 }
 0x414   : > { %v3628_v55 = vadd.f32 %v3486_v54, %v8226_v51  ;;  %v3854_v36 = vpop.f32.mrb[96].mxu0  ;;  %v6071_v52 = vpop.f32.mrb[13].mxu1 }
 0x415   : > { %v6171_v63 = vpop.f32.mrb[97].mxu0  ;;  %v3489_v13 = vpop.f32.mrb[14].mxu1 }
 0x416   : > { %v8422_v56 = vadd.f32 %v3854_v36, %v3628_v55  ;;  %v3629_v24 = vadd.f32 %v3489_v13, %v8229_v25  ;;  %v3857_v53 = vpop.f32.mrb[98].mxu0  ;;  %v6072_v8 = vpop.f32.mrb[15].mxu1  ;;  %v4081_v36 = vpack.c.bf16 %v4052_v47, %v4051_v32  ;;  %v4054_v13 = vld [vmem:[#allocation2 + $0xfb] sm:$0xff] }
 0x417   : > { %v6172_v58 = vpop.f32.mrb[99].mxu0 }
 0x418   : > { %v8425_v48 = vadd.f32 %v3857_v53, %v3629_v24  ;;  %6294 = vmatmul.mubr.bf16.gmra.mrb[120].mxu1 %v4080_v10  ;;  %v4053_v58 = vld [vmem:[#allocation2 + $0xf3] sm:$0xff] }
 0x419   : > { %6297 = vmatprep.mubr.msk.bf16.mxu1 %vm6816_vm0, %v8372_v41 }
 0x41b   : > { %v3494_v51 = vpop.f32.mrb[16].mxu1 }
 0x41c   : > { %v3630_v18 = vadd.f32 %v3494_v51, %v8237_v40  ;;  %v3862_v46 = vpop.f32.mrb[100].mxu0  ;;  %v6075_v20 = vpop.f32.mrb[17].mxu1 }
 0x41d   : > { %v6175_v44 = vpop.f32.mrb[101].mxu0  ;;  %v3497_v28 = vpop.f32.mrb[18].mxu1 }
 0x41e   : > { %v8430_v25 = vadd.f32 %v3862_v46, %v3630_v18  ;;  %v3631_v54 = vadd.f32 %v3497_v28, %v8240_v26  ;;  %v3865_v12 = vpop.f32.mrb[102].mxu0  ;;  %v6076_v55 = vpop.f32.mrb[19].mxu1  ;;  %v4082_v46 = vpack.c.bf16 %v4054_v13, %v4053_v58  ;;  %v4056_v28 = vld [vmem:[#allocation2 + $0x10b] sm:$0xff] }
 0x41f   : > { %v6176_v52 = vpop.f32.mrb[103].mxu0 }
 0x420   : > { %v8433_v63 = vadd.f32 %v3865_v12, %v3631_v54  ;;  %6298 = vmatmul.mubr.bf16.gmra.mrb[124].mxu1 %v4081_v36  ;;  %v4055_v52 = vld [vmem:[#allocation2 + $0x103] sm:$0xff] }
 0x421   : > { %6301 = vmatprep.mubr.msk.bf16.mxu1 %vm6816_vm0, %v8372_v41 }
 0x423   : > { %v3502_v40 = vpop.f32.mrb[20].mxu1 }
 0x424   : > { %v3632_v27 = vadd.f32 %v3502_v40, %v8248_v29  ;;  %v3870_v24 = vpop.f32.mrb[104].mxu0  ;;  %v6079_v53 = vpop.f32.mrb[21].mxu1 }
 0x425   : > { %v6179_v8 = vpop.f32.mrb[105].mxu0  ;;  %v3505_v10 = vpop.f32.mrb[22].mxu1 }
 0x426   : > { %v8438_v26 = vadd.f32 %v3870_v24, %v3632_v27  ;;  %v3633_v51 = vadd.f32 %v3505_v10, %v8251_v23  ;;  %v3873_v47 = vpop.f32.mrb[106].mxu0  ;;  %v6080_v18 = vpop.f32.mrb[23].mxu1  ;;  %v4083_v24 = vpack.c.bf16 %v4056_v28, %v4055_v52  ;;  %v4058_v10 = vld [vmem:[#allocation2 + $0x11b] sm:$0xff] }
 0x427   : > { %v6180_v20 = vpop.f32.mrb[107].mxu0 }
 0x428   : > { %v8441_v44 = vadd.f32 %v3873_v47, %v3633_v51  ;;  %6302 = vmatmul.mubr.bf16.gmra.mrb[128].mxu1 %v4082_v46  ;;  %v4057_v20 = vld [vmem:[#allocation2 + $0x113] sm:$0xff] }
 0x429   : > { %6305 = vmatprep.mubr.msk.bf16.mxu1 %vm6816_vm0, %v8372_v41 }
 0x42b   : > { %v3510_v29 = vpop.f32.mrb[24].mxu1 }
 0x42c   : > { %v3634_v32 = vadd.f32 %v3510_v29, %v8259_v38  ;;  %v3878_v54 = vpop.f32.mrb[108].mxu0  ;;  %v6083_v12 = vpop.f32.mrb[25].mxu1 }
 0x42d   : > { %v6183_v55 = vpop.f32.mrb[109].mxu0  ;;  %v3513_v36 = vpop.f32.mrb[26].mxu1 }
 0x42e   : > { %v8446_v23 = vadd.f32 %v3878_v54, %v3634_v32  ;;  %v3635_v40 = vadd.f32 %v3513_v36, %v8262_v62  ;;  %v3881_v13 = vpop.f32.mrb[110].mxu0  ;;  %v6084_v27 = vpop.f32.mrb[27].mxu1  ;;  %v4084_v54 = vpack.c.bf16 %v4058_v10, %v4057_v20  ;;  %v4060_v36 = vld [vmem:[#allocation2 + $0x12b] sm:$0xff] }
 0x42f   : > { %v6184_v53 = vpop.f32.mrb[111].mxu0 }
 0x430   : > { %v8449_v8 = vadd.f32 %v3881_v13, %v3635_v40  ;;  %6306 = vmatmul.mubr.bf16.gmra.mrb[132].mxu1 %v4083_v24  ;;  %v4059_v53 = vld [vmem:[#allocation2 + $0x123] sm:$0xff] }
 0x431   : > { %6309 = vmatprep.mubr.msk.bf16.mxu1 %vm6816_vm0, %v8372_v41 }
 0x433   : > { %v3518_v38 = vpop.f32.mrb[28].mxu1 }
 0x434   : > { %v3636_v58 = vadd.f32 %v3518_v38, %v8270_v49  ;;  %v3886_v51 = vpop.f32.mrb[112].mxu0  ;;  %v6087_v47 = vpop.f32.mrb[29].mxu1 }
 0x435   : > { %v6187_v18 = vpop.f32.mrb[113].mxu0  ;;  %v3521_v46 = vpop.f32.mrb[30].mxu1 }
 0x436   : > { %v8454_v62 = vadd.f32 %v3886_v51, %v3636_v58  ;;  %v3637_v29 = vadd.f32 %v3521_v46, %v8273_v45  ;;  %v3889_v28 = vpop.f32.mrb[114].mxu0  ;;  %v6088_v32 = vpop.f32.mrb[31].mxu1  ;;  %v4085_v51 = vpack.c.bf16 %v4060_v36, %v4059_v53  ;;  %v4062_v46 = vld [vmem:[#allocation2 + $0x13b] sm:$0xff] }
 0x437   : > { %v6188_v12 = vpop.f32.mrb[115].mxu0 }
 0x438   : > { %v8457_v55 = vadd.f32 %v3889_v28, %v3637_v29  ;;  %6310 = vmatmul.mubr.bf16.gmra.mrb[136].mxu1 %v4084_v54  ;;  %v4061_v12 = vld [vmem:[#allocation2 + $0x133] sm:$0xff] }
 0x439   : > { %6313 = vmatprep.mubr.msk.bf16.mxu1 %vm6816_vm0, %v8372_v41 }
 0x43b   : > { %v3526_v49 = vpop.f32.mrb[32].mxu1 }
 0x43c   : > { %v3638_v52 = vadd.f32 %v3526_v49, %v8281_v34  ;;  %v3894_v40 = vpop.f32.mrb[116].mxu0  ;;  %v6091_v13 = vpop.f32.mrb[33].mxu1 }
 0x43d   : > { %v6191_v27 = vpop.f32.mrb[117].mxu0  ;;  %v3529_v24 = vpop.f32.mrb[34].mxu1 }
 0x43e   : > { %v8462_v45 = vadd.f32 %v3894_v40, %v3638_v52  ;;  %v3639_v38 = vadd.f32 %v3529_v24, %v8284_v11  ;;  %v3897_v10 = vpop.f32.mrb[118].mxu0  ;;  %v6092_v58 = vpop.f32.mrb[35].mxu1  ;;  %v4086_v40 = vpack.c.bf16 %v4062_v46, %v4061_v12  ;;  %v4064_v24 = vld [vmem:[#allocation2 + $0x14b] sm:$0xff] }
 0x43f   : > { %v6192_v47 = vpop.f32.mrb[119].mxu0 }
 0x440   : > { %v8465_v18 = vadd.f32 %v3897_v10, %v3639_v38  ;;  %6314 = vmatmul.mubr.bf16.gmra.mrb[140].mxu1 %v4085_v51  ;;  %v4063_v47 = vld [vmem:[#allocation2 + $0x143] sm:$0xff] }
 0x441   : > { %6317 = vmatprep.mubr.msk.bf16.mxu1 %vm6816_vm0, %v8372_v41 }
 0x443   : > { %v3534_v34 = vpop.f32.mrb[36].mxu1 }
 0x444   : > { %v3640_v20 = vadd.f32 %v3534_v34, %v8292_v21  ;;  %v3902_v29 = vpop.f32.mrb[120].mxu0  ;;  %v6095_v28 = vpop.f32.mrb[37].mxu1 }
 0x445   : > { %v6195_v32 = vpop.f32.mrb[121].mxu0  ;;  %v3537_v54 = vpop.f32.mrb[38].mxu1 }
 0x446   : > { %v8470_v11 = vadd.f32 %v3902_v29, %v3640_v20  ;;  %v3641_v49 = vadd.f32 %v3537_v54, %v8295_v5  ;;  %v3905_v36 = vpop.f32.mrb[122].mxu0  ;;  %v6096_v52 = vpop.f32.mrb[39].mxu1  ;;  %v4087_v29 = vpack.c.bf16 %v4064_v24, %v4063_v47  ;;  %v4066_v54 = vld [vmem:[#allocation2 + $0x15b] sm:$0xff]  ;;  %v4068_v47 = vld [vmem:[#allocation2 + $0x16b] sm:$0xff] }
 0x447   : > { %v6196_v13 = vpop.f32.mrb[123].mxu0 }
 0x448   : > { %v8473_v27 = vadd.f32 %v3905_v36, %v3641_v49  ;;  %6318 = vmatmul.mubr.bf16.gmra.mrb[144].mxu1 %v4086_v40  ;;  %v4065_v13 = vld [vmem:[#allocation2 + $0x153] sm:$0xff] }
 0x449   : > { %6321 = vmatprep.mubr.msk.bf16.mxu1 %vm6816_vm0, %v8372_v41 }
 0x44b   : > { %v3542_v21 = vpop.f32.mrb[40].mxu1 }
 0x44c   : > { %v3642_v53 = vadd.f32 %v3542_v21, %v8303_v9  ;;  %v3910_v38 = vpop.f32.mrb[124].mxu0  ;;  %v6099_v10 = vpop.f32.mrb[41].mxu1 }
 0x44d   : > { %v6199_v58 = vpop.f32.mrb[125].mxu0  ;;  %v3545_v51 = vpop.f32.mrb[42].mxu1 }
 0x44e   : > { %v8478_v5 = vadd.f32 %v3910_v38, %v3642_v53  ;;  %v3643_v34 = vadd.f32 %v3545_v51, %v8306_v30  ;;  %v3913_v46 = vpop.f32.mrb[126].mxu0  ;;  %v6100_v20 = vpop.f32.mrb[43].mxu1  ;;  %v4088_v38 = vpack.c.bf16 %v4066_v54, %v4065_v13  ;;  %v4067_v51 = vld [vmem:[#allocation2 + $0x163] sm:$0xff] }
 0x44f   : > { %v6200_v28 = vpop.f32.mrb[127].mxu0 }
 0x450   : > { %v8481_v32 = vadd.f32 %v3913_v46, %v3643_v34  ;;  %6322 = vmatmul.mubr.bf16.gmra.mrb[148].mxu1 %v4087_v29 }
 0x451   : > { %6325 = vmatprep.mubr.msk.bf16.mxu1 %vm6816_vm0, %v8372_v41 }
 0x453   : > { %v3550_v9 = vpop.f32.mrb[44].mxu1 }
 0x454   : > { %v3644_v12 = vadd.f32 %v3550_v9, %v8314_v16  ;;  %v3918_v49 = vpop.f32.mrb[128].mxu0  ;;  %v6103_v36 = vpop.f32.mrb[45].mxu1 }
 0x455   : > { %v6203_v52 = vpop.f32.mrb[129].mxu0  ;;  %v3553_v40 = vpop.f32.mrb[46].mxu1 }
 0x456   : > { %v8486_v30 = vadd.f32 %v3918_v49, %v3644_v12  ;;  %v3645_v21 = vadd.f32 %v3553_v40, %v8317_v17  ;;  %v3921_v24 = vpop.f32.mrb[130].mxu0  ;;  %v6104_v53 = vpop.f32.mrb[47].mxu1  ;;  %v4089_v49 = vpack.c.bf16 %v4068_v47, %v4067_v51  ;;  %v4069_v40 = vld [vmem:[#allocation2 + $0x173] sm:$0xf] }
 0x457   : > { %v6204_v10 = vpop.f32.mrb[131].mxu0  ;;  %v4090_v53 = vpack.c.bf16 %v4069_v40, %v4069_v40 }
 0x458   : > { %v8489_v58 = vadd.f32 %v3921_v24, %v3645_v21  ;;  %6326 = vmatmul.mubr.bf16.gmra.mrb[152].mxu1 %v4088_v38 }
 0x459   : > { %6329 = vmatprep.mubr.msk.bf16.mxu1 %vm6816_vm0, %v8372_v41 }
 0x45b   : > { %v3558_v16 = vpop.f32.mrb[48].mxu1 }
 0x45c   : > { %v3646_v34 = vadd.f32 %v3558_v16, %v8325_v1  ;;  %v3926_v46 = vpop.f32.mrb[132].mxu0  ;;  %v6107_v20 = vpop.f32.mrb[49].mxu1 }
 0x45d   : > { %v6207_v29 = vpop.f32.mrb[133].mxu0  ;;  %v3561_v28 = vpop.f32.mrb[50].mxu1 }
 0x45e   : > { %v8494_v17 = vadd.f32 %v3926_v46, %v3646_v34  ;;  %v3647_v9 = vadd.f32 %v3561_v28, %v8328_v31  ;;  %v3929_v54 = vpop.f32.mrb[134].mxu0  ;;  %v6108_v12 = vpop.f32.mrb[51].mxu1 }
 0x45f   : > { %v6208_v36 = vpop.f32.mrb[135].mxu0 }
 0x460   : > { %v8497_v52 = vadd.f32 %v3929_v54, %v3647_v9  ;;  %6330 = vmatmul.mubr.bf16.gmra.mrb[156].mxu1 %v4089_v49 }
 0x461   : > { %6333 = vmatprep.mubr.msk.bf16.mxu1 %vm6816_vm0, %v8372_v41 }
 0x463   : > { %v3566_v1 = vpop.f32.mrb[52].mxu1 }
 0x464   : > { %v3648_v13 = vadd.f32 %v3566_v1, %v8335_v43  ;;  %v3934_v21 = vpop.f32.mrb[136].mxu0  ;;  %v6111_v24 = vpop.f32.mrb[53].mxu1 }
 0x465   : > { %v6211_v38 = vpop.f32.mrb[137].mxu0  ;;  %v3569_v10 = vpop.f32.mrb[54].mxu1 }
 0x466   : > { %v8502_v31 = vadd.f32 %v3934_v21, %v3648_v13  ;;  %v3649_v16 = vadd.f32 %v3569_v10, %v8338_v2  ;;  %v3937_v51 = vpop.f32.mrb[138].mxu0  ;;  %v6112_v47 = vpop.f32.mrb[55].mxu1 }
 0x467   : > { %v6212_v34 = vpop.f32.mrb[139].mxu0 }
 0x468   : > { %v8505_v46 = vadd.f32 %v3937_v51, %v3649_v16  ;;  %6334 = vmatmul.mubr.bf16.gmra.mrb[160].mxu1 %v4090_v53 }
 0x46b   : > { %v3574_v41 = vpop.f32.mrb[56].mxu1 }
 0x46c   : > { %v3650_v20 = vadd.f32 %v3574_v41, %v8343_v39  ;;  %v3942_v29 = vpop.f32.mrb[140].mxu0  ;;  %v6115_v43 = vpop.f32.mrb[57].mxu1 }
 0x46d   : > { %v6215_v28 = vpop.f32.mrb[141].mxu0  ;;  %v3577_v9 = vpop.f32.mrb[58].mxu1 }
 0x46e   : > { %v8508_v54 = vadd.f32 %v3942_v29, %v3650_v20  ;;  %v3651_v12 = vadd.f32 %v3577_v9, %v8346_v35  ;;  %v3945_v49 = vpop.f32.mrb[142].mxu0  ;;  %v6116_v36 = vpop.f32.mrb[59].mxu1 }
 0x46f   : > { %v6216_v2 = vpop.f32.mrb[143].mxu0 }
 0x470   : > { %v8511_v40 = vadd.f32 %v3945_v49, %v3651_v12 }
 0x473   : > { %v3582_v1 = vpop.f32.mrb[60].mxu1 }
 0x474   : > { %v3652_v13 = vadd.f32 %v3582_v1, %v8351_v33  ;;  %v3950_v21 = vpop.f32.mrb[144].mxu0  ;;  %v6119_v24 = vpop.f32.mrb[61].mxu1 }
 0x475   : > { %v6219_v53 = vpop.f32.mrb[145].mxu0  ;;  %v3585_v39 = vpop.f32.mrb[62].mxu1 }
 0x476   : > { %v8514_v38 = vadd.f32 %v3950_v21, %v3652_v13  ;;  %v3653_v10 = vadd.f32 %v3585_v39, %v8354_v14  ;;  %v3953_v16 = vpop.f32.mrb[146].mxu0  ;;  %v6120_v51 = vpop.f32.mrb[63].mxu1 }
 0x477   : > { %v6220_v47 = vpop.f32.mrb[147].mxu0 }
 0x478   : > { %v8517_v35 = vadd.f32 %v3953_v16, %v3653_v10 }
 0x47b   : > { %v3590_v34 = vpop.f32.mrb[64].mxu1 }
 0x47c   : > { %v3654_v41 = vadd.f32 %v3590_v34, %v8359_v60  ;;  %v3958_v20 = vpop.f32.mrb[148].mxu0  ;;  %v6123_v29 = vpop.f32.mrb[65].mxu1 }
 0x47d   : > { %v6223_v43 = vpop.f32.mrb[149].mxu0  ;;  %v3593_v33 = vpop.f32.mrb[66].mxu1 }
 0x47e   : > { %v8520_v28 = vadd.f32 %v3958_v20, %v3654_v41  ;;  %v3655_v9 = vadd.f32 %v3593_v33, %v8362_v42  ;;  %v3961_v12 = vpop.f32.mrb[150].mxu0  ;;  %v6124_v49 = vpop.f32.mrb[67].mxu1 }
 0x47f   : > { %v6224_v36 = vpop.f32.mrb[151].mxu0 }
 0x480   : > { %v8523_v14 = vadd.f32 %v3961_v12, %v3655_v9 }
 0x483   : > { %v3598_v2 = vpop.f32.mrb[68].mxu1 }
 0x484   : > { %v3656_v1 = vadd.f32 %v3598_v2, %v8367_v0  ;;  %v3966_v13 = vpop.f32.mrb[152].mxu0  ;;  %v6127_v21 = vpop.f32.mrb[69].mxu1 }
 0x485   : > { %v6227_v24 = vpop.f32.mrb[153].mxu0  ;;  %v3601_v60 = vpop.f32.mrb[70].mxu1 }
 0x486   : > { %v8526_v53 = vadd.f32 %v3966_v13, %v3656_v1  ;;  %v3657_v39 = vadd.f32 %v3601_v60, %v8370_v7  ;;  %v3969_v10 = vpop.f32.mrb[154].mxu0  ;;  %v6128_v16 = vpop.f32.mrb[71].mxu1 }
 0x487   : > { %v6228_v51 = vpop.f32.mrb[155].mxu0 }
 0x488   : > { %v8529_v42 = vadd.f32 %v3969_v10, %v3657_v39 }
 0x48b   : > { %v3606_v47 = vpop.f32.mrb[72].mxu1 }
 0x48c   : > { %v3658_v34 = vadd.f32 %v3606_v47, %v8377_v19  ;;  %v3974_v41 = vpop.f32.mrb[156].mxu0  ;;  %v6131_v20 = vpop.f32.mrb[73].mxu1 }
 0x48d   : > { %v6231_v29 = vpop.f32.mrb[157].mxu0  ;;  %v3609_v0 = vpop.f32.mrb[74].mxu1 }
 0x48e   : > { %v8532_v43 = vadd.f32 %v3974_v41, %v3658_v34  ;;  %v3659_v33 = vadd.f32 %v3609_v0, %v8380_v15  ;;  %v3977_v9 = vpop.f32.mrb[158].mxu0  ;;  %v6132_v12 = vpop.f32.mrb[75].mxu1  ;;  %v8543_v15 = vld [vmem:[%s8885_s4] ss:$0 sm:$0xff] }
 0x48f   : > { %v6232_v49 = vpop.f32.mrb[159].mxu0 }
 0x490   : > { %v8535_v7 = vadd.f32 %v3977_v9, %v3659_v33 }
 0x493   : > { %v3614_v36 = vpop.f32.mrb[76].mxu1 }
 0x494   : > { %v3660_v2 = vadd.f32 %v3614_v36, %v8385_v61  ;;  %v6135_v1 = vpop.f32.mrb[77].mxu1  ;;  %v3982_v13 = vpop.f32.mrb[160].mxu0 }
 0x495   : > { %v3617_v21 = vpop.f32.mrb[78].mxu1  ;;  %v6235_v19 = vpop.f32.mrb[161].mxu0 }
 0x496   : > { %v8538_v24 = vadd.f32 %v3982_v13, %v3660_v2  ;;  %v6136_v60 = vpop.f32.mrb[79].mxu1  ;;  %v3985_v39 = vpop.f32.mrb[162].mxu0 }
 0x497   : > { %v6236_v10 = vpop.f32.mrb[163].mxu0 }
 0x49b   : > { %v4190_v16 = vpop.f32.mrb[80].mxu1 }
 0x49c   : > { %v4356_v51 = vadd.f32 %v4190_v16, %v8390_v6  ;;  %v6255_v47 = vpop.f32.mrb[81].mxu1 }
 0x49d   : > { %v4193_v34 = vpop.f32.mrb[82].mxu1 }
 0x49e   : > { %v8547_v61 = vadd.f32 %v8543_v15, %v4356_v51  ;;  %v4357_v41 = vadd.f32 %v4193_v34, %v8393_v3  ;;  %v6256_v20 = vpop.f32.mrb[83].mxu1 }
 0x4a0   : > { %v4445_v29 = vsub.f32 0.0, %v8547_v61  ;;  %v8552_v0 = vadd.f32 %v8543_v15, %v4357_v41 }
 0x4a2   : > { %v4486_v33 = vmul.f32 1.442695, %v4445_v29  ;;  %v4446_v9 = vsub.f32 0.0, %v8552_v0 }
 0x4a3   : > { %v4198_v12 = vpop.f32.mrb[84].mxu1 }
 0x4a4   : > { %6595 = vpow2.f32 %v4486_v33  ;;  %v4488_v49 = vmul.f32 1.442695, %v4446_v9  ;;  %v4358_v6 = vadd.f32 %v4198_v12, %v8398_v4  ;;  %v6259_v36 = vpop.f32.mrb[85].mxu1 }
 0x4a5   : > { %v4201_v2 = vpop.f32.mrb[86].mxu1 }
 0x4a6   : > { %6597 = vpow2.f32 %v4488_v49  ;;  %v8557_v1 = vadd.f32 %v8543_v15, %v4358_v6  ;;  %v4359_v3 = vadd.f32 %v4201_v2, %v8401_v50  ;;  %v6260_v13 = vpop.f32.mrb[87].mxu1 }
 0x4a8   : > { %v4447_v21 = vsub.f32 0.0, %v8557_v1  ;;  %v8562_v19 = vadd.f32 %v8543_v15, %v4359_v3 }
 0x4aa   : > { %v4490_v60 = vmul.f32 1.442695, %v4447_v21  ;;  %v4448_v39 = vsub.f32 0.0, %v8562_v19 }
 0x4ab   : > { %v4206_v10 = vpop.f32.mrb[88].mxu1 }
 0x4ac   : > { %6599 = vpow2.f32 %v4490_v60  ;;  %v4492_v4 = vmul.f32 1.442695, %v4448_v39  ;;  %v4360_v16 = vadd.f32 %v4206_v10, %v8406_v59  ;;  %v6263_v51 = vpop.f32.mrb[89].mxu1 }
 0x4ad   : > { %v4209_v47 = vpop.f32.mrb[90].mxu1 }
 0x4ae   : > { %v6596_v34 = vpop.eup %6595  ;;  %6601 = vpow2.f32 %v4492_v4  ;;  %v8567_v50 = vadd.f32 %v8543_v15, %v4360_v16  ;;  %v4361_v41 = vadd.f32 %v4209_v47, %v8409_v37  ;;  %v6264_v20 = vpop.f32.mrb[91].mxu1 }
 0x4af   : > { %v4568_v29 = vadd.f32 1.0, %v6596_v34 }
 0x4b0   : > { %v6598_v33 = vpop.eup %6597  ;;  %v4449_v9 = vsub.f32 0.0, %v8567_v50  ;;  %v8572_v12 = vadd.f32 %v8543_v15, %v4361_v41 }
 0x4b1   : > { %6603 = vrcp.f32 %v4568_v29  ;;  %v4569_v49 = vadd.f32 1.0, %v6598_v33 }
 0x4b2   : > { %v4494_v59 = vmul.f32 1.442695, %v4449_v9  ;;  %v4450_v6 = vsub.f32 0.0, %v8572_v12 }
 0x4b3   : > { %6605 = vrcp.f32 %v4569_v49  ;;  %v4214_v36 = vpop.f32.mrb[92].mxu1 }
 0x4b4   : > { %6607 = vpow2.f32 %v4494_v59  ;;  %v4496_v2 = vmul.f32 1.442695, %v4450_v6  ;;  %v4362_v3 = vadd.f32 %v4214_v36, %v8414_v57  ;;  %v6267_v37 = vpop.f32.mrb[93].mxu1 }
 0x4b5   : > { %v4217_v13 = vpop.f32.mrb[94].mxu1 }
 0x4b6   : > { %v6600_v21 = vpop.eup %6599  ;;  %6609 = vpow2.f32 %v4496_v2  ;;  %v8577_v60 = vadd.f32 %v8543_v15, %v4362_v3  ;;  %v4363_v39 = vadd.f32 %v4217_v13, %v8417_v22  ;;  %v6268_v10 = vpop.f32.mrb[95].mxu1  ;;  %v6765_v2 = vld [vmem:[%s6937_s10] sm:$0xff] }
 0x4b7   : > { %v4570_v4 = vadd.f32 1.0, %v6600_v21  ;;  %v6766_v10 = vld [vmem:[%s6937_s10 + $0x8] sm:$0xff] }
 0x4b8   : > { %v6602_v16 = vpop.eup %6601  ;;  %v4451_v51 = vsub.f32 0.0, %v8577_v60  ;;  %v8582_v47 = vadd.f32 %v8543_v15, %v4363_v39 }
 0x4b9   : > { %6611 = vrcp.f32 %v4570_v4  ;;  %v4571_v57 = vadd.f32 1.0, %v6602_v16 }
 0x4ba   : > { %v4498_v34 = vmul.f32 1.442695, %v4451_v51  ;;  %v4452_v41 = vsub.f32 0.0, %v8582_v47 }
 0x4bb   : > { %v6604_v20 = vpop.eup %6603  ;;  %6613 = vrcp.f32 %v4571_v57  ;;  %v4222_v29 = vpop.f32.mrb[96].mxu1 }
 0x4bc   : > { %v4650_v22 = vmul.f32 %v6604_v20, %v8547_v61  ;;  %6615 = vpow2.f32 %v4498_v34  ;;  %v4500_v33 = vmul.f32 1.442695, %v4452_v41  ;;  %v4364_v9 = vadd.f32 %v4222_v29, %v8422_v56  ;;  %v6271_v49 = vpop.f32.mrb[97].mxu1 }
 0x4bd   : > { %v6606_v59 = vpop.eup %6605  ;;  %v4225_v6 = vpop.f32.mrb[98].mxu1 }
 0x4be   : > { %v6608_v36 = vpop.eup %6607  ;;  %v4691_v3 = vadd.f32 %v6765_v2, %v4650_v22  ;;  %v4651_v61 = vmul.f32 %v6606_v59, %v8552_v0  ;;  %6617 = vpow2.f32 %v4500_v33  ;;  %v8597_v56 = vadd.f32 %v8543_v15, %v4364_v9  ;;  %v6272_v37 = vpop.f32.mrb[99].mxu1 }
 0x4bf   : > { %v4572_v13 = vadd.f32 1.0, %v6608_v36  ;;  %v4365_v21 = vadd.f32 %v4225_v6, %v8425_v48  ;;  %v6767_v6 = vld [vmem:[%s6937_s10 + $0x10] sm:$0xff] }
 0x4c0   : > { %v6610_v39 = vpop.eup %6609  ;;  %4732 = vst [vmem:[%s8592_s11] sm:$0xff] %v4691_v3  ;;  %v4692_v4 = vadd.f32 %v6766_v10, %v4651_v61  ;;  %v4453_v16 = vsub.f32 0.0, %v8597_v56 }
 0x4c1   : > { %6619 = vrcp.f32 %v4572_v13  ;;  %v4573_v51 = vadd.f32 1.0, %v6610_v39  ;;  %v8604_v57 = vadd.f32 %v8543_v15, %v4365_v21  ;;  %v6768_v13 = vld [vmem:[%s6937_s10 + $0x18] sm:$0xff] }
 0x4c2   : > { %4733 = vst [vmem:[%s8592_s11 + $0x8] sm:$0xff] %v4692_v4  ;;  %v4502_v0 = vmul.f32 1.442695, %v4453_v16 }
 0x4c3   : > { %v6612_v34 = vpop.eup %6611  ;;  %6621 = vrcp.f32 %v4573_v51  ;;  %v4454_v41 = vsub.f32 0.0, %v8604_v57  ;;  %v4230_v20 = vpop.f32.mrb[100].mxu1 }
 0x4c4   : > { %v4652_v48 = vmul.f32 %v6612_v34, %v8557_v1  ;;  %6623 = vpow2.f32 %v4502_v0  ;;  %v4366_v29 = vadd.f32 %v4230_v20, %v8430_v25  ;;  %v6275_v22 = vpop.f32.mrb[101].mxu1 }
 0x4c5   : > { %v6614_v33 = vpop.eup %6613  ;;  %v4504_v9 = vmul.f32 1.442695, %v4454_v41  ;;  %v4233_v49 = vpop.f32.mrb[102].mxu1 }
 0x4c6   : > { %v6616_v59 = vpop.eup %6615  ;;  %v4693_v36 = vadd.f32 %v6767_v6, %v4652_v48  ;;  %v4653_v2 = vmul.f32 %v6614_v33, %v8562_v19  ;;  %v8613_v3 = vadd.f32 %v8543_v15, %v4366_v29  ;;  %v4367_v1 = vadd.f32 %v4233_v49, %v8433_v63  ;;  %v6276_v61 = vpop.f32.mrb[103].mxu1  ;;  %v6769_v33 = vld [vmem:[%s6937_s10 + $0x20] sm:$0xff] }
 0x4c7   : > { %v4574_v37 = vadd.f32 1.0, %v6616_v59  ;;  %6625 = vpow2.f32 %v4504_v9 }
 0x4c8   : > { %v6618_v25 = vpop.eup %6617  ;;  %4734 = vst [vmem:[%s8592_s11 + $0x10] sm:$0xff] %v4693_v36  ;;  %v4694_v21 = vadd.f32 %v6768_v13, %v4653_v2  ;;  %v4455_v39 = vsub.f32 0.0, %v8613_v3  ;;  %v8620_v10 = vadd.f32 %v8543_v15, %v4367_v1  ;;  %v6770_v2 = vld [vmem:[%s6937_s10 + $0x28] sm:$0xff] }
 0x4c9   : > { %6627 = vrcp.f32 %v4574_v37  ;;  %v4575_v19 = vadd.f32 1.0, %v6618_v25 }
 0x4ca   : > { %4735 = vst [vmem:[%s8592_s11 + $0x18] sm:$0xff] %v4694_v21  ;;  %v4506_v4 = vmul.f32 1.442695, %v4455_v39  ;;  %v4456_v16 = vsub.f32 0.0, %v8620_v10 }
 0x4cb   : > { %v6620_v63 = vpop.eup %6619  ;;  %6629 = vrcp.f32 %v4575_v19  ;;  %v4238_v51 = vpop.f32.mrb[104].mxu1 }
 0x4cc   : > { %v4654_v0 = vmul.f32 %v6620_v63, %v8567_v50  ;;  %6631 = vpow2.f32 %v4506_v4  ;;  %v4508_v34 = vmul.f32 1.442695, %v4456_v16  ;;  %v4368_v41 = vadd.f32 %v4238_v51, %v8438_v26  ;;  %v6279_v20 = vpop.f32.mrb[105].mxu1 }
 0x4cd   : > { %v6622_v48 = vpop.eup %6621  ;;  %v4241_v29 = vpop.f32.mrb[106].mxu1 }
 0x4ce   : > { %v6624_v22 = vpop.eup %6623  ;;  %v4695_v9 = vadd.f32 %v6769_v33, %v4654_v0  ;;  %v4655_v49 = vmul.f32 %v6622_v48, %v8572_v12  ;;  %6633 = vpow2.f32 %v4508_v34  ;;  %v8629_v59 = vadd.f32 %v8543_v15, %v4368_v41  ;;  %v6280_v50 = vpop.f32.mrb[107].mxu1  ;;  %v6771_v34 = vld [vmem:[%s6937_s10 + $0x30] sm:$0xff]  ;;  %v6772_v33 = vld [vmem:[%s6937_s10 + $0x38] sm:$0xff] }
 0x4cf   : > { %v4576_v6 = vadd.f32 1.0, %v6624_v22  ;;  %v4369_v36 = vadd.f32 %v4241_v29, %v8441_v44 }
 0x4d0   : > { %4736 = vst [vmem:[%s8592_s11 + $0x20] sm:$0xff] %v4695_v9  ;;  %v4696_v26 = vadd.f32 %v6770_v2, %v4655_v49  ;;  %v4457_v1 = vsub.f32 0.0, %v8629_v59 }
 0x4d1   : > { %v6626_v61 = vpop.eup %6625  ;;  %6635 = vrcp.f32 %v4576_v6  ;;  %v8636_v37 = vadd.f32 %v8543_v15, %v4369_v36 }
 0x4d2   : > { %4737 = vst [vmem:[%s8592_s11 + $0x28] sm:$0xff] %v4696_v26  ;;  %v4577_v12 = vadd.f32 1.0, %v6626_v61  ;;  %v4510_v25 = vmul.f32 1.442695, %v4457_v1 }
 0x4d3   : > { %v6628_v13 = vpop.eup %6627  ;;  %v4458_v21 = vsub.f32 0.0, %v8636_v37  ;;  %v4246_v39 = vpop.f32.mrb[108].mxu1 }
 0x4d4   : > { %v4656_v44 = vmul.f32 %v6628_v13, %v8577_v60  ;;  %6637 = vrcp.f32 %v4577_v12  ;;  %v4370_v19 = vadd.f32 %v4246_v39, %v8446_v23  ;;  %v6283_v4 = vpop.f32.mrb[109].mxu1 }
 0x4d5   : > { %v6630_v16 = vpop.eup %6629  ;;  %6639 = vpow2.f32 %v4510_v25  ;;  %v4512_v63 = vmul.f32 1.442695, %v4458_v21  ;;  %v4249_v51 = vpop.f32.mrb[110].mxu1  ;;  %v6773_v21 = vld [vmem:[%s6937_s10 + $0x40] sm:$0xff] }
 0x4d6   : > { %v6632_v0 = vpop.eup %6631  ;;  %v4697_v41 = vadd.f32 %v6771_v34, %v4656_v44  ;;  %v4657_v20 = vmul.f32 %v6630_v16, %v8582_v47  ;;  %v8645_v48 = vadd.f32 %v8543_v15, %v4370_v19  ;;  %v4371_v60 = vadd.f32 %v4249_v51, %v8449_v8  ;;  %v6284_v29 = vpop.f32.mrb[111].mxu1  ;;  %v6774_v34 = vld [vmem:[%s6937_s10 + $0x48] sm:$0xff] }
 0x4d7   : > { %v4578_v23 = vadd.f32 1.0, %v6632_v0  ;;  %6641 = vpow2.f32 %v4512_v63 }
 0x4d8   : > { %v6634_v22 = vpop.eup %6633  ;;  %4738 = vst [vmem:[%s8592_s11 + $0x30] sm:$0xff] %v4697_v41  ;;  %v4698_v9 = vadd.f32 %v6772_v33, %v4657_v20  ;;  %v4459_v49 = vsub.f32 0.0, %v8645_v48  ;;  %v8652_v50 = vadd.f32 %v8543_v15, %v4371_v60 }
 0x4d9   : > { %6643 = vrcp.f32 %v4578_v23  ;;  %v4579_v47 = vadd.f32 1.0, %v6634_v22 }
 0x4da   : > { %4739 = vst [vmem:[%s8592_s11 + $0x38] sm:$0xff] %v4698_v9  ;;  %v4514_v6 = vmul.f32 1.442695, %v4459_v49  ;;  %v4460_v36 = vsub.f32 0.0, %v8652_v50 }
 0x4db   : > { %v6636_v8 = vpop.eup %6635  ;;  %6645 = vrcp.f32 %v4579_v47  ;;  %v4254_v2 = vpop.f32.mrb[112].mxu1 }
 0x4dc   : > { %v4658_v26 = vmul.f32 %v6636_v8, %v8597_v56  ;;  %6647 = vpow2.f32 %v4514_v6  ;;  %v4516_v1 = vmul.f32 1.442695, %v4460_v36  ;;  %v4372_v61 = vadd.f32 %v4254_v2, %v8454_v62  ;;  %v6287_v12 = vpop.f32.mrb[113].mxu1  ;;  %v6775_v36 = vld [vmem:[%s6937_s10 + $0x50] sm:$0xff] }
 0x4dd   : > { %v4257_v25 = vpop.f32.mrb[114].mxu1  ;;  %v6776_v12 = vld [vmem:[%s6937_s10 + $0x58] sm:$0xff] }
 0x4de   : > { %v6638_v13 = vpop.eup %6637  ;;  %v4699_v39 = vadd.f32 %v6773_v21, %v4658_v26  ;;  %6649 = vpow2.f32 %v4516_v1  ;;  %v8660_v44 = vadd.f32 %v8543_v15, %v4372_v61  ;;  %v4373_v19 = vadd.f32 %v4257_v25, %v8457_v55  ;;  %v6288_v4 = vpop.f32.mrb[115].mxu1 }
 0x4df   : > { %v6640_v16 = vpop.eup %6639  ;;  %v4659_v56 = vmul.f32 %v6638_v13, %v8604_v57 }
 0x4e0   : > { %4740 = vst [vmem:[%s8592_s11 + $0x40] sm:$0xff] %v4699_v39  ;;  %v4580_v63 = vadd.f32 1.0, %v6640_v16  ;;  %v4461_v62 = vsub.f32 0.0, %v8660_v44  ;;  %v8667_v51 = vadd.f32 %v8543_v15, %v4373_v19 }
 0x4e1   : > { %v6642_v0 = vpop.eup %6641  ;;  %v4700_v41 = vadd.f32 %v6774_v34, %v4659_v56 }
 0x4e2   : > { %6651 = vrcp.f32 %v4580_v63  ;;  %v4581_v20 = vadd.f32 1.0, %v6642_v0  ;;  %v4518_v60 = vmul.f32 1.442695, %v4461_v62  ;;  %v4462_v55 = vsub.f32 0.0, %v8667_v51 }
 0x4e3   : > { %v6644_v29 = vpop.eup %6643  ;;  %4741 = vst [vmem:[%s8592_s11 + $0x48] sm:$0xff] %v4700_v41  ;;  %v4262_v23 = vpop.f32.mrb[116].mxu1 }
 0x4e4   : > { %v4660_v57 = vmul.f32 %v6644_v29, %v8613_v3  ;;  %6653 = vrcp.f32 %v4581_v20  ;;  %v4520_v22 = vmul.f32 1.442695, %v4462_v55  ;;  %v4374_v33 = vadd.f32 %v4262_v23, %v8462_v45  ;;  %v6291_v9 = vpop.f32.mrb[117].mxu1  ;;  %v6777_v29 = vld [vmem:[%s6937_s10 + $0x60] sm:$0xff] }
 0x4e5   : > { %v6646_v49 = vpop.eup %6645  ;;  %6655 = vpow2.f32 %v4518_v60  ;;  %v4265_v47 = vpop.f32.mrb[118].mxu1  ;;  %v6778_v9 = vld [vmem:[%s6937_s10 + $0x68] sm:$0xff] }
 0x4e6   : > { %v6648_v6 = vpop.eup %6647  ;;  %v4701_v8 = vadd.f32 %v6775_v36, %v4660_v57  ;;  %v4661_v2 = vmul.f32 %v6646_v49, %v8620_v10  ;;  %6657 = vpow2.f32 %v4520_v22  ;;  %v8677_v26 = vadd.f32 %v8543_v15, %v4374_v33  ;;  %v6292_v3 = vpop.f32.mrb[119].mxu1 }
 0x4e7   : > { %v4582_v1 = vadd.f32 1.0, %v6648_v6  ;;  %v4375_v61 = vadd.f32 %v4265_v47, %v8465_v18 }
 0x4e8   : > { %v6650_v45 = vpop.eup %6649  ;;  %4742 = vst [vmem:[%s8592_s11 + $0x50] sm:$0xff] %v4701_v8  ;;  %v4702_v25 = vadd.f32 %v6776_v12, %v4661_v2  ;;  %v4463_v13 = vsub.f32 0.0, %v8677_v26 }
 0x4e9   : > { %6659 = vrcp.f32 %v4582_v1  ;;  %v4583_v21 = vadd.f32 1.0, %v6650_v45  ;;  %v8684_v39 = vadd.f32 %v8543_v15, %v4375_v61 }
 0x4ea   : > { %4743 = vst [vmem:[%s8592_s11 + $0x58] sm:$0xff] %v4702_v25  ;;  %v4522_v10 = vmul.f32 1.442695, %v4463_v13  ;;  %v6779_v25 = vld [vmem:[%s6937_s10 + $0x70] sm:$0xff] }
 0x4eb   : > { %6661 = vrcp.f32 %v4583_v21  ;;  %v4464_v19 = vsub.f32 0.0, %v8684_v39  ;;  %v4270_v4 = vpop.f32.mrb[120].mxu1 }
 0x4ec   : > { %v6652_v16 = vpop.eup %6651  ;;  %6663 = vpow2.f32 %v4522_v10  ;;  %v4376_v18 = vadd.f32 %v4270_v4, %v8470_v11  ;;  %v6295_v56 = vpop.f32.mrb[121].mxu1 }
 0x4ed   : > { %v4662_v63 = vmul.f32 %v6652_v16, %v8629_v59  ;;  %v4524_v62 = vmul.f32 1.442695, %v4464_v19  ;;  %v4273_v0 = vpop.f32.mrb[122].mxu1  ;;  %v6780_v16 = vld [vmem:[%s6937_s10 + $0x78] sm:$0xff] }
 0x4ee   : > { %v6654_v34 = vpop.eup %6653  ;;  %v8691_v41 = vadd.f32 %v8543_v15, %v4376_v18  ;;  %v4377_v20 = vadd.f32 %v4273_v0, %v8473_v27  ;;  %v6296_v60 = vpop.f32.mrb[123].mxu1 }
 0x4ef   : > { %v6656_v55 = vpop.eup %6655  ;;  %v4703_v23 = vadd.f32 %v6777_v29, %v4662_v63  ;;  %v4663_v11 = vmul.f32 %v6654_v34, %v8636_v37  ;;  %6665 = vpow2.f32 %v4524_v62 }
 0x4f0   : > { %v6658_v57 = vpop.eup %6657  ;;  %v4584_v59 = vadd.f32 1.0, %v6656_v55  ;;  %v4465_v22 = vsub.f32 0.0, %v8691_v41  ;;  %v8698_v33 = vadd.f32 %v8543_v15, %v4377_v20 }
 0x4f1   : > { %4744 = vst [vmem:[%s8592_s11 + $0x60] sm:$0xff] %v4703_v23  ;;  %v4704_v49 = vadd.f32 %v6778_v9, %v4663_v11  ;;  %v4585_v47 = vadd.f32 1.0, %v6658_v57 }
 0x4f2   : > { %6667 = vrcp.f32 %v4584_v59  ;;  %v4526_v27 = vmul.f32 1.442695, %v4465_v22  ;;  %v4466_v6 = vsub.f32 0.0, %v8698_v33 }
 0x4f3   : > { %v6660_v36 = vpop.eup %6659  ;;  %4745 = vst [vmem:[%s8592_s11 + $0x68] sm:$0xff] %v4704_v49  ;;  %6669 = vrcp.f32 %v4585_v47  ;;  %v4278_v37 = vpop.f32.mrb[124].mxu1 }
 0x4f4   : > { %v4664_v8 = vmul.f32 %v6660_v36, %v8645_v48  ;;  %6671 = vpow2.f32 %v4526_v27  ;;  %v4528_v2 = vmul.f32 1.442695, %v4466_v6  ;;  %v4378_v3 = vadd.f32 %v4278_v37, %v8478_v5  ;;  %v6299_v1 = vpop.f32.mrb[125].mxu1 }
 0x4f5   : > { %v6662_v61 = vpop.eup %6661  ;;  %v4281_v45 = vpop.f32.mrb[126].mxu1 }
 0x4f6   : > { %v6664_v12 = vpop.eup %6663  ;;  %v4705_v13 = vadd.f32 %v6779_v25, %v4664_v8  ;;  %v4665_v21 = vmul.f32 %v6662_v61, %v8652_v50  ;;  %6673 = vpow2.f32 %v4528_v2  ;;  %v8709_v10 = vadd.f32 %v8543_v15, %v4378_v3  ;;  %v6300_v48 = vpop.f32.mrb[127].mxu1 }
 0x4f7   : > { %v4586_v19 = vadd.f32 1.0, %v6664_v12  ;;  %v4379_v4 = vadd.f32 %v4281_v45, %v8481_v32  ;;  %v6783_v48 = vld [vmem:[%s6937_s10 + $0x90] sm:$0xff] }
 0x4f8   : > { %4746 = vst [vmem:[%s8592_s11 + $0x70] sm:$0xff] %v4705_v13  ;;  %v4706_v5 = vadd.f32 %v6780_v16, %v4665_v21  ;;  %v4467_v18 = vsub.f32 0.0, %v8709_v10 }
 0x4f9   : > { %v6666_v56 = vpop.eup %6665  ;;  %6675 = vrcp.f32 %v4586_v19  ;;  %v8716_v63 = vadd.f32 %v8543_v15, %v4379_v4 }
 0x4fa   : > { %4747 = vst [vmem:[%s8592_s11 + $0x78] sm:$0xff] %v4706_v5  ;;  %v4587_v50 = vadd.f32 1.0, %v6666_v56  ;;  %v4530_v62 = vmul.f32 1.442695, %v4467_v18 }
 0x4fb   : > { %v4468_v0 = vsub.f32 0.0, %v8716_v63  ;;  %v4286_v34 = vpop.f32.mrb[128].mxu1 }
 0x4fc   : > { %v6668_v20 = vpop.eup %6667  ;;  %6677 = vrcp.f32 %v4587_v50  ;;  %v4380_v32 = vadd.f32 %v4286_v34, %v8486_v30  ;;  %v6303_v60 = vpop.f32.mrb[129].mxu1  ;;  %v6781_v30 = vld [vmem:[%s6937_s10 + $0x80] sm:$0xff] }
 0x4fd   : > { %v6670_v55 = vpop.eup %6669  ;;  %v4666_v29 = vmul.f32 %v6668_v20, %v8660_v44  ;;  %6679 = vpow2.f32 %v4530_v62  ;;  %v4532_v23 = vmul.f32 1.442695, %v4468_v0  ;;  %v4289_v11 = vpop.f32.mrb[130].mxu1  ;;  %v6782_v44 = vld [vmem:[%s6937_s10 + $0x88] sm:$0xff]  ;;  %v6784_v0 = vld [vmem:[%s6937_s10 + $0x98] sm:$0xff] }
 0x4fe   : > { %v6672_v57 = vpop.eup %6671  ;;  %v4667_v59 = vmul.f32 %v6670_v55, %v8667_v51  ;;  %v8724_v22 = vadd.f32 %v8543_v15, %v4380_v32  ;;  %v4381_v9 = vadd.f32 %v4289_v11, %v8489_v58  ;;  %v6304_v49 = vpop.f32.mrb[131].mxu1 }
 0x4ff   : > { %v4707_v47 = vadd.f32 %v6781_v30, %v4666_v29  ;;  %v4588_v27 = vadd.f32 1.0, %v6672_v57  ;;  %6681 = vpow2.f32 %v4532_v23  ;;  %v6785_v49 = vld [vmem:[%s6937_s10 + $0xa0] sm:$0xff] }
 0x500   : > { %v6674_v6 = vpop.eup %6673  ;;  %v4708_v36 = vadd.f32 %v6782_v44, %v4667_v59  ;;  %v4469_v37 = vsub.f32 0.0, %v8724_v22  ;;  %v8731_v8 = vadd.f32 %v8543_v15, %v4381_v9 }
 0x501   : > { %4748 = vst [vmem:[%s8592_s11 + $0x80] sm:$0xff] %v4707_v47  ;;  %6683 = vrcp.f32 %v4588_v27  ;;  %v4589_v51 = vadd.f32 1.0, %v6674_v6 }
 0x502   : > { %4749 = vst [vmem:[%s8592_s11 + $0x88] sm:$0xff] %v4708_v36  ;;  %v4534_v2 = vmul.f32 1.442695, %v4469_v37  ;;  %v4470_v58 = vsub.f32 0.0, %v8731_v8  ;;  %v6786_v36 = vld [vmem:[%s6937_s10 + $0xa8] sm:$0xff] }
 0x503   : > { %v6676_v3 = vpop.eup %6675  ;;  %6685 = vrcp.f32 %v4589_v51  ;;  %v4294_v1 = vpop.f32.mrb[132].mxu1 }
 0x504   : > { %v4668_v61 = vmul.f32 %v6676_v3, %v8677_v26  ;;  %6687 = vpow2.f32 %v4534_v2  ;;  %v4536_v45 = vmul.f32 1.442695, %v4470_v58  ;;  %v4382_v12 = vadd.f32 %v4294_v1, %v8494_v17  ;;  %v6307_v25 = vpop.f32.mrb[133].mxu1 }
 0x505   : > { %v4297_v13 = vpop.f32.mrb[134].mxu1 }
 0x506   : > { %v6678_v21 = vpop.eup %6677  ;;  %v4709_v19 = vadd.f32 %v6783_v48, %v4668_v61  ;;  %6689 = vpow2.f32 %v4536_v45  ;;  %v8740_v4 = vadd.f32 %v8543_v15, %v4382_v12  ;;  %v4383_v16 = vadd.f32 %v4297_v13, %v8497_v52  ;;  %v6308_v5 = vpop.f32.mrb[135].mxu1 }
 0x507   : > { %v6680_v18 = vpop.eup %6679  ;;  %v4669_v26 = vmul.f32 %v6678_v21, %v8684_v39 }
 0x508   : > { %4750 = vst [vmem:[%s8592_s11 + $0x90] sm:$0xff] %v4709_v19  ;;  %v4590_v56 = vadd.f32 1.0, %v6680_v18  ;;  %v4471_v17 = vsub.f32 0.0, %v8740_v4  ;;  %v8747_v50 = vadd.f32 %v8543_v15, %v4383_v16  ;;  %v6787_v18 = vld [vmem:[%s6937_s10 + $0xb0] sm:$0xff] }
 0x509   : > { %v6682_v62 = vpop.eup %6681  ;;  %v4710_v34 = vadd.f32 %v6784_v0, %v4669_v26  ;;  %v6788_v0 = vld [vmem:[%s6937_s10 + $0xb8] sm:$0xff] }
 0x50a   : > { %6691 = vrcp.f32 %v4590_v56  ;;  %v4591_v20 = vadd.f32 1.0, %v6682_v62  ;;  %v4538_v32 = vmul.f32 1.442695, %v4471_v17  ;;  %v4472_v52 = vsub.f32 0.0, %v8747_v50 }
 0x50b   : > { %v6684_v60 = vpop.eup %6683  ;;  %4751 = vst [vmem:[%s8592_s11 + $0x98] sm:$0xff] %v4710_v34  ;;  %v4302_v55 = vpop.f32.mrb[136].mxu1 }
 0x50c   : > { %v4670_v39 = vmul.f32 %v6684_v60, %v8691_v41  ;;  %6693 = vrcp.f32 %v4591_v20  ;;  %v4540_v29 = vmul.f32 1.442695, %v4472_v52  ;;  %v4384_v23 = vadd.f32 %v4302_v55, %v8502_v31  ;;  %v6311_v11 = vpop.f32.mrb[137].mxu1 }
 0x50d   : > { %v6686_v57 = vpop.eup %6685  ;;  %6695 = vpow2.f32 %v4538_v32  ;;  %v4305_v59 = vpop.f32.mrb[138].mxu1 }
 0x50e   : > { %v6688_v9 = vpop.eup %6687  ;;  %v4711_v30 = vadd.f32 %v6785_v49, %v4670_v39  ;;  %v4671_v47 = vmul.f32 %v6686_v57, %v8698_v33  ;;  %6697 = vpow2.f32 %v4540_v29  ;;  %v8757_v27 = vadd.f32 %v8543_v15, %v4384_v23  ;;  %v6312_v41 = vpop.f32.mrb[139].mxu1 }
 0x50f   : > { %v4592_v6 = vadd.f32 1.0, %v6688_v9  ;;  %v4385_v44 = vadd.f32 %v4305_v59, %v8505_v46  ;;  %v6789_v59 = vld [vmem:[%s6937_s10 + $0xc0] sm:$0xff] }
 0x510   : > { %v6690_v31 = vpop.eup %6689  ;;  %4752 = vst [vmem:[%s8592_s11 + $0xa0] sm:$0xff] %v4711_v30  ;;  %v4712_v37 = vadd.f32 %v6786_v36, %v4671_v47  ;;  %v4473_v51 = vsub.f32 0.0, %v8757_v27 }
 0x511   : > { %6699 = vrcp.f32 %v4592_v6  ;;  %v4593_v2 = vadd.f32 1.0, %v6690_v31  ;;  %v8764_v58 = vadd.f32 %v8543_v15, %v4385_v44  ;;  %v6790_v6 = vld [vmem:[%s6937_s10 + $0xc8] sm:$0xff] }
 0x512   : > { %4753 = vst [vmem:[%s8592_s11 + $0xa8] sm:$0xff] %v4712_v37  ;;  %v4542_v33 = vmul.f32 1.442695, %v4473_v51 }
 0x513   : > { %6701 = vrcp.f32 %v4593_v2  ;;  %v4474_v3 = vsub.f32 0.0, %v8764_v58  ;;  %v4310_v1 = vpop.f32.mrb[140].mxu1 }
 0x514   : > { %v6692_v61 = vpop.eup %6691  ;;  %6703 = vpow2.f32 %v4542_v33  ;;  %v4386_v46 = vadd.f32 %v4310_v1, %v8508_v54  ;;  %v6315_v45 = vpop.f32.mrb[141].mxu1 }
 0x515   : > { %v4672_v12 = vmul.f32 %v6692_v61, %v8709_v10  ;;  %v4544_v25 = vmul.f32 1.442695, %v4474_v3  ;;  %v4313_v13 = vpop.f32.mrb[142].mxu1 }
 0x516   : > { %v6694_v21 = vpop.eup %6693  ;;  %v8771_v48 = vadd.f32 %v8543_v15, %v4386_v46  ;;  %v4387_v19 = vadd.f32 %v4313_v13, %v8511_v40  ;;  %v6316_v16 = vpop.f32.mrb[143].mxu1 }
 0x517   : > { %v6696_v5 = vpop.eup %6695  ;;  %v4713_v26 = vadd.f32 %v6787_v18, %v4672_v12  ;;  %v4673_v54 = vmul.f32 %v6694_v21, %v8716_v63  ;;  %6705 = vpow2.f32 %v4544_v25 }
 0x518   : > { %v6698_v56 = vpop.eup %6697  ;;  %v4594_v10 = vadd.f32 1.0, %v6696_v5  ;;  %v4475_v17 = vsub.f32 0.0, %v8771_v48  ;;  %v8778_v62 = vadd.f32 %v8543_v15, %v4387_v19 }
 0x519   : > { %4754 = vst [vmem:[%s8592_s11 + $0xb0] sm:$0xff] %v4713_v26  ;;  %v4714_v34 = vadd.f32 %v6788_v0, %v4673_v54  ;;  %v4595_v20 = vadd.f32 1.0, %v6698_v56 }
 0x51a   : > { %6707 = vrcp.f32 %v4594_v10  ;;  %v4546_v40 = vmul.f32 1.442695, %v4475_v17  ;;  %v4476_v32 = vsub.f32 0.0, %v8778_v62 }
 0x51b   : > { %v6700_v52 = vpop.eup %6699  ;;  %4755 = vst [vmem:[%s8592_s11 + $0xb8] sm:$0xff] %v4714_v34  ;;  %6709 = vrcp.f32 %v4595_v20  ;;  %v4318_v63 = vpop.f32.mrb[144].mxu1 }
 0x51c   : > { %v4674_v60 = vmul.f32 %v6700_v52, %v8724_v22  ;;  %6711 = vpow2.f32 %v4546_v40  ;;  %v4548_v55 = vmul.f32 1.442695, %v4476_v32  ;;  %v4388_v39 = vadd.f32 %v4318_v63, %v8514_v38  ;;  %v6319_v29 = vpop.f32.mrb[145].mxu1 }
 0x51d   : > { %v6702_v23 = vpop.eup %6701  ;;  %v4321_v11 = vpop.f32.mrb[146].mxu1 }
 0x51e   : > { %v6704_v57 = vpop.eup %6703  ;;  %v4715_v9 = vadd.f32 %v6789_v59, %v4674_v60  ;;  %v4675_v49 = vmul.f32 %v6702_v23, %v8731_v8  ;;  %6713 = vpow2.f32 %v4548_v55  ;;  %v8789_v30 = vadd.f32 %v8543_v15, %v4388_v39  ;;  %v6320_v22 = vpop.f32.mrb[147].mxu1  ;;  %v6793_v60 = vld [vmem:[%s6937_s10 + $0xe0] sm:$0xff] }
 0x51f   : > { %v4596_v47 = vadd.f32 1.0, %v6704_v57  ;;  %v4389_v41 = vadd.f32 %v4321_v11, %v8517_v35 }
 0x520   : > { %4756 = vst [vmem:[%s8592_s11 + $0xc0] sm:$0xff] %v4715_v9  ;;  %v4716_v38 = vadd.f32 %v6790_v6, %v4675_v49  ;;  %v4477_v44 = vsub.f32 0.0, %v8789_v30  ;;  %v6794_v49 = vld [vmem:[%s6937_s10 + $0xe8] sm:$0xff] }
 0x521   : > { %v6706_v31 = vpop.eup %6705  ;;  %6715 = vrcp.f32 %v4596_v47  ;;  %v8796_v36 = vadd.f32 %v8543_v15, %v4389_v41 }
 0x522   : > { %4757 = vst [vmem:[%s8592_s11 + $0xc8] sm:$0xff] %v4716_v38  ;;  %v4597_v8 = vadd.f32 1.0, %v6706_v31  ;;  %v4550_v37 = vmul.f32 1.442695, %v4477_v44 }
 0x523   : > { %v4478_v51 = vsub.f32 0.0, %v8796_v36  ;;  %v4326_v2 = vpop.f32.mrb[148].mxu1 }
 0x524   : > { %v6708_v33 = vpop.eup %6707  ;;  %6717 = vrcp.f32 %v4597_v8  ;;  %v4390_v35 = vadd.f32 %v4326_v2, %v8520_v28  ;;  %v6323_v3 = vpop.f32.mrb[149].mxu1  ;;  %v6791_v28 = vld [vmem:[%s6937_s10 + $0xd0] sm:$0xff] }
 0x525   : > { %v6710_v1 = vpop.eup %6709  ;;  %v4676_v61 = vmul.f32 %v6708_v33, %v8740_v4  ;;  %6719 = vpow2.f32 %v4550_v37  ;;  %v4552_v46 = vmul.f32 1.442695, %v4478_v51  ;;  %v4329_v45 = vpop.f32.mrb[150].mxu1  ;;  %v6792_v4 = vld [vmem:[%s6937_s10 + $0xd8] sm:$0xff]  ;;  %v6795_v33 = vld [vmem:[%s6937_s10 + $0xf0] sm:$0xff] }
 0x526   : > { %v6712_v12 = vpop.eup %6711  ;;  %v4677_v25 = vmul.f32 %v6710_v1, %v8747_v50  ;;  %v8804_v13 = vadd.f32 %v8543_v15, %v4390_v35  ;;  %v4391_v21 = vadd.f32 %v4329_v45, %v8523_v14  ;;  %v6324_v19 = vpop.f32.mrb[151].mxu1  ;;  %v6796_v45 = vld [vmem:[%s6937_s10 + $0xf8] sm:$0xff] }
 0x527   : > { %v4717_v16 = vadd.f32 %v6791_v28, %v4676_v61  ;;  %v4598_v5 = vadd.f32 1.0, %v6712_v12  ;;  %6721 = vpow2.f32 %v4552_v46 }
 0x528   : > { %v6714_v18 = vpop.eup %6713  ;;  %v4718_v26 = vadd.f32 %v6792_v4, %v4677_v25  ;;  %v4479_v54 = vsub.f32 0.0, %v8804_v13  ;;  %v8811_v56 = vadd.f32 %v8543_v15, %v4391_v21 }
 0x529   : > { %4758 = vst [vmem:[%s8592_s11 + $0xd0] sm:$0xff] %v4717_v16  ;;  %6723 = vrcp.f32 %v4598_v5  ;;  %v4599_v50 = vadd.f32 1.0, %v6714_v18 }
 0x52a   : > { %4759 = vst [vmem:[%s8592_s11 + $0xd8] sm:$0xff] %v4718_v26  ;;  %v4554_v10 = vmul.f32 1.442695, %v4479_v54  ;;  %v4480_v14 = vsub.f32 0.0, %v8811_v56 }
 0x52b   : > { %v6716_v17 = vpop.eup %6715  ;;  %6725 = vrcp.f32 %v4599_v50  ;;  %v4334_v0 = vpop.f32.mrb[152].mxu1  ;;  %v6797_v50 = vld [vmem:[%s8885_s4] ss:$0 sm:$0xff] }
 0x52c   : > { %v4678_v34 = vmul.f32 %v6716_v17, %v8757_v27  ;;  %6727 = vpow2.f32 %v4554_v10  ;;  %v4556_v20 = vmul.f32 1.442695, %v4480_v14  ;;  %v4392_v40 = vadd.f32 %v4334_v0, %v8526_v53  ;;  %v6327_v32 = vpop.f32.mrb[153].mxu1  ;;  %v6798_v0 = vld [vmem:[%s6937_s10 + $0x100] sm:$0xff] }
 0x52d   : > { %v4337_v52 = vpop.f32.mrb[154].mxu1  ;;  %v6799_v32 = vld [vmem:[%s6937_s10 + $0x108] sm:$0xff] }
 0x52e   : > { %v6718_v63 = vpop.eup %6717  ;;  %v4719_v55 = vadd.f32 %v6793_v60, %v4678_v34  ;;  %6729 = vpow2.f32 %v4556_v20  ;;  %v8820_v39 = vadd.f32 %v8543_v15, %v4392_v40  ;;  %v4393_v29 = vadd.f32 %v4337_v52, %v8529_v42  ;;  %v6328_v23 = vpop.f32.mrb[155].mxu1 }
 0x52f   : > { %v6720_v11 = vpop.eup %6719  ;;  %v4679_v27 = vmul.f32 %v6718_v63, %v8764_v58 }
 0x530   : > { %4760 = vst [vmem:[%s8592_s11 + $0xe0] sm:$0xff] %v4719_v55  ;;  %v4600_v57 = vadd.f32 1.0, %v6720_v11  ;;  %v4481_v53 = vsub.f32 0.0, %v8820_v39  ;;  %v8827_v59 = vadd.f32 %v8543_v15, %v4393_v29  ;;  %v6800_v11 = vld [vmem:[%s6937_s10 + $0x110] sm:$0xff] }
 0x531   : > { %v6722_v9 = vpop.eup %6721  ;;  %v4720_v22 = vadd.f32 %v6794_v49, %v4679_v27 }
 0x532   : > { %6731 = vrcp.f32 %v4600_v57  ;;  %v4601_v47 = vadd.f32 1.0, %v6722_v9  ;;  %v4558_v41 = vmul.f32 1.442695, %v4481_v53  ;;  %v4482_v42 = vsub.f32 0.0, %v8827_v59  ;;  %v6801_v9 = vld [vmem:[%s6937_s10 + $0x118] sm:$0xff] }
 0x533   : > { %v6724_v6 = vpop.eup %6723  ;;  %4761 = vst [vmem:[%s8592_s11 + $0xe8] sm:$0xff] %v4720_v22  ;;  %v4342_v38 = vpop.f32.mrb[156].mxu1 }
 0x534   : > { %v4680_v58 = vmul.f32 %v6724_v6, %v8771_v48  ;;  %6733 = vrcp.f32 %v4601_v47  ;;  %v4560_v44 = vmul.f32 1.442695, %v4482_v42  ;;  %v4394_v31 = vadd.f32 %v4342_v38, %v8532_v43  ;;  %v6331_v8 = vpop.f32.mrb[157].mxu1  ;;  %v6802_v38 = vld [vmem:[%s6937_s10 + $0x120] sm:$0xff] }
 0x535   : > { %v6726_v37 = vpop.eup %6725  ;;  %6735 = vpow2.f32 %v4558_v41  ;;  %v4345_v51 = vpop.f32.mrb[158].mxu1 }
 0x536   : > { %v6728_v2 = vpop.eup %6727  ;;  %v4721_v35 = vadd.f32 %v6795_v33, %v4680_v58  ;;  %v4681_v3 = vmul.f32 %v6726_v37, %v8778_v62  ;;  %6737 = vpow2.f32 %v4560_v44  ;;  %v8837_v1 = vadd.f32 %v8543_v15, %v4394_v31  ;;  %v6332_v48 = vpop.f32.mrb[159].mxu1  ;;  %v6803_v31 = vld [vmem:[%s6937_s10 + $0x128] sm:$0xff] }
 0x537   : > { %v4602_v61 = vadd.f32 1.0, %v6728_v2  ;;  %v4395_v46 = vadd.f32 %v4345_v51, %v8535_v7  ;;  %v6804_v2 = vld [vmem:[%s6937_s10 + $0x130] sm:$0xff] }
 0x538   : > { %v6730_v43 = vpop.eup %6729  ;;  %4762 = vst [vmem:[%s8592_s11 + $0xf0] sm:$0xff] %v4721_v35  ;;  %v4722_v12 = vadd.f32 %v6796_v45, %v4681_v3  ;;  %v4483_v25 = vsub.f32 0.0, %v8837_v1  ;;  %v6805_v35 = vld [vmem:[%s6937_s10 + $0x138] sm:$0xff] }
 0x539   : > { %6739 = vrcp.f32 %v4602_v61  ;;  %v4603_v21 = vadd.f32 1.0, %v6730_v43  ;;  %v8844_v19 = vadd.f32 %v8543_v15, %v4395_v46  ;;  %v6806_v46 = vld [vmem:[%s6937_s10 + $0x140] sm:$0xf] }
 0x53a   : > { %4763 = vst [vmem:[%s8592_s11 + $0xf8] sm:$0xff] %v4722_v12  ;;  %v4562_v62 = vmul.f32 1.442695, %v4483_v25 }
 0x53b   : > { %6741 = vrcp.f32 %v4603_v21  ;;  %v4484_v28 = vsub.f32 0.0, %v8844_v19  ;;  %v4350_v16 = vpop.f32.mrb[160].mxu1 }
 0x53c   : > { %v6732_v5 = vpop.eup %6731  ;;  %6743 = vpow2.f32 %v4562_v62  ;;  %v4396_v7 = vadd.f32 %v4350_v16, %v8538_v24  ;;  %v6335_v18 = vpop.f32.mrb[161].mxu1 }
 0x53d   : > { %v4682_v4 = vmul.f32 %v6732_v5, %v8789_v30  ;;  %v4564_v26 = vmul.f32 1.442695, %v4484_v28  ;;  %v4353_v54 = vpop.f32.mrb[162].mxu1 }
 0x53e   : > { %v6734_v15 = vpop.eup %6733  ;;  %v4444_v10 = vadd.f32 %v6797_v50, %v4396_v7  ;;  %v6336_v14 = vpop.f32.mrb[163].mxu1 }
 0x53f   : > { %v6736_v17 = vpop.eup %6735  ;;  %v4723_v34 = vadd.f32 %v6798_v0, %v4682_v4  ;;  %v4683_v24 = vmul.f32 %v6734_v15, %v8796_v36  ;;  %6745 = vpow2.f32 %v4564_v26 }
 0x540   : > { %v6738_v20 = vpop.eup %6737  ;;  %v4604_v30 = vadd.f32 1.0, %v6736_v17  ;;  %v4485_v40 = vsub.f32 0.0, %v4444_v10 }
 0x541   : > { %4764 = vst [vmem:[%s8592_s11 + $0x100] sm:$0xff] %v4723_v34  ;;  %v4724_v52 = vadd.f32 %v6799_v32, %v4683_v24  ;;  %v4605_v63 = vadd.f32 1.0, %v6738_v20 }
 0x542   : > { %6747 = vrcp.f32 %v4604_v30  ;;  %v4566_v60 = vmul.f32 1.442695, %v4485_v40 }
 0x543   : > { %v6740_v55 = vpop.eup %6739  ;;  %4765 = vst [vmem:[%s8592_s11 + $0x108] sm:$0xff] %v4724_v52  ;;  %6749 = vrcp.f32 %v4605_v63 }
 0x544   : > { %v4684_v29 = vmul.f32 %v6740_v55, %v8804_v13  ;;  %6751 = vpow2.f32 %v4566_v60 }
 0x545   : > { %v6742_v36 = vpop.eup %6741 }
 0x546   : > { %v6744_v23 = vpop.eup %6743  ;;  %v4725_v27 = vadd.f32 %v6800_v11, %v4684_v29  ;;  %v4685_v57 = vmul.f32 %v6742_v36, %v8811_v56 }
 0x547   : > { %v4606_v53 = vadd.f32 1.0, %v6744_v23 }
 0x548   : > { %4766 = vst [vmem:[%s8592_s11 + $0x110] sm:$0xff] %v4725_v27  ;;  %v4726_v49 = vadd.f32 %v6801_v9, %v4685_v57 }
 0x549   : > { %v6746_v22 = vpop.eup %6745  ;;  %6753 = vrcp.f32 %v4606_v53 }
 0x54a   : > { %4767 = vst [vmem:[%s8592_s11 + $0x118] sm:$0xff] %v4726_v49  ;;  %v4607_v47 = vadd.f32 1.0, %v6746_v22 }
 0x54c   : > { %v6748_v13 = vpop.eup %6747  ;;  %6755 = vrcp.f32 %v4607_v47 }
 0x54d   : > { %v6750_v41 = vpop.eup %6749  ;;  %v4686_v42 = vmul.f32 %v6748_v13, %v8820_v39 }
 0x54e   : > { %v6752_v6 = vpop.eup %6751  ;;  %v4687_v56 = vmul.f32 %v6750_v41, %v8827_v59 }
 0x54f   : > { %v4727_v58 = vadd.f32 %v6802_v38, %v4686_v42  ;;  %v4608_v44 = vadd.f32 1.0, %v6752_v6 }
 0x550   : > { %v4728_v8 = vadd.f32 %v6803_v31, %v4687_v56 }
 0x551   : > { %4768 = vst [vmem:[%s8592_s11 + $0x120] sm:$0xff] %v4727_v58  ;;  %6757 = vrcp.f32 %v4608_v44 }
 0x552   : > { %4769 = vst [vmem:[%s8592_s11 + $0x128] sm:$0xff] %v4728_v8 }
 0x553   : > { %v6754_v37 = vpop.eup %6753 }
 0x554   : > { %v4688_v51 = vmul.f32 %v6754_v37, %v8837_v1 }
 0x556   : > { %v6756_v39 = vpop.eup %6755  ;;  %v4729_v33 = vadd.f32 %v6804_v2, %v4688_v51 }
 0x557   : > { %v4689_v59 = vmul.f32 %v6756_v39, %v8844_v19 }
 0x558   : > { %4770 = vst [vmem:[%s8592_s11 + $0x130] sm:$0xff] %v4729_v33 }
 0x559   : > { %v4730_v3 = vadd.f32 %v6805_v35, %v4689_v59 }
 0x55b   : > { %v6758_v48 = vpop.eup %6757  ;;  %4771 = vst [vmem:[%s8592_s11 + $0x138] sm:$0xff] %v4730_v3 }
 0x55c   : > { %v4690_v61 = vmul.f32 %v6758_v48, %v4444_v10 }
 0x55e   : > { %v4731_v43 = vadd.f32 %v6806_v46, %v4690_v61 }
 0x560   : > { %4772 = vst [vmem:[%s8592_s11 + $0x140] sm:$0xf] %v4731_v43 }
 0x561 PF: > { %s16_s21 = sadd.s32 1, %s6813_s21  }
 0x562   : > { %p13_p4 = scmp.ge.s32.totalorder %s16_s21, 4  }
 0x564   :  { %15 = sbr.rel (!%p13_p4) target bundleno = 1 (0x1), region = 82 }

</bundles_post_ra>
